<compile_context>
chip_gen: v7x
topology: tpu7x:2x2x1
jax: 0.10.0
libtpu: 0.0.40
codegen_flags: <defaults>
</compile_context>

<pallas_src>
import jax
import jax.numpy as jnp
from jax.experimental import pallas as pl
from jax.experimental.pallas import tpu as pltpu


def _zero_border(pad_ref, H, W):
    """Zero only the 1-pixel border of a (H+2, W+2, C) scratch (interior is overwritten)."""
    C = pad_ref.shape[-1]
    row = jnp.zeros((1, W + 2, C), jnp.float32)
    col = jnp.zeros((H + 2, 1, C), jnp.float32)
    pad_ref[0:1, :, :] = row
    pad_ref[H + 1:H + 2, :, :] = row
    pad_ref[:, 0:1, :] = col
    pad_ref[:, W + 1:W + 2, :] = col


def _conv3x3_bias_relu(pad_ref, w_ref, b_ref, H, W):
    """3x3 SAME conv + bias + ReLU as a single im2col matmul.

    pad_ref: (H+2, W+2, C) f32 scratch with zero border.
    w_ref:   (9*C, Cout) bf16, HWIO flattened as (ky, kx, ci).
    b_ref:   (1, Cout) f32.
    Returns  (H*W, Cout) f32.
    """
    C = pad_ref.shape[-1]
    # Hoist the 3 dx-shifted column windows once; reuse across the 3 dy row shifts.
    xw = jnp.concatenate([pad_ref[:, dx:dx + W, :] for dx in range(3)],
                         axis=-1)                                   # (H+2, W, 3C), lanes (dx, c)
    im2 = jnp.concatenate([xw[dy:dy + H] for dy in range(3)],
                          axis=-1)                                  # (H, W, 9C), lanes (dy, dx, c)
    im2 = im2.reshape(H * W, 9 * C).astype(jnp.bfloat16)
    acc = jnp.dot(im2, w_ref[...], preferred_element_type=jnp.float32)   # (H*W, Cout) f32
    return jnp.maximum(acc + b_ref[...], 0.0)


def vgg_block_kernel(x_ref, w1_ref, b1_ref, w2_ref, b2_ref, o_ref,
                     xpad_ref, h1pad_ref, rm_ref):
    # x_ref  : (H, W, Cin) bf16 (one batch element, unpadded)
    # w1_ref : (9*Cin, Cout) bf16 ; b1_ref : (1, Cout) f32
    # w2_ref : (9*Cout, Cout) bf16; b2_ref : (1, Cout) f32
    # o_ref  : (H//2, W//2, Cout) f32
    H, W, Cin = x_ref.shape
    Cout = o_ref.shape[-1]
    H2, W2 = H // 2, W // 2

    # ---- conv1 (padding=1 folded into the kernel) + bias + ReLU ----
    _zero_border(xpad_ref, H, W)
    xpad_ref[1:H + 1, 1:W + 1, :] = x_ref[...].astype(jnp.float32)
    h1 = _conv3x3_bias_relu(xpad_ref, w1_ref, b1_ref, H, W)         # (H*W, Cout) f32

    # ---- conv2 (padding=1) + bias + ReLU ----
    _zero_border(h1pad_ref, H, W)
    h1pad_ref[1:H + 1, 1:W + 1, :] = h1.reshape(H, W, Cout)
    h2 = _conv3x3_bias_relu(h1pad_ref, w2_ref, b2_ref, H, W)        # (H*W, Cout) f32

    # ---- 2x2 max pool, stride 2 ----
    # H direction: in-register, pairing rows via a major-dim split of the live value.
    h2 = h2.reshape(H2, 2, W, Cout)
    rm_ref[...] = jnp.maximum(h2[:, 0, :, :], h2[:, 1, :, :])       # (H2, W, Cout)
    # W direction: two strided reads of the small row-pooled scratch.
    o_ref[...] = jnp.maximum(rm_ref[:, pl.ds(0, W2, stride=2), :],
                             rm_ref[:, pl.ds(1, W2, stride=2), :]).astype(o_ref.dtype)


def vgg_block_forward(x_nchw, w1, b1, w2, b2):
    """Pallas implementation of VGGBlock.forward (batch_norm=False).

    x_nchw : (B, Cin, H, W) float32  — PyTorch layout
    w1     : (3, 3, Cin, Cout) HWIO ; b1 : (Cout,)
    w2     : (3, 3, Cout, Cout) HWIO; b2 : (Cout,)
    returns: (B, Cout, H//2, W//2) float32 (NCHW, matching PyTorch)
    """
    B, Cin, H, W = x_nchw.shape
    Cout = w1.shape[-1]
    assert H % 2 == 0 and W % 2 == 0 and W % 8 == 0, (H, W)
    H2, W2 = H // 2, W // 2

    # Boundary layout adaptation only (no HBM pad pass; padding is done in-kernel).
    x_nhwc = jnp.transpose(x_nchw, (0, 2, 3, 1)).astype(jnp.bfloat16)
    w1r = w1.reshape(9 * Cin, Cout).astype(jnp.bfloat16)            # (ky, kx, ci) flattened
    w2r = w2.reshape(9 * Cout, Cout).astype(jnp.bfloat16)
    b1r = b1.reshape(1, Cout).astype(jnp.float32)
    b2r = b2.reshape(1, Cout).astype(jnp.float32)

    # VMEM budget: scratch + double-buffered in/out blocks + headroom, capped below
    # v7x's 64 MiB physical VMEM.
    scratch_bytes = 4 * ((H + 2) * (W + 2) * (Cin + Cout) + H2 * W * Cout)
    io_bytes = 2 * (2 * H * W * Cin + 2 * 9 * Cin * Cout + 2 * 9 * Cout * Cout
                    + 8 * Cout + 4 * H2 * W2 * Cout)
    vmem_limit = int(min(48 * 2**20, max(16 * 2**20, 2 * (scratch_bytes + io_bytes))))

    grid_spec = pltpu.PrefetchScalarGridSpec(
        num_scalar_prefetch=0,
        grid=(B,),                                                  # one batch element per step
        in_specs=[
            pl.BlockSpec((None, H, W, Cin), lambda b: (b, 0, 0, 0)),
            pl.BlockSpec((9 * Cin, Cout), lambda b: (0, 0)),
            pl.BlockSpec((1, Cout), lambda b: (0, 0)),
            pl.BlockSpec((9 * Cout, Cout), lambda b: (0, 0)),
            pl.BlockSpec((1, Cout), lambda b: (0, 0)),
        ],
        out_specs=pl.BlockSpec((None, H2, W2, Cout), lambda b: (b, 0, 0, 0)),
        scratch_shapes=[
            pltpu.VMEM((H + 2, W + 2, Cin), jnp.float32),           # padded conv1 input
            pltpu.VMEM((H + 2, W + 2, Cout), jnp.float32),          # padded conv1 activations
            pltpu.VMEM((H2, W, Cout), jnp.float32),                 # row-pooled intermediate
        ],
    )

    out_nhwc = pl.pallas_call(
        vgg_block_kernel,
        out_shape=jax.ShapeDtypeStruct((B, H2, W2, Cout), jnp.float32),
        grid_spec=grid_spec,
        compiler_params=pltpu.CompilerParams(
            dimension_semantics=("parallel",),                      # batch elems are independent
            vmem_limit_bytes=vmem_limit,
        ),
    )(x_nhwc, w1r, b1r, w2r, b2r)

    return jnp.transpose(out_nhwc, (0, 3, 1, 2))                    # back to NCHW


def reference_forward(x_nchw, w1, b1, w2, b2):
    """Plain-JAX f32 reference matching the PyTorch VGGBlock semantics."""
    dn = ("NHWC", "HWIO", "NHWC")
    x = jnp.transpose(x_nchw, (0, 2, 3, 1))
    y = jax.lax.conv_general_dilated(x, w1, (1, 1), "SAME", dimension_numbers=dn,
                                     precision=jax.lax.Precision.HIGHEST) + b1
    y = jnp.maximum(y, 0.0)
    y = jax.lax.conv_general_dilated(y, w2, (1, 1), "SAME", dimension_numbers=dn,
                                     precision=jax.lax.Precision.HIGHEST) + b2
    y = jnp.maximum(y, 0.0)
    y = jax.lax.reduce_window(y, -jnp.inf, jax.lax.max,
                              (1, 2, 2, 1), (1, 2, 2, 1), "VALID")
    return jnp.transpose(y, (0, 3, 1, 2))


if __name__ == "__main__":
    B, Cin, Cout, H, W = 2, 4, 8, 16, 16
    key = jax.random.PRNGKey(0)
    k1, k2, k3, k4, k5 = jax.random.split(key, 5)

    x = jax.random.normal(k1, (B, Cin, H, W), jnp.float32)
    w1 = jax.random.normal(k2, (3, 3, Cin, Cout), jnp.float32) * 0.1
    b1 = jax.random.normal(k3, (Cout,), jnp.float32) * 0.1
    w2 = jax.random.normal(k4, (3, 3, Cout, Cout), jnp.float32) * 0.1
    b2 = jax.random.normal(k5, (Cout,), jnp.float32) * 0.1

    out = jax.block_until_ready(vgg_block_forward(x, w1, b1, w2, b2))
    ref = jax.block_until_ready(reference_forward(x, w1, b1, w2, b2))

    assert out.shape == (B, Cout, H // 2, W // 2), out.shape
    max_err = float(jnp.max(jnp.abs(out - ref)))
    # bf16 MXU inputs with f32 accumulation: allow a modest tolerance vs. the f32 reference.
    if not jnp.allclose(out, ref, rtol=5e-2, atol=5e-2):
        raise AssertionError(f"Pallas output mismatch vs reference, max abs err = {max_err}")

    print("KERNEL_OK")
</pallas_src>

<mosaic_0001>
module attributes {stable_mosaic.version = 11 : i64} {
  func.func @vgg_block_kernel(%arg0: i32, %arg1: memref<1x16x16x4xbf16, #tpu.memory_space<vmem>>, %arg2: memref<36x8xbf16, #tpu.memory_space<vmem>>, %arg3: memref<1x8xf32, #tpu.memory_space<vmem>>, %arg4: memref<72x8xbf16, #tpu.memory_space<vmem>>, %arg5: memref<1x8xf32, #tpu.memory_space<vmem>>, %arg6: memref<1x8x8x8xf32, #tpu.memory_space<vmem>>, %arg7: memref<18x18x4xf32, #tpu.memory_space<vmem>>, %arg8: memref<18x18x8xf32, #tpu.memory_space<vmem>>, %arg9: memref<8x16x8xf32, #tpu.memory_space<vmem>>) attributes {dimension_semantics = [#tpu.dimension_semantics<parallel>], iteration_bounds = array<i64: 2>, scalar_prefetch = 0 : i64, scratch_operands = 3 : i64, tpu.core_type = #tpu.core_type<tc>, window_params = [{transform_indices = @transform_0, window_bounds = array<i64: 1, 16, 16, 4>}, {pipeline_mode = #tpu.pipeline_mode<synchronous>, transform_indices = @transform_1, window_bounds = array<i64: 36, 8>}, {pipeline_mode = #tpu.pipeline_mode<synchronous>, transform_indices = @transform_2, window_bounds = array<i64: 1, 8>}, {pipeline_mode = #tpu.pipeline_mode<synchronous>, transform_indices = @transform_3, window_bounds = array<i64: 72, 8>}, {pipeline_mode = #tpu.pipeline_mode<synchronous>, transform_indices = @transform_4, window_bounds = array<i64: 1, 8>}, {transform_indices = @transform_5, window_bounds = array<i64: 1, 8, 8, 8>}]} {
    %cst = arith.constant 0.000000e+00 : f32
    %0 = vector.broadcast %cst : f32 to vector<1x18x4xf32>
    %cst_0 = arith.constant 0.000000e+00 : f32
    %1 = vector.broadcast %cst_0 : f32 to vector<18x1x4xf32>
    %c0 = arith.constant 0 : index
    %c0_1 = arith.constant 0 : index
    %c0_2 = arith.constant 0 : index
    %2 = vector.load %arg7[%c0, %c0_1, %c0_2] : memref<18x18x4xf32, #tpu.memory_space<vmem>>, vector<1x18x4xf32>
    tpu.vector_store %arg7[%c0, %c0_1, %c0_2], %0 {strides = array<i32>} : memref<18x18x4xf32, #tpu.memory_space<vmem>>, vector<1x18x4xf32>,
    %c17 = arith.constant 17 : index
    %c0_3 = arith.constant 0 : index
    %c0_4 = arith.constant 0 : index
    %3 = vector.load %arg7[%c17, %c0_3, %c0_4] : memref<18x18x4xf32, #tpu.memory_space<vmem>>, vector<1x18x4xf32>
    tpu.vector_store %arg7[%c17, %c0_3, %c0_4], %0 {strides = array<i32>} : memref<18x18x4xf32, #tpu.memory_space<vmem>>, vector<1x18x4xf32>,
    %c0_5 = arith.constant 0 : index
    %c0_6 = arith.constant 0 : index
    %c0_7 = arith.constant 0 : index
    %4 = vector.load %arg7[%c0_5, %c0_6, %c0_7] : memref<18x18x4xf32, #tpu.memory_space<vmem>>, vector<18x1x4xf32>
    tpu.vector_store %arg7[%c0_5, %c0_6, %c0_7], %1 {strides = array<i32>} : memref<18x18x4xf32, #tpu.memory_space<vmem>>, vector<18x1x4xf32>,
    %c0_8 = arith.constant 0 : index
    %c17_9 = arith.constant 17 : index
    %c0_10 = arith.constant 0 : index
    %5 = vector.load %arg7[%c0_8, %c17_9, %c0_10] : memref<18x18x4xf32, #tpu.memory_space<vmem>>, vector<18x1x4xf32>
    tpu.vector_store %arg7[%c0_8, %c17_9, %c0_10], %1 {strides = array<i32>} : memref<18x18x4xf32, #tpu.memory_space<vmem>>, vector<18x1x4xf32>,
    %c0_11 = arith.constant 0 : index
    %c0_12 = arith.constant 0 : index
    %c0_13 = arith.constant 0 : index
    %c0_14 = arith.constant 0 : index
    %6 = vector.load %arg1[%c0_11, %c0_12, %c0_13, %c0_14] : memref<1x16x16x4xbf16, #tpu.memory_space<vmem>>, vector<1x16x16x4xbf16>
    %7 = vector.shape_cast %6 : vector<1x16x16x4xbf16> to vector<16x16x4xbf16>
    %8 = arith.extf %7 : vector<16x16x4xbf16> to vector<16x16x4xf32>
    %c1 = arith.constant 1 : index
    %c1_15 = arith.constant 1 : index
    %c0_16 = arith.constant 0 : index
    %9 = vector.load %arg7[%c1, %c1_15, %c0_16] : memref<18x18x4xf32, #tpu.memory_space<vmem>>, vector<16x16x4xf32>
    tpu.vector_store %arg7[%c1, %c1_15, %c0_16], %8 {strides = array<i32>} : memref<18x18x4xf32, #tpu.memory_space<vmem>>, vector<16x16x4xf32>,
    %c0_17 = arith.constant 0 : index
    %c0_18 = arith.constant 0 : index
    %c0_19 = arith.constant 0 : index
    %10 = vector.load %arg7[%c0_17, %c0_18, %c0_19] : memref<18x18x4xf32, #tpu.memory_space<vmem>>, vector<18x16x4xf32>
    %c0_20 = arith.constant 0 : index
    %c1_21 = arith.constant 1 : index
    %c0_22 = arith.constant 0 : index
    %11 = vector.load %arg7[%c0_20, %c1_21, %c0_22] : memref<18x18x4xf32, #tpu.memory_space<vmem>>, vector<18x16x4xf32>
    %c0_23 = arith.constant 0 : index
    %c2 = arith.constant 2 : index
    %c0_24 = arith.constant 0 : index
    %12 = vector.load %arg7[%c0_23, %c2, %c0_24] : memref<18x18x4xf32, #tpu.memory_space<vmem>>, vector<18x16x4xf32>
    %13 = tpu.concatenate %10, %11, %12 in 2 : vector<18x16x4xf32>, vector<18x16x4xf32>, vector<18x16x4xf32> -> vector<18x16x12xf32>
    %14 = vector.extract_strided_slice %13 {offsets = [0, 0, 0], sizes = [16, 16, 12], strides = [1, 1, 1]} : vector<18x16x12xf32> to vector<16x16x12xf32>
    %15 = vector.extract_strided_slice %13 {offsets = [1, 0, 0], sizes = [16, 16, 12], strides = [1, 1, 1]} : vector<18x16x12xf32> to vector<16x16x12xf32>
    %16 = vector.extract_strided_slice %13 {offsets = [2, 0, 0], sizes = [16, 16, 12], strides = [1, 1, 1]} : vector<18x16x12xf32> to vector<16x16x12xf32>
    %17 = tpu.concatenate %14, %15, %16 in 2 : vector<16x16x12xf32>, vector<16x16x12xf32>, vector<16x16x12xf32> -> vector<16x16x36xf32>
    %18 = vector.shape_cast %17 : vector<16x16x36xf32> to vector<256x36xf32>
    %19 = arith.truncf %18 : vector<256x36xf32> to vector<256x36xbf16>
    %c0_25 = arith.constant 0 : index
    %c0_26 = arith.constant 0 : index
    %20 = vector.load %arg2[%c0_25, %c0_26] : memref<36x8xbf16, #tpu.memory_space<vmem>>, vector<36x8xbf16>
    %cst_27 = arith.constant dense<0.000000e+00> : vector<256x8xf32>
    %21 = tpu.matmul %19, %20, %cst_27 {dimension_numbers = #tpu.dot_dimension_numbers<[1], [0], [0], [1], [0, 0, 1, 1], [], []>} : vector<256x36xbf16>, vector<36x8xbf16>, vector<256x8xf32> -> vector<256x8xf32>
    %c0_28 = arith.constant 0 : index
    %c0_29 = arith.constant 0 : index
    %22 = vector.load %arg3[%c0_28, %c0_29] : memref<1x8xf32, #tpu.memory_space<vmem>>, vector<1x8xf32>
    %23 = vector.broadcast %22 : vector<1x8xf32> to vector<256x8xf32>
    %24 = arith.addf %21, %23 : vector<256x8xf32>
    %cst_30 = arith.constant 0.000000e+00 : f32
    %25 = vector.broadcast %cst_30 : f32 to vector<256x8xf32>
    %26 = arith.maximumf %24, %25 : vector<256x8xf32>
    %cst_31 = arith.constant 0.000000e+00 : f32
    %27 = vector.broadcast %cst_31 : f32 to vector<1x18x8xf32>
    %cst_32 = arith.constant 0.000000e+00 : f32
    %28 = vector.broadcast %cst_32 : f32 to vector<18x1x8xf32>
    %c0_33 = arith.constant 0 : index
    %c0_34 = arith.constant 0 : index
    %c0_35 = arith.constant 0 : index
    %29 = vector.load %arg8[%c0_33, %c0_34, %c0_35] : memref<18x18x8xf32, #tpu.memory_space<vmem>>, vector<1x18x8xf32>
    tpu.vector_store %arg8[%c0_33, %c0_34, %c0_35], %27 {strides = array<i32>} : memref<18x18x8xf32, #tpu.memory_space<vmem>>, vector<1x18x8xf32>,
    %c17_36 = arith.constant 17 : index
    %c0_37 = arith.constant 0 : index
    %c0_38 = arith.constant 0 : index
    %30 = vector.load %arg8[%c17_36, %c0_37, %c0_38] : memref<18x18x8xf32, #tpu.memory_space<vmem>>, vector<1x18x8xf32>
    tpu.vector_store %arg8[%c17_36, %c0_37, %c0_38], %27 {strides = array<i32>} : memref<18x18x8xf32, #tpu.memory_space<vmem>>, vector<1x18x8xf32>,
    %c0_39 = arith.constant 0 : index
    %c0_40 = arith.constant 0 : index
    %c0_41 = arith.constant 0 : index
    %31 = vector.load %arg8[%c0_39, %c0_40, %c0_41] : memref<18x18x8xf32, #tpu.memory_space<vmem>>, vector<18x1x8xf32>
    tpu.vector_store %arg8[%c0_39, %c0_40, %c0_41], %28 {strides = array<i32>} : memref<18x18x8xf32, #tpu.memory_space<vmem>>, vector<18x1x8xf32>,
    %c0_42 = arith.constant 0 : index
    %c17_43 = arith.constant 17 : index
    %c0_44 = arith.constant 0 : index
    %32 = vector.load %arg8[%c0_42, %c17_43, %c0_44] : memref<18x18x8xf32, #tpu.memory_space<vmem>>, vector<18x1x8xf32>
    tpu.vector_store %arg8[%c0_42, %c17_43, %c0_44], %28 {strides = array<i32>} : memref<18x18x8xf32, #tpu.memory_space<vmem>>, vector<18x1x8xf32>,
    %33 = vector.shape_cast %26 : vector<256x8xf32> to vector<16x16x8xf32>
    %c1_45 = arith.constant 1 : index
    %c1_46 = arith.constant 1 : index
    %c0_47 = arith.constant 0 : index
    %34 = vector.load %arg8[%c1_45, %c1_46, %c0_47] : memref<18x18x8xf32, #tpu.memory_space<vmem>>, vector<16x16x8xf32>
    tpu.vector_store %arg8[%c1_45, %c1_46, %c0_47], %33 {strides = array<i32>} : memref<18x18x8xf32, #tpu.memory_space<vmem>>, vector<16x16x8xf32>,
    %c0_48 = arith.constant 0 : index
    %c0_49 = arith.constant 0 : index
    %c0_50 = arith.constant 0 : index
    %35 = vector.load %arg8[%c0_48, %c0_49, %c0_50] : memref<18x18x8xf32, #tpu.memory_space<vmem>>, vector<18x16x8xf32>
    %c0_51 = arith.constant 0 : index
    %c1_52 = arith.constant 1 : index
    %c0_53 = arith.constant 0 : index
    %36 = vector.load %arg8[%c0_51, %c1_52, %c0_53] : memref<18x18x8xf32, #tpu.memory_space<vmem>>, vector<18x16x8xf32>
    %c0_54 = arith.constant 0 : index
    %c2_55 = arith.constant 2 : index
    %c0_56 = arith.constant 0 : index
    %37 = vector.load %arg8[%c0_54, %c2_55, %c0_56] : memref<18x18x8xf32, #tpu.memory_space<vmem>>, vector<18x16x8xf32>
    %38 = tpu.concatenate %35, %36, %37 in 2 : vector<18x16x8xf32>, vector<18x16x8xf32>, vector<18x16x8xf32> -> vector<18x16x24xf32>
    %39 = vector.extract_strided_slice %38 {offsets = [0, 0, 0], sizes = [16, 16, 24], strides = [1, 1, 1]} : vector<18x16x24xf32> to vector<16x16x24xf32>
    %40 = vector.extract_strided_slice %38 {offsets = [1, 0, 0], sizes = [16, 16, 24], strides = [1, 1, 1]} : vector<18x16x24xf32> to vector<16x16x24xf32>
    %41 = vector.extract_strided_slice %38 {offsets = [2, 0, 0], sizes = [16, 16, 24], strides = [1, 1, 1]} : vector<18x16x24xf32> to vector<16x16x24xf32>
    %42 = tpu.concatenate %39, %40, %41 in 2 : vector<16x16x24xf32>, vector<16x16x24xf32>, vector<16x16x24xf32> -> vector<16x16x72xf32>
    %43 = vector.shape_cast %42 : vector<16x16x72xf32> to vector<256x72xf32>
    %44 = arith.truncf %43 : vector<256x72xf32> to vector<256x72xbf16>
    %c0_57 = arith.constant 0 : index
    %c0_58 = arith.constant 0 : index
    %45 = vector.load %arg4[%c0_57, %c0_58] : memref<72x8xbf16, #tpu.memory_space<vmem>>, vector<72x8xbf16>
    %cst_59 = arith.constant dense<0.000000e+00> : vector<256x8xf32>
    %46 = tpu.matmul %44, %45, %cst_59 {dimension_numbers = #tpu.dot_dimension_numbers<[1], [0], [0], [1], [0, 0, 1, 1], [], []>} : vector<256x72xbf16>, vector<72x8xbf16>, vector<256x8xf32> -> vector<256x8xf32>
    %c0_60 = arith.constant 0 : index
    %c0_61 = arith.constant 0 : index
    %47 = vector.load %arg5[%c0_60, %c0_61] : memref<1x8xf32, #tpu.memory_space<vmem>>, vector<1x8xf32>
    %48 = vector.broadcast %47 : vector<1x8xf32> to vector<256x8xf32>
    %49 = arith.addf %46, %48 : vector<256x8xf32>
    %cst_62 = arith.constant 0.000000e+00 : f32
    %50 = vector.broadcast %cst_62 : f32 to vector<256x8xf32>
    %51 = arith.maximumf %49, %50 : vector<256x8xf32>
    %52 = vector.shape_cast %51 : vector<256x8xf32> to vector<8x2x16x8xf32>
    %53 = vector.extract_strided_slice %52 {offsets = [0, 0, 0, 0], sizes = [8, 1, 16, 8], strides = [1, 1, 1, 1]} : vector<8x2x16x8xf32> to vector<8x1x16x8xf32>
    %54 = vector.shape_cast %53 : vector<8x1x16x8xf32> to vector<8x16x8xf32>
    %55 = vector.extract_strided_slice %52 {offsets = [0, 1, 0, 0], sizes = [8, 1, 16, 8], strides = [1, 1, 1, 1]} : vector<8x2x16x8xf32> to vector<8x1x16x8xf32>
    %56 = vector.shape_cast %55 : vector<8x1x16x8xf32> to vector<8x16x8xf32>
    %57 = arith.maximumf %54, %56 : vector<8x16x8xf32>
    %c0_63 = arith.constant 0 : index
    %c0_64 = arith.constant 0 : index
    %c0_65 = arith.constant 0 : index
    %58 = vector.load %arg9[%c0_63, %c0_64, %c0_65] : memref<8x16x8xf32, #tpu.memory_space<vmem>>, vector<8x16x8xf32>
    tpu.vector_store %arg9[%c0_63, %c0_64, %c0_65], %57 {strides = array<i32>} : memref<8x16x8xf32, #tpu.memory_space<vmem>>, vector<8x16x8xf32>,
    %c0_66 = arith.constant 0 : index
    %c0_67 = arith.constant 0 : index
    %c0_68 = arith.constant 0 : index
    %59 = tpu.strided_load %arg9[%c0_66, %c0_67, %c0_68] {strides = array<i32: 1, 2, 1>} : memref<8x16x8xf32, #tpu.memory_space<vmem>>, vector<8x8x8xf32>
    %c0_69 = arith.constant 0 : index
    %c1_70 = arith.constant 1 : index
    %c0_71 = arith.constant 0 : index
    %60 = tpu.strided_load %arg9[%c0_69, %c1_70, %c0_71] {strides = array<i32: 1, 2, 1>} : memref<8x16x8xf32, #tpu.memory_space<vmem>>, vector<8x8x8xf32>
    %61 = arith.maximumf %59, %60 : vector<8x8x8xf32>
    %c0_72 = arith.constant 0 : index
    %c0_73 = arith.constant 0 : index
    %c0_74 = arith.constant 0 : index
    %c0_75 = arith.constant 0 : index
    %62 = vector.load %arg6[%c0_72, %c0_73, %c0_74, %c0_75] : memref<1x8x8x8xf32, #tpu.memory_space<vmem>>, vector<1x8x8x8xf32>
    %63 = vector.shape_cast %62 : vector<1x8x8x8xf32> to vector<8x8x8xf32>
    %64 = vector.shape_cast %61 : vector<8x8x8xf32> to vector<1x8x8x8xf32>
    tpu.vector_store %arg6[%c0_72, %c0_73, %c0_74, %c0_75], %64 {strides = array<i32>} : memref<1x8x8x8xf32, #tpu.memory_space<vmem>>, vector<1x8x8x8xf32>,
    return
  }
  func.func @transform_0(%arg0: i32) -> (i32, i32, i32, i32) {
    %c0_i32 = arith.constant 0 : i32
    %c0_i32_0 = arith.constant 0 : i32
    %c0_i32_1 = arith.constant 0 : i32
    %c0_i32_2 = arith.constant 0 : i32
    return %arg0, %c0_i32, %c0_i32_0, %c0_i32_1 : i32, i32, i32, i32
  }
  func.func @transform_1(%arg0: i32) -> (i32, i32) {
    %c0_i32 = arith.constant 0 : i32
    %c0_i32_0 = arith.constant 0 : i32
    %c0_i32_1 = arith.constant 0 : i32
    return %c0_i32, %c0_i32_0 : i32, i32
  }
  func.func @transform_2(%arg0: i32) -> (i32, i32) {
    %c0_i32 = arith.constant 0 : i32
    %c0_i32_0 = arith.constant 0 : i32
    %c0_i32_1 = arith.constant 0 : i32
    return %c0_i32, %c0_i32_0 : i32, i32
  }
  func.func @transform_3(%arg0: i32) -> (i32, i32) {
    %c0_i32 = arith.constant 0 : i32
    %c0_i32_0 = arith.constant 0 : i32
    %c0_i32_1 = arith.constant 0 : i32
    return %c0_i32, %c0_i32_0 : i32, i32
  }
  func.func @transform_4(%arg0: i32) -> (i32, i32) {
    %c0_i32 = arith.constant 0 : i32
    %c0_i32_0 = arith.constant 0 : i32
    %c0_i32_1 = arith.constant 0 : i32
    return %c0_i32, %c0_i32_0 : i32, i32
  }
  func.func @transform_5(%arg0: i32) -> (i32, i32, i32, i32) {
    %c0_i32 = arith.constant 0 : i32
    %c0_i32_0 = arith.constant 0 : i32
    %c0_i32_1 = arith.constant 0 : i32
    %c0_i32_2 = arith.constant 0 : i32
    return %arg0, %c0_i32, %c0_i32_0, %c0_i32_1 : i32, i32, i32, i32
  }
}

</mosaic_0001>

<bundles_post_ra>
// kernel: tpu_custom_call.1
= control target key start
LH: loop header
LB: loop body
LE: loop exit
PB: predicated region body
PF: predicated region fallthrough
CT: control target
= control target key end

     0   :  { %10 = vsyncpa [#allocation6], 0  ;;  %s4993_s0 = inlined_call_operand.vmem [shape: bf16[2,16,16,4], index: 0, kind: input, shape index: {}]   ;;  %s4994_s1 = inlined_call_operand.vmem [shape: bf16[36,8], index: 1, kind: input, shape index: {}]   ;;  %s4995_s2 = inlined_call_operand.vmem [shape: f32[1,8], index: 2, kind: input, shape index: {}]   ;;  %s4996_s3 = inlined_call_operand.vmem [shape: bf16[72,8], index: 3, kind: input, shape index: {}]   ;;  %s4997_s4 = inlined_call_operand.vmem [shape: f32[1,8], index: 4, kind: input, shape index: {}]   ;;  %s4998_s5 = inlined_call_operand.hbm [shape: f32[2,8,8,8], index: 5, kind: output, shape index: {}]  }
   0x1   :  { %12 = vsyncpa [#allocation6 + $0x1], 0  ;;  %s3810_s18 = smov 0   ;;  %s3812_s19 = smov 0  }
   0x2   :  { %s3814_s20 = smov 0   ;;  %s3816_s21 = smov 0  }
   0x3 LB: > { %s3831_s22 = sadd.s32 4294967295, %s3769_s21   ;;  %s2715_s23 = sadd.s32 4294967294, %s3769_s21   ;;  %s3769_s21 = sphi %s3816_s21, %s5004_s21   ;;  %s3765_s20 = sphi %s3814_s20, %s5003_s20   ;;  %s3761_s19 = sphi %s3812_s19, %s5002_s19   ;;  %s3757_s18 = sphi %s3810_s18, %s5001_s18  }
   0x4   : > { %s3835_s24 = sadd.s32 1, %s3769_s21   ;;  %s135_s25 = sadd.s32 1, %s3765_s20 }
   0x5   : > { %s132_s26 = ssub.s32 %s3769_s21, %s3835_s24  ;;  %p145_p0 = scmp.ne.s32.totalorder %s3765_s20, %s3761_s19 }
   0x6   : > { %p133_p1 = scmp.eq.s32.totalorder %s132_s26, 0  ;;  %p146_p2 = scmp.eq.s32.totalorder %s3831_s22, 1 }
   0x7   : > { %p151_p3 = scmp.ne.s32.totalorder %s3761_s19, %s3757_s18  ;;  %p152_p4 = scmp.eq.s32.totalorder %s2715_s23, 1 }
   0x8   : > { %s3846_s27 = scalar_select %p133_p1, %s3765_s20, %s135_s25  }
   0x9   : > { %p3848_p5 = por %p146_p2, %p145_p0  ;;  %p3852_p6 = por %p152_p4, %p151_p3 }
   0xa   : > { %p2718_p7 = scmp.ge.s32.totalorder %s3769_s21, 1  ;;  %p190_p8 = scmp.lt.s32.totalorder %s3769_s21, 3 }
   0xc   : > { %p191_p9 = pnand %p2718_p7, %p190_p8 }
   0xd   : > { %p218_p10 = scmp.lt.s32.totalorder (!%p191_p9), %s3831_s22, 1  ;;  %vm224_vm0 = vcmask (!%p191_p9), 31744   ;;  %vm233_vm1 = vcmask (!%p191_p9), 24576   ;;  %vm227_vm2 = vcmask (!%p191_p9), 25600   ;;  %v3771_v0 = vmov (!%p191_p9), 0.0   ;;  %s3772_s10 = smov (!%p191_p9), 8  }
   0xe   : > { %194 = sbr.rel (%p191_p9) target bundleno = 1085 (0x43d), region = 40  ;;  %253 = vst.msk [vmem:[#allocation2 + $0x29] sm:$0x1] (!%p191_p9), %vm233_vm1, %v3771_v0  ;;  %235 = vst.msk [vmem:[#allocation2 + $0x18] sm:$0x1] (!%p191_p9), %vm233_vm1, %v3771_v0  ;;  %vm799_vm3 = vcmask (!%p191_p9), 64512  }
   0xf   : > { %225 = vst.msk [vmem:[#allocation2] sm:$0xff] (!%p191_p9), %vm224_vm0, %v3771_v0  ;;  %226 = vst.msk [vmem:[#allocation2 + $0x8] sm:$0xff] (!%p191_p9), %vm224_vm0, %v3771_v0  ;;  %s3773_s11 = smov (!%p191_p9), 4   ;;  %vm1220_vm4 = vcmask (!%p191_p9), 1041408   ;;  %s3774_s23 = smov (!%p191_p9), 12   ;;  %vm1062_vm5 = vcmask (!%p191_p9), 97280  }
  0x10   : > { %230 = vst.msk [vmem:[#allocation2 + $0x198] sm:$0xff] (!%p191_p9), %vm224_vm0, %v3771_v0  ;;  %231 = vst.msk [vmem:[#allocation2 + $0x1a0] sm:$0xff] (!%p191_p9), %vm224_vm0, %v3771_v0  ;;  %s3775_s25 = smov (!%p191_p9), 24   ;;  %vm1095_vm6 = vcmask (!%p191_p9), 195584   ;;  %vm1171_vm7 = vcmask (!%p191_p9), 293888   ;;  %vm1419_vm8 = vcmask (!%p191_p9), 58368  }
  0x11   : > { %236 = vst.msk [vmem:[#allocation2 + $0x30] sm:$0x1] (!%p191_p9), %vm233_vm1, %v3771_v0  ;;  %237 = vst.msk [vmem:[#allocation2 + $0x48] sm:$0x1] (!%p191_p9), %vm233_vm1, %v3771_v0  ;;  %vm1425_vm9 = vcmask (!%p191_p9), 57344   ;;  %s3776_s26 = smov (!%p191_p9), 16  }
  0x12   : > { %238 = vst.msk [vmem:[#allocation2 + $0x60] sm:$0x1] (!%p191_p9), %vm233_vm1, %v3771_v0  ;;  %239 = vst.msk [vmem:[#allocation2 + $0x78] sm:$0x1] (!%p191_p9), %vm233_vm1, %v3771_v0  ;;  %vm1927_vm10 = vcmask (!%p191_p9), 130048   ;;  %vm2363_vm11 = vcmask (!%p191_p9), 1043456  }
  0x13   : > { %240 = vst.msk [vmem:[#allocation2 + $0x90] sm:$0x1] (!%p191_p9), %vm233_vm1, %v3771_v0  ;;  %241 = vst.msk [vmem:[#allocation2 + $0xa8] sm:$0x1] (!%p191_p9), %vm233_vm1, %v3771_v0  ;;  %vm2222_vm12 = vcmask (!%p191_p9), 392192   ;;  %vm2314_vm13 = vcmask (!%p191_p9), 588800  }
  0x14   : > { %242 = vst.msk [vmem:[#allocation2 + $0xc0] sm:$0x1] (!%p191_p9), %vm233_vm1, %v3771_v0  ;;  %243 = vst.msk [vmem:[#allocation2 + $0xd8] sm:$0x1] (!%p191_p9), %vm233_vm1, %v3771_v0  ;;  %s2770_s8 = sshll.u32 (!%p191_p9), %s3831_s22, 10  ;;  %s3778_s15 = smov (!%p191_p9), [#allocation5]  }
  0x15   : > { %244 = vst.msk [vmem:[#allocation2 + $0xf0] sm:$0x1] %vm233_vm1, %v3771_v0  ;;  %245 = vst.msk [vmem:[#allocation2 + $0x108] sm:$0x1] %vm233_vm1, %v3771_v0  ;;  %s219_s30 = scalar_select %p218_p10, %s3831_s22, 1 }
  0x16   : > { %246 = vst.msk [vmem:[#allocation2 + $0x120] sm:$0x1] %vm233_vm1, %v3771_v0  ;;  %247 = vst.msk [vmem:[#allocation2 + $0x138] sm:$0x1] %vm233_vm1, %v3771_v0  ;;  %s4943_s13 = scalar_lea.hbm %s4998_s5, %s2770_s8  ;;  %s3711_s16 = sshll.u32 %s3778_s15, 4  ;;  %s3712_s16 = int_to_ptr.vmem [resolvable:$false] %s3711_s16 }
  0x17   : > { %248 = vst.msk [vmem:[#allocation2 + $0x150] sm:$0x1] %vm233_vm1, %v3771_v0  ;;  %249 = vst.msk [vmem:[#allocation2 + $0x168] sm:$0x1] %vm233_vm1, %v3771_v0  ;;  %s2769_s6 = sshll.u32 %s219_s30, 7  ;;  %s215_s30 = sand.u32 1, %s3761_s19  }
  0x18   : > { %250 = vst.msk [vmem:[#allocation2 + $0x180] sm:$0x1] %vm233_vm1, %v3771_v0  ;;  %254 = vst.msk [vmem:[#allocation2 + $0x41] sm:$0x1] %vm233_vm1, %v3771_v0  ;;  %s3949_s9 = scalar_lea.vmem %s4993_s0, %s2769_s6  ;;  %s2719_s6 = sshll.u32 %s215_s30, 6 }
  0x19   : > { %255 = vst.msk [vmem:[#allocation2 + $0x59] sm:$0x1] %vm233_vm1, %v3771_v0  ;;  %256 = vst.msk [vmem:[#allocation2 + $0x71] sm:$0x1] %vm233_vm1, %v3771_v0  ;;  %v2772_v1 = vld [vmem:[%s3949_s9] sm:$0xff]   ;;  %v2836_v2 = vld [vmem:[%s3949_s9 + $0x10] sm:$0xff]  }
  0x1a   : > { %257 = vst.msk [vmem:[#allocation2 + $0x89] sm:$0x1] %vm233_vm1, %v3771_v0  ;;  %258 = vst.msk [vmem:[#allocation2 + $0xa1] sm:$0x1] %vm233_vm1, %v3771_v0  ;;  %v2835_v3 = vld [vmem:[%s3949_s9 + $0x8] sm:$0xff]   ;;  %v2773_v4 = vunpack.c.l.bf16 %v2772_v1  ;;  %v2774_v5 = vunpack.c.h.bf16 %v2772_v1  ;;  %v2781_v6 = vunpack.c.l.bf16 %v2836_v2  ;;  %v2782_v7 = vunpack.c.h.bf16 %v2836_v2  ;;  %v2838_v8 = vld [vmem:[%s3949_s9 + $0x20] sm:$0xff]  }
  0x1b   : > { %259 = vst.msk [vmem:[#allocation2 + $0xb9] sm:$0x1] %vm233_vm1, %v3771_v0  ;;  %260 = vst.msk [vmem:[#allocation2 + $0xd1] sm:$0x1] %vm233_vm1, %v3771_v0  ;;  %v2837_v9 = vld [vmem:[%s3949_s9 + $0x18] sm:$0xff]   ;;  %v2840_v10 = vld [vmem:[%s3949_s9 + $0x30] sm:$0xff]   ;;  %v2777_v11 = vunpack.c.l.bf16 %v2835_v3  ;;  %v2778_v12 = vunpack.c.h.bf16 %v2835_v3  ;;  %v2789_v13 = vunpack.c.l.bf16 %v2838_v8  ;;  %v2790_v14 = vunpack.c.h.bf16 %v2838_v8 }
  0x1c   : > { %261 = vst.msk [vmem:[#allocation2 + $0xe9] sm:$0x1] %vm233_vm1, %v3771_v0  ;;  %262 = vst.msk [vmem:[#allocation2 + $0x101] sm:$0x1] %vm233_vm1, %v3771_v0  ;;  %v2839_v15 = vld [vmem:[%s3949_s9 + $0x28] sm:$0xff]   ;;  %v2842_v16 = vld [vmem:[%s3949_s9 + $0x40] sm:$0xff]   ;;  %v2785_v18 = vunpack.c.l.bf16 %v2837_v9  ;;  %v2786_v19 = vunpack.c.h.bf16 %v2837_v9  ;;  %v2797_v20 = vunpack.c.l.bf16 %v2840_v10  ;;  %v2798_v21 = vunpack.c.h.bf16 %v2840_v10 }
  0x1d   : > { %263 = vst.msk [vmem:[#allocation2 + $0x119] sm:$0x1] %vm233_vm1, %v3771_v0  ;;  %264 = vst.msk [vmem:[#allocation2 + $0x131] sm:$0x1] %vm233_vm1, %v3771_v0  ;;  %v2841_v17 = vld [vmem:[%s3949_s9 + $0x38] sm:$0xff]   ;;  %v2844_v22 = vld [vmem:[%s3949_s9 + $0x50] sm:$0xff]   ;;  %v2793_v25 = vunpack.c.l.bf16 %v2839_v15  ;;  %v2794_v26 = vunpack.c.h.bf16 %v2839_v15  ;;  %v2805_v27 = vunpack.c.l.bf16 %v2842_v16  ;;  %v2806_v28 = vunpack.c.h.bf16 %v2842_v16 }
  0x1e   : > { %265 = vst.msk [vmem:[#allocation2 + $0x149] sm:$0x1] %vm233_vm1, %v3771_v0  ;;  %266 = vst.msk [vmem:[#allocation2 + $0x161] sm:$0x1] %vm233_vm1, %v3771_v0  ;;  %v2843_v23 = vld [vmem:[%s3949_s9 + $0x48] sm:$0xff]   ;;  %v2846_v24 = vld [vmem:[%s3949_s9 + $0x60] sm:$0xff]   ;;  %v2801_v31 = vunpack.c.l.bf16 %v2841_v17  ;;  %v2802_v32 = vunpack.c.h.bf16 %v2841_v17  ;;  %v2813_v33 = vunpack.c.l.bf16 %v2844_v22  ;;  %v2814_v34 = vunpack.c.h.bf16 %v2844_v22 }
  0x1f   : > { %267 = vst.msk [vmem:[#allocation2 + $0x179] sm:$0x1] %vm233_vm1, %v3771_v0  ;;  %268 = vst.msk [vmem:[#allocation2 + $0x191] sm:$0x1] %vm233_vm1, %v3771_v0  ;;  %v2845_v29 = vld [vmem:[%s3949_s9 + $0x58] sm:$0xff]   ;;  %v2848_v30 = vld [vmem:[%s3949_s9 + $0x70] sm:$0xff]   ;;  %v2809_v37 = vunpack.c.l.bf16 %v2843_v23  ;;  %v2810_v38 = vunpack.c.h.bf16 %v2843_v23  ;;  %v2821_v39 = vunpack.c.l.bf16 %v2846_v24  ;;  %v2822_v40 = vunpack.c.h.bf16 %v2846_v24 }
  0x20   : > { %228 = vst.msk [vmem:[#allocation2 + $0x10] sm:$0x3] %vm227_vm2, %v3771_v0  ;;  %232 = vst.msk [vmem:[#allocation2 + $0x1a8] sm:$0x3] %vm227_vm2, %v3771_v0  ;;  %v2847_v35 = vld [vmem:[%s3949_s9 + $0x68] sm:$0xff]   ;;  %v2849_v36 = vld [vmem:[%s3949_s9 + $0x78] sm:$0xff]   ;;  %v2817_v41 = vunpack.c.l.bf16 %v2845_v29  ;;  %v2818_v42 = vunpack.c.h.bf16 %v2845_v29  ;;  %v2829_v43 = vunpack.c.l.bf16 %v2848_v30  ;;  %v2830_v44 = vunpack.c.h.bf16 %v2848_v30 }
  0x21   : > { %234 = vst.msk [vmem:[#allocation2] sm:$0x1] %vm233_vm1, %v3771_v0  ;;  %251 = vst.msk [vmem:[#allocation2 + $0x198] sm:$0x1] %vm233_vm1, %v3771_v0  ;;  %v2825_v45 = vunpack.c.l.bf16 %v2847_v35  ;;  %v2826_v46 = vunpack.c.h.bf16 %v2847_v35  ;;  %v2833_v47 = vunpack.c.l.bf16 %v2849_v36  ;;  %v2834_v48 = vunpack.c.h.bf16 %v2849_v36  ;;  %s4890_s7 = scalar_lea.vmem [#allocation5], %s2719_s6  ;;  %s4951_s14 = scalar_lea.sflag [#allocation6], %s215_s30 }
  0x22   : > { %252 = vst.msk [vmem:[#allocation2 + $0x11] sm:$0x1] %vm233_vm1, %v3771_v0  ;;  %269 = vst.msk [vmem:[#allocation2 + $0x1a9] sm:$0x1] %vm233_vm1, %v3771_v0  ;;  %s2653_s9 = sshll.u32 %s4890_s7, 4  ;;  %s3713_s17 = scalar_lea.vmem %s3712_s16, 2048  ;;  %s4945_s9 = int_to_ptr.vmem [resolvable:$true] %s2653_s9 }
  0x23   : > { %335 = vst.msk [vmem:[#allocation2 + $0x19] sm:$0xff] %vm224_vm0, %v2773_v4  ;;  %336 = vst.msk [vmem:[#allocation2 + $0x21] sm:$0xff] %vm224_vm0, %v2774_v5  ;;  %s3707_s22 = scalar_lea.vmem %s4945_s9, 1024  ;;  %p3714_p0 = scmp.lt.s32.totalorder %s4945_s9, %s3712_s16 }
  0x24   : > { %339 = vst.msk [vmem:[#allocation2 + $0x49] sm:$0xff] %vm224_vm0, %v2781_v6  ;;  %340 = vst.msk [vmem:[#allocation2 + $0x51] sm:$0xff] %vm224_vm0, %v2782_v7  ;;  %p3708_p11 = scmp.ne.s32.totalorder %s4945_s9, %s3707_s22  ;;  %p3715_p1 = scmp.lt.s32.totalorder %s3713_s17, %s3707_s22 }
  0x25   : > { %337 = vst.msk [vmem:[#allocation2 + $0x31] sm:$0xff] %vm224_vm0, %v2777_v11  ;;  %338 = vst.msk [vmem:[#allocation2 + $0x39] sm:$0xff] %vm224_vm0, %v2778_v12 }
  0x26   : > { %343 = vst.msk [vmem:[#allocation2 + $0x79] sm:$0xff] %vm224_vm0, %v2789_v13  ;;  %344 = vst.msk [vmem:[#allocation2 + $0x81] sm:$0xff] %vm224_vm0, %v2790_v14  ;;  %p3709_p12 = pnand %p3708_p11, %p3848_p5  ;;  %p3716_p2 = por %p3715_p1, %p3714_p0 }
  0x27   : > { %341 = vst.msk [vmem:[#allocation2 + $0x61] sm:$0xff] %vm224_vm0, %v2785_v18  ;;  %342 = vst.msk [vmem:[#allocation2 + $0x69] sm:$0xff] %vm224_vm0, %v2786_v19 }
  0x28   : > { %347 = vst.msk [vmem:[#allocation2 + $0xa9] sm:$0xff] %vm224_vm0, %v2797_v20  ;;  %348 = vst.msk [vmem:[#allocation2 + $0xb1] sm:$0xff] %vm224_vm0, %v2798_v21  ;;  %p3710_p13 = pneg %p3709_p12 }
  0x29   : > { %345 = vst.msk [vmem:[#allocation2 + $0x91] sm:$0xff] %vm224_vm0, %v2793_v25  ;;  %346 = vst.msk [vmem:[#allocation2 + $0x99] sm:$0xff] %vm224_vm0, %v2794_v26 }
  0x2a   : > { %351 = vst.msk [vmem:[#allocation2 + $0xd9] sm:$0xff] %vm224_vm0, %v2805_v27  ;;  %352 = vst.msk [vmem:[#allocation2 + $0xe1] sm:$0xff] %vm224_vm0, %v2806_v28  ;;  %v441_v49 = vld [vmem:[#allocation2 + $0x1a] sm:$0xff]  ;;  %v442_v50 = vld [vmem:[#allocation2 + $0x22] sm:$0xff]  ;;  %p3717_p3 = pnand %p3716_p2, %p3710_p13 }
  0x2b   : > { %349 = vst.msk [vmem:[#allocation2 + $0xc1] sm:$0xff] %vm224_vm0, %v2801_v31  ;;  %350 = vst.msk [vmem:[#allocation2 + $0xc9] sm:$0xff] %vm224_vm0, %v2802_v32  ;;  %v405_v51 = vld [vmem:[#allocation2 + $0x19] sm:$0xff]  ;;  %v3029_v52 = vpack.i.bf16 %v442_v50, %v441_v49  ;;  %v406_v53 = vld [vmem:[#allocation2 + $0x21] sm:$0xff] }
  0x2c   : > { %355 = vst.msk [vmem:[#allocation2 + $0x109] sm:$0xff] %vm224_vm0, %v2813_v33  ;;  %356 = vst.msk [vmem:[#allocation2 + $0x111] sm:$0xff] %vm224_vm0, %v2814_v34  ;;  %v409_v54 = vld [vmem:[#allocation2 + $0x49] sm:$0xff]  ;;  %v410_v55 = vld [vmem:[#allocation2 + $0x51] sm:$0xff]  ;;  %v3019_v56 = vpack.i.bf16 %v406_v53, %v405_v51 }
  0x2d   : > { %353 = vst.msk [vmem:[#allocation2 + $0xf1] sm:$0xff] %vm224_vm0, %v2809_v37  ;;  %354 = vst.msk [vmem:[#allocation2 + $0xf9] sm:$0xff] %vm224_vm0, %v2810_v38  ;;  %v407_v57 = vld [vmem:[#allocation2 + $0x31] sm:$0xff]  ;;  %v408_v58 = vld [vmem:[#allocation2 + $0x39] sm:$0xff]  ;;  %3030 = vrot.lane.b32.xlu1 %v3029_v52, %s3772_s10  ;;  %v3034_v59 = vpack.i.bf16 %v410_v55, %v409_v54 }
  0x2e   : > { %359 = vst.msk [vmem:[#allocation2 + $0x139] sm:$0xff] %vm224_vm0, %v2821_v39  ;;  %360 = vst.msk [vmem:[#allocation2 + $0x141] sm:$0xff] %vm224_vm0, %v2822_v40  ;;  %3020 = vrot.lane.b32.xlu0 %v3019_v56, %s3773_s11  ;;  %v3024_v60 = vpack.i.bf16 %v408_v58, %v407_v57  ;;  %v445_v61 = vld [vmem:[#allocation2 + $0x4a] sm:$0xff]  ;;  %v446_v62 = vld [vmem:[#allocation2 + $0x52] sm:$0xff] }
  0x2f   : > { %357 = vst.msk [vmem:[#allocation2 + $0x121] sm:$0xff] %vm224_vm0, %v2817_v41  ;;  %358 = vst.msk [vmem:[#allocation2 + $0x129] sm:$0xff] %vm224_vm0, %v2818_v42  ;;  %v443_v63 = vld [vmem:[#allocation2 + $0x32] sm:$0xff]  ;;  %v444_v1 = vld [vmem:[#allocation2 + $0x3a] sm:$0xff]  ;;  %v3044_v2 = vpack.i.bf16 %v446_v62, %v445_v61 }
  0x30   : > { %363 = vst.msk [vmem:[#allocation2 + $0x169] sm:$0xff] %vm224_vm0, %v2829_v43  ;;  %364 = vst.msk [vmem:[#allocation2 + $0x171] sm:$0xff] %vm224_vm0, %v2830_v44  ;;  %v3039_v3 = vpack.i.bf16 %v444_v1, %v443_v63  ;;  %v413_v4 = vld [vmem:[#allocation2 + $0x79] sm:$0xff]  ;;  %v414_v5 = vld [vmem:[#allocation2 + $0x81] sm:$0xff] }
  0x31   : > { %361 = vst.msk [vmem:[#allocation2 + $0x151] sm:$0xff] %vm224_vm0, %v2825_v45  ;;  %362 = vst.msk [vmem:[#allocation2 + $0x159] sm:$0xff] %vm224_vm0, %v2826_v46  ;;  %3035 = vrot.lane.b32.xlu1 %v3034_v59, %s3773_s11  ;;  %v411_v6 = vld [vmem:[#allocation2 + $0x61] sm:$0xff]  ;;  %v412_v7 = vld [vmem:[#allocation2 + $0x69] sm:$0xff]  ;;  %v3054_v8 = vpack.i.bf16 %v414_v5, %v413_v4 }
  0x32   : > { %365 = vst.msk [vmem:[#allocation2 + $0x181] sm:$0xff] %vm224_vm0, %v2833_v47  ;;  %366 = vst.msk [vmem:[#allocation2 + $0x189] sm:$0xff] %vm224_vm0, %v2834_v48  ;;  %3025 = vrot.lane.b32.xlu0 %v3024_v60, %s3773_s11  ;;  %v3049_v9 = vpack.i.bf16 %v412_v7, %v411_v6  ;;  %v449_v10 = vld [vmem:[#allocation2 + $0x7a] sm:$0xff]  ;;  %v450_v11 = vld [vmem:[#allocation2 + $0x82] sm:$0xff] }
  0x33   : > { %1417 = vst.msk [vmem:[#allocation3] sm:$0xff] %vm799_vm3, %v3771_v0  ;;  %1418 = vst.msk [vmem:[#allocation3 + $0x8] sm:$0xff] %vm799_vm3, %v3771_v0  ;;  %v447_v12 = vld [vmem:[#allocation2 + $0x62] sm:$0xff]  ;;  %v448_v13 = vld [vmem:[#allocation2 + $0x6a] sm:$0xff]  ;;  %v3064_v14 = vpack.i.bf16 %v450_v11, %v449_v10 }
  0x34   : > { %1422 = vst.msk [vmem:[#allocation3 + $0x198] sm:$0xff] %vm799_vm3, %v3771_v0  ;;  %1423 = vst.msk [vmem:[#allocation3 + $0x1a0] sm:$0xff] %vm799_vm3, %v3771_v0  ;;  %v3059_v15 = vpack.i.bf16 %v448_v13, %v447_v12  ;;  %v417_v16 = vld [vmem:[#allocation2 + $0xa9] sm:$0xff]  ;;  %v418_v17 = vld [vmem:[#allocation2 + $0xb1] sm:$0xff] }
  0x35   : > { %3045 = vrot.lane.b32.xlu1 %v3044_v2, %s3772_s10  ;;  %v415_v18 = vld [vmem:[#allocation2 + $0x91] sm:$0xff]  ;;  %v416_v19 = vld [vmem:[#allocation2 + $0x99] sm:$0xff]  ;;  %v3074_v20 = vpack.i.bf16 %v418_v17, %v417_v16  ;;  %v422_v29 = vld [vmem:[#allocation2 + $0xe1] sm:$0xff]  ;;  %1424 = vst.msk [vmem:[#allocation3 + $0x1a8] sm:$0x3] %vm1419_vm8, %v3771_v0 }
  0x36   : > { %3040 = vrot.lane.b32.xlu0 %v3039_v3, %s3772_s10  ;;  %v3069_v21 = vpack.i.bf16 %v416_v19, %v415_v18  ;;  %v453_v22 = vld [vmem:[#allocation2 + $0xaa] sm:$0xff]  ;;  %v454_v23 = vld [vmem:[#allocation2 + $0xb2] sm:$0xff]  ;;  %v452_v25 = vld [vmem:[#allocation2 + $0x9a] sm:$0xff]  ;;  %1420 = vst.msk [vmem:[#allocation3 + $0x10] sm:$0x3] %vm1419_vm8, %v3771_v0 }
  0x37   : > { %v451_v24 = vld [vmem:[#allocation2 + $0x92] sm:$0xff]  ;;  %v3084_v26 = vpack.i.bf16 %v454_v23, %v453_v22  ;;  %v419_v30 = vld [vmem:[#allocation2 + $0xc1] sm:$0xff]  ;;  %v420_v31 = vld [vmem:[#allocation2 + $0xc9] sm:$0xff]  ;;  %1461 = vst.msk [vmem:[#allocation3 + $0x1a9] sm:$0x1] %vm1425_vm9, %v3771_v0 }
  0x38   : > { %v3079_v27 = vpack.i.bf16 %v452_v25, %v451_v24  ;;  %v421_v28 = vld [vmem:[#allocation2 + $0xd9] sm:$0xff]  ;;  %v3089_v33 = vpack.i.bf16 %v420_v31, %v419_v30  ;;  %v458_v35 = vld [vmem:[#allocation2 + $0xe2] sm:$0xff]  ;;  %v456_v37 = vld [vmem:[#allocation2 + $0xca] sm:$0xff]  ;;  %1426 = vst.msk [vmem:[#allocation3] sm:$0x1] %vm1425_vm9, %v3771_v0 }
  0x39   : > { %3055 = vrot.lane.b32.xlu1 %v3054_v8, %s3773_s11  ;;  %v3094_v32 = vpack.i.bf16 %v422_v29, %v421_v28  ;;  %v457_v34 = vld [vmem:[#allocation2 + $0xda] sm:$0xff]  ;;  %v455_v36 = vld [vmem:[#allocation2 + $0xc2] sm:$0xff]  ;;  %v426_v41 = vld [vmem:[#allocation2 + $0x111] sm:$0xff]  ;;  %1427 = vst.msk [vmem:[#allocation3 + $0x18] sm:$0x1] %vm1425_vm9, %v3771_v0 }
  0x3a   : > { %3050 = vrot.lane.b32.xlu0 %v3049_v9, %s3773_s11  ;;  %v3104_v38 = vpack.i.bf16 %v458_v35, %v457_v34  ;;  %v3099_v39 = vpack.i.bf16 %v456_v37, %v455_v36  ;;  %v425_v40 = vld [vmem:[#allocation2 + $0x109] sm:$0xff]  ;;  %v423_v42 = vld [vmem:[#allocation2 + $0xf1] sm:$0xff]  ;;  %v424_v43 = vld [vmem:[#allocation2 + $0xf9] sm:$0xff]  ;;  %1428 = vst.msk [vmem:[#allocation3 + $0x30] sm:$0x1] %vm1425_vm9, %v3771_v0 }
  0x3b   : > { %v3114_v44 = vpack.i.bf16 %v426_v41, %v425_v40  ;;  %v3109_v45 = vpack.i.bf16 %v424_v43, %v423_v42  ;;  %v461_v46 = vld [vmem:[#allocation2 + $0x10a] sm:$0xff]  ;;  %v462_v47 = vld [vmem:[#allocation2 + $0x112] sm:$0xff]  ;;  %v460_v49 = vld [vmem:[#allocation2 + $0xfa] sm:$0xff]  ;;  %1429 = vst.msk [vmem:[#allocation3 + $0x48] sm:$0x1] %vm1425_vm9, %v3771_v0 }
  0x3c   : > { %v459_v48 = vld [vmem:[#allocation2 + $0xf2] sm:$0xff]  ;;  %v3124_v50 = vpack.i.bf16 %v462_v47, %v461_v46  ;;  %v430_v53 = vld [vmem:[#allocation2 + $0x141] sm:$0xff]  ;;  %v428_v55 = vld [vmem:[#allocation2 + $0x129] sm:$0xff]  ;;  %1430 = vst.msk [vmem:[#allocation3 + $0x60] sm:$0x1] %vm1425_vm9, %v3771_v0 }
  0x3d   : > { %3065 = vrot.lane.b32.xlu1 %v3064_v14, %s3772_s10  ;;  %v3119_v51 = vpack.i.bf16 %v460_v49, %v459_v48  ;;  %v429_v52 = vld [vmem:[#allocation2 + $0x139] sm:$0xff]  ;;  %v427_v54 = vld [vmem:[#allocation2 + $0x121] sm:$0xff]  ;;  %v464_v61 = vld [vmem:[#allocation2 + $0x12a] sm:$0xff]  ;;  %1431 = vst.msk [vmem:[#allocation3 + $0x78] sm:$0x1] %vm1425_vm9, %v3771_v0 }
  0x3e   : > { %3060 = vrot.lane.b32.xlu0 %v3059_v15, %s3772_s10  ;;  %v3134_v56 = vpack.i.bf16 %v430_v53, %v429_v52  ;;  %v3129_v57 = vpack.i.bf16 %v428_v55, %v427_v54  ;;  %v465_v58 = vld [vmem:[#allocation2 + $0x13a] sm:$0xff]  ;;  %v466_v59 = vld [vmem:[#allocation2 + $0x142] sm:$0xff]  ;;  %v434_v2 = vld [vmem:[#allocation2 + $0x171] sm:$0xff]  ;;  %1432 = vst.msk [vmem:[#allocation3 + $0x90] sm:$0x1] %vm1425_vm9, %v3771_v0 }
  0x3f   : > { %v463_v60 = vld [vmem:[#allocation2 + $0x122] sm:$0xff]  ;;  %v3144_v62 = vpack.i.bf16 %v466_v59, %v465_v58  ;;  %v431_v3 = vld [vmem:[#allocation2 + $0x151] sm:$0xff]  ;;  %v432_v4 = vld [vmem:[#allocation2 + $0x159] sm:$0xff]  ;;  %1433 = vst.msk [vmem:[#allocation3 + $0xa8] sm:$0x1] %vm1425_vm9, %v3771_v0 }
  0x40   : > { %v3139_v63 = vpack.i.bf16 %v464_v61, %v463_v60  ;;  %v433_v1 = vld [vmem:[#allocation2 + $0x169] sm:$0xff]  ;;  %v3149_v6 = vpack.i.bf16 %v432_v4, %v431_v3  ;;  %v470_v8 = vld [vmem:[#allocation2 + $0x172] sm:$0xff]  ;;  %v468_v10 = vld [vmem:[#allocation2 + $0x15a] sm:$0xff]  ;;  %1434 = vst.msk [vmem:[#allocation3 + $0xc0] sm:$0x1] %vm1425_vm9, %v3771_v0 }
  0x41   : > { %3075 = vrot.lane.b32.xlu1 %v3074_v20, %s3773_s11  ;;  %v3154_v5 = vpack.i.bf16 %v434_v2, %v433_v1  ;;  %v469_v7 = vld [vmem:[#allocation2 + $0x16a] sm:$0xff]  ;;  %v467_v9 = vld [vmem:[#allocation2 + $0x152] sm:$0xff]  ;;  %v403_v13 = vld [vmem:[#allocation2 + $0x1] sm:$0xff]  ;;  %1435 = vst.msk [vmem:[#allocation3 + $0xd8] sm:$0x1] %vm1425_vm9, %v3771_v0 }
  0x42   : > { %3070 = vrot.lane.b32.xlu0 %v3069_v21, %s3773_s11  ;;  %v3164_v11 = vpack.i.bf16 %v470_v8, %v469_v7  ;;  %v3159_v12 = vpack.i.bf16 %v468_v10, %v467_v9  ;;  %v404_v14 = vld [vmem:[#allocation2 + $0x9] sm:$0xff]  ;;  %v435_v15 = vld [vmem:[#allocation2 + $0x181] sm:$0xff]  ;;  %v437_v21 = vld [vmem:[#allocation2 + $0x199] sm:$0xff]  ;;  %1436 = vst.msk [vmem:[#allocation3 + $0xf0] sm:$0x1] %vm1425_vm9, %v3771_v0 }
  0x43   : > { %v436_v16 = vld [vmem:[#allocation2 + $0x189] sm:$0xff]  ;;  %v3174_v17 = vpack.i.bf16 %v404_v14, %v403_v13  ;;  %v438_v22 = vld [vmem:[#allocation2 + $0x1a1] sm:$0xff]  ;;  %v369_v36 = vld [vmem:[#allocation2 + $0x18] sm:$0xff]  ;;  %1437 = vst.msk [vmem:[#allocation3 + $0x108] sm:$0x1] %vm1425_vm9, %v3771_v0 }
  0x44   : > { %v3169_v18 = vpack.i.bf16 %v436_v16, %v435_v15  ;;  %v471_v19 = vld [vmem:[#allocation2 + $0x182] sm:$0xff]  ;;  %v472_v20 = vld [vmem:[#allocation2 + $0x18a] sm:$0xff]  ;;  %v3179_v24 = vpack.i.bf16 %v438_v22, %v437_v21  ;;  %v473_v25 = vld [vmem:[#allocation2 + $0x19a] sm:$0xff]  ;;  %1438 = vst.msk [vmem:[#allocation3 + $0x120] sm:$0x1] %vm1425_vm9, %v3771_v0 }
  0x45   : > { %3085 = vrot.lane.b32.xlu1 %v3084_v26, %s3772_s10  ;;  %v3184_v23 = vpack.i.bf16 %v472_v20, %v471_v19  ;;  %v474_v26 = vld [vmem:[#allocation2 + $0x1a2] sm:$0xff]  ;;  %v440_v28 = vld [vmem:[#allocation2 + $0xa] sm:$0xff]  ;;  %v372_v53 = vld [vmem:[#allocation2 + $0x38] sm:$0xff]  ;;  %1439 = vst.msk [vmem:[#allocation3 + $0x138] sm:$0x1] %vm1425_vm9, %v3771_v0 }
  0x46   : > { %3080 = vrot.lane.b32.xlu0 %v3079_v27, %s3772_s10  ;;  %v439_v27 = vld [vmem:[#allocation2 + $0x2] sm:$0xff]  ;;  %v3194_v29 = vpack.i.bf16 %v474_v26, %v473_v25  ;;  %v3701_v47 = vld [vmem:[%s4994_s1 + $0x10] ss:$0 sps:$4 sm:$0x33]   ;;  %v377_v21 = vld [vmem:[#allocation2 + $0x78] sm:$0xff] }
  0x47   : > { %v3189_v30 = vpack.i.bf16 %v440_v28, %v439_v27  ;;  %v3699_v31 = vld [vmem:[%s4994_s1] sm:$0xff]   ;;  %v371_v52 = vld [vmem:[#allocation2 + $0x30] sm:$0xff]  ;;  %v373_v58 = vld [vmem:[#allocation2 + $0x48] sm:$0xff]  ;;  %1440 = vst.msk [vmem:[#allocation3 + $0x150] sm:$0x1] %vm1425_vm9, %v3771_v0 }
  0x48   : > { %2890 = vmatprep.subr.bf16.mxu0 %v3699_v31  ;;  %v370_v37 = vld [vmem:[#allocation2 + $0x20] sm:$0xff]  ;;  %v374_v59 = vld [vmem:[#allocation2 + $0x50] sm:$0xff]  ;;  %v376_v15 = vld [vmem:[#allocation2 + $0x68] sm:$0xff]  ;;  %1441 = vst.msk [vmem:[#allocation3 + $0x168] sm:$0x1] %vm1425_vm9, %v3771_v0 }
  0x49   : > { %3095 = vrot.lane.b32.xlu1 %v3094_v32, %s3773_s11  ;;  %2891 = vmatpush3.bf16.msra.mxu0 %v3699_v31  ;;  %v375_v14 = vld [vmem:[#allocation2 + $0x60] sm:$0xff]  ;;  %1442 = vst.msk [vmem:[#allocation3 + $0x180] sm:$0x1] %vm1425_vm9, %v3771_v0  ;;  %1443 = vst.msk [vmem:[#allocation3 + $0x198] sm:$0x1] %vm1425_vm9, %v3771_v0 }
  0x4a   : > { %3090 = vrot.lane.b32.xlu0 %v3089_v33, %s3773_s11  ;;  %v378_v22 = vld [vmem:[#allocation2 + $0x80] sm:$0xff]  ;;  %1445 = vst.msk [vmem:[#allocation3 + $0x29] sm:$0x1] %vm1425_vm9, %v3771_v0  ;;  %1446 = vst.msk [vmem:[#allocation3 + $0x41] sm:$0x1] %vm1425_vm9, %v3771_v0 }
  0x4b   : > { %1447 = vst.msk [vmem:[#allocation3 + $0x59] sm:$0x1] %vm1425_vm9, %v3771_v0  ;;  %1448 = vst.msk [vmem:[#allocation3 + $0x71] sm:$0x1] %vm1425_vm9, %v3771_v0 }
  0x4c   : > { %1449 = vst.msk [vmem:[#allocation3 + $0x89] sm:$0x1] %vm1425_vm9, %v3771_v0  ;;  %1450 = vst.msk [vmem:[#allocation3 + $0xa1] sm:$0x1] %vm1425_vm9, %v3771_v0 }
  0x4d   : > { %3105 = vrot.lane.b32.xlu1 %v3104_v38, %s3772_s10  ;;  %v3700_v38 = vld [vmem:[%s4994_s1 + $0x8] sm:$0xff]   ;;  %1451 = vst.msk [vmem:[#allocation3 + $0xb9] sm:$0x1] %vm1425_vm9, %v3771_v0  ;;  %1452 = vst.msk [vmem:[#allocation3 + $0xd1] sm:$0x1] %vm1425_vm9, %v3771_v0 }
  0x4e   : > { %3100 = vrot.lane.b32.xlu0 %v3099_v39, %s3772_s10  ;;  %2892 = vmatprep.subr.bf16.mxu0 %v3700_v38  ;;  %1453 = vst.msk [vmem:[#allocation3 + $0xe9] sm:$0x1] %vm1425_vm9, %v3771_v0  ;;  %1454 = vst.msk [vmem:[#allocation3 + $0x101] sm:$0x1] %vm1425_vm9, %v3771_v0 }
  0x4f   : > { %2893 = vmatpush3.bf16.msra.mxu0 %v3700_v38  ;;  %1455 = vst.msk [vmem:[#allocation3 + $0x119] sm:$0x1] %vm1425_vm9, %v3771_v0  ;;  %1456 = vst.msk [vmem:[#allocation3 + $0x131] sm:$0x1] %vm1425_vm9, %v3771_v0 }
  0x50   : > { %2970 = vmatprep.subr.msk.bf16.mxu0 %vm1220_vm4, %v3701_v47  ;;  %1457 = vst.msk [vmem:[#allocation3 + $0x149] sm:$0x1] %vm1425_vm9, %v3771_v0  ;;  %1458 = vst.msk [vmem:[#allocation3 + $0x161] sm:$0x1] %vm1425_vm9, %v3771_v0 }
  0x51   : > { %3115 = vrot.lane.b32.xlu1 %v3114_v44, %s3773_s11  ;;  %1459 = vst.msk [vmem:[#allocation3 + $0x179] sm:$0x1] %vm1425_vm9, %v3771_v0  ;;  %1460 = vst.msk [vmem:[#allocation3 + $0x191] sm:$0x1] %vm1425_vm9, %v3771_v0 }
  0x52   : > { %3110 = vrot.lane.b32.xlu0 %v3109_v45, %s3773_s11  ;;  %1444 = vst.msk [vmem:[#allocation3 + $0x11] sm:$0x1] %vm1425_vm9, %v3771_v0  ;;  %v4436_v0 = vld [vmem:[%s4995_s2] ss:$0 sm:$0xff] }
  0x55   : > { %3125 = vrot.lane.b32.xlu1 %v3124_v50, %s3772_s10 }
  0x56   : > { %3120 = vrot.lane.b32.xlu0 %v3119_v51, %s3772_s10  ;;  %v1222_v51 = vsel %vm1220_vm4, %v3701_v47, 0 }
  0x57   : > { %2895 = vmatpush3.bf16.msra.mxu0 %v1222_v51 }
  0x59   : > { %3135 = vrot.lane.b32.xlu1 %v3134_v56, %s3773_s11 }
  0x5a   : > { %3130 = vrot.lane.b32.xlu0 %v3129_v57, %s3773_s11 }
  0x5d   : > { %3145 = vrot.lane.b32.xlu1 %v3144_v62, %s3772_s10 }
  0x5e   : > { %3140 = vrot.lane.b32.xlu0 %v3139_v63, %s3772_s10 }
  0x61   : > { %3155 = vrot.lane.b32.xlu1 %v3154_v5, %s3773_s11 }
  0x62   : > { %3150 = vrot.lane.b32.xlu0 %v3149_v6, %s3773_s11 }
  0x65   : > { %3165 = vrot.lane.b32.xlu1 %v3164_v11, %s3772_s10 }
  0x66   : > { %3160 = vrot.lane.b32.xlu0 %v3159_v12, %s3772_s10 }
  0x69   : > { %3175 = vrot.lane.b32.xlu1 %v3174_v17, %s3773_s11 }
  0x6a   : > { %3170 = vrot.lane.b32.xlu0 %v3169_v18, %s3773_s11 }
  0x6d   : > { %3185 = vrot.lane.b32.xlu1 %v3184_v23, %s3772_s10 }
  0x6e   : > { %3180 = vrot.lane.b32.xlu0 %v3179_v24, %s3773_s11 }
  0x71   : > { %3195 = vrot.lane.b32.xlu1 %v3194_v29, %s3772_s10 }
  0x72   : > { %3190 = vrot.lane.b32.xlu0 %v3189_v30, %s3772_s10 }
  0x9f   : > { %v3031_v32 = vpop.permute.xlu1 %3030 }
  0xa0   : > { %v3033_v33 = vunpack.i.h.bf16 %v3031_v32  ;;  %v3032_v34 = vunpack.i.l.bf16 %v3031_v32  ;;  %v3021_v35 = vpop.permute.xlu0 %3020 }
  0xa1   : > { %v3023_v39 = vunpack.i.h.bf16 %v3021_v35  ;;  %v3022_v40 = vunpack.i.l.bf16 %v3021_v35 }
  0xa3   : > { %v3036_v41 = vpop.permute.xlu1 %3035  ;;  %v765_v42 = vsel %vm224_vm0, %v369_v36, %v3022_v40  ;;  %v766_v43 = vsel %vm224_vm0, %v370_v37, %v3023_v39  ;;  %v379_v40 = vld [vmem:[#allocation2 + $0x90] sm:$0xff] }
  0xa4   : > { %v3026_v44 = vpop.permute.xlu0 %3025  ;;  %v4052_v45 = vsel %vm799_vm3, %v765_v42, %v3032_v34  ;;  %v4055_v46 = vsel %vm799_vm3, %v766_v43, %v3033_v33  ;;  %v3038_v55 = vunpack.i.h.bf16 %v3036_v41  ;;  %v3037_v56 = vunpack.i.l.bf16 %v3036_v41  ;;  %v380_v41 = vld [vmem:[#allocation2 + $0x98] sm:$0xff] }
  0xa5   : > { %v3199_v48 = vpack.i.bf16 %v4055_v46, %v4052_v45  ;;  %v3028_v49 = vunpack.i.h.bf16 %v3026_v44  ;;  %v3027_v50 = vunpack.i.l.bf16 %v3026_v44 }
  0xa6   : > { %v770_v6 = vsel %vm224_vm0, %v374_v59, %v3038_v55  ;;  %v769_v7 = vsel %vm224_vm0, %v373_v58, %v3037_v56 }
  0xa7   : > { %3200 = vrot.lane.b32.xlu0 %v3199_v48, %s3774_s23  ;;  %v3046_v54 = vpop.permute.xlu1 %3045  ;;  %v768_v1 = vsel %vm224_vm0, %v372_v53, %v3028_v49  ;;  %v767_v2 = vsel %vm224_vm0, %v371_v52, %v3027_v50  ;;  %v381_v49 = vld [vmem:[#allocation2 + $0xa8] sm:$0xff]  ;;  %v382_v50 = vld [vmem:[#allocation2 + $0xb0] sm:$0xff] }
  0xa8   : > { %v3041_v57 = vpop.permute.xlu0 %3040  ;;  %v3048_v60 = vunpack.i.h.bf16 %v3046_v54  ;;  %v3047_v61 = vunpack.i.l.bf16 %v3046_v54 }
  0xa9   : > { %v3043_v62 = vunpack.i.h.bf16 %v3041_v57  ;;  %v3042_v63 = vunpack.i.l.bf16 %v3041_v57 }
  0xaa   : > { %v4076_v10 = vsel %vm799_vm3, %v769_v7, %v3047_v61  ;;  %v4079_v11 = vsel %vm799_vm3, %v770_v6, %v3048_v60  ;;  %v383_v7 = vld [vmem:[#allocation2 + $0xc0] sm:$0xff] }
  0xab   : > { %v3056_v3 = vpop.permute.xlu1 %3055  ;;  %v4066_v4 = vsel %vm799_vm3, %v767_v2, %v3042_v63  ;;  %v4069_v5 = vsel %vm799_vm3, %v768_v1, %v3043_v62  ;;  %v3214_v20 = vpack.i.bf16 %v4079_v11, %v4076_v10 }
  0xac   : > { %v3051_v8 = vpop.permute.xlu0 %3050  ;;  %v3204_v9 = vpack.i.bf16 %v4069_v5, %v4066_v4  ;;  %v3058_v17 = vunpack.i.h.bf16 %v3056_v3  ;;  %v3057_v18 = vunpack.i.l.bf16 %v3056_v3 }
  0xad   : > { %v3053_v12 = vunpack.i.h.bf16 %v3051_v8  ;;  %v3052_v13 = vunpack.i.l.bf16 %v3051_v8  ;;  %v384_v8 = vld [vmem:[#allocation2 + $0xc8] sm:$0xff] }
  0xae   : > { %3205 = vrot.lane.b32.xlu1 %v3204_v9, %s3774_s23  ;;  %3210 = vrot.lane.b32.xlu0 %v3204_v9, %s3775_s25  ;;  %v774_v32 = vsel %vm224_vm0, %v378_v22, %v3058_v17  ;;  %v773_v33 = vsel %vm224_vm0, %v377_v21, %v3057_v18  ;;  %v386_v17 = vld [vmem:[#allocation2 + $0xe0] sm:$0xff] }
  0xaf   : > { %v3066_v16 = vpop.permute.xlu1 %3065  ;;  %v772_v27 = vsel %vm224_vm0, %v376_v15, %v3053_v12  ;;  %v771_v28 = vsel %vm224_vm0, %v375_v14, %v3052_v13 }
  0xb0   : > { %v3061_v19 = vpop.permute.xlu0 %3060  ;;  %v3068_v23 = vunpack.i.h.bf16 %v3066_v16  ;;  %v3067_v24 = vunpack.i.l.bf16 %v3066_v16  ;;  %v385_v16 = vld [vmem:[#allocation2 + $0xd8] sm:$0xff] }
  0xb1   : > { %v3063_v25 = vunpack.i.h.bf16 %v3061_v19  ;;  %v3062_v26 = vunpack.i.l.bf16 %v3061_v19 }
  0xb2   : > { %3215 = vrot.lane.b32.xlu1 %v3214_v20, %s3775_s25  ;;  %3220 = vrot.lane.b32.xlu0 %v3214_v20, %s3774_s23  ;;  %v4100_v36 = vsel %vm799_vm3, %v773_v33, %v3067_v24  ;;  %v4103_v37 = vsel %vm799_vm3, %v774_v32, %v3068_v23 }
  0xb3   : > { %v3076_v29 = vpop.permute.xlu1 %3075  ;;  %v4090_v30 = vsel %vm799_vm3, %v771_v28, %v3062_v26  ;;  %v4093_v31 = vsel %vm799_vm3, %v772_v27, %v3063_v25  ;;  %v3234_v48 = vpack.i.bf16 %v4103_v37, %v4100_v36 }
  0xb4   : > { %v3071_v34 = vpop.permute.xlu0 %3070  ;;  %v3224_v35 = vpack.i.bf16 %v4093_v31, %v4090_v30  ;;  %v3078_v43 = vunpack.i.h.bf16 %v3076_v29  ;;  %v3077_v44 = vunpack.i.l.bf16 %v3076_v29 }
  0xb5   : > { %v3073_v38 = vunpack.i.h.bf16 %v3071_v34  ;;  %v3072_v39 = vunpack.i.l.bf16 %v3071_v34 }
  0xb6   : > { %3225 = vrot.lane.b32.xlu1 %v3224_v35, %s3774_s23  ;;  %3230 = vrot.lane.b32.xlu0 %v3224_v35, %s3775_s25  ;;  %v778_v60 = vsel %vm224_vm0, %v382_v50, %v3078_v43  ;;  %v777_v61 = vsel %vm224_vm0, %v381_v49, %v3077_v44  ;;  %v390_v49 = vld [vmem:[#allocation2 + $0x110] sm:$0xff] }
  0xb7   : > { %v3086_v42 = vpop.permute.xlu1 %3085  ;;  %v776_v55 = vsel %vm224_vm0, %v380_v41, %v3073_v38  ;;  %v775_v56 = vsel %vm224_vm0, %v379_v40, %v3072_v39  ;;  %v387_v39 = vld [vmem:[#allocation2 + $0xf0] sm:$0xff]  ;;  %v388_v40 = vld [vmem:[#allocation2 + $0xf8] sm:$0xff] }
  0xb8   : > { %v3081_v47 = vpop.permute.xlu0 %3080  ;;  %v3088_v51 = vunpack.i.h.bf16 %v3086_v42  ;;  %v3087_v52 = vunpack.i.l.bf16 %v3086_v42 }
  0xb9   : > { %v3083_v53 = vunpack.i.h.bf16 %v3081_v47  ;;  %v3082_v54 = vunpack.i.l.bf16 %v3081_v47 }
  0xba   : > { %3235 = vrot.lane.b32.xlu1 %v3234_v48, %s3775_s25  ;;  %3240 = vrot.lane.b32.xlu0 %v3234_v48, %s3774_s23  ;;  %v4124_v1 = vsel %vm799_vm3, %v777_v61, %v3087_v52  ;;  %v4127_v2 = vsel %vm799_vm3, %v778_v60, %v3088_v51  ;;  %v389_v48 = vld [vmem:[#allocation2 + $0x108] sm:$0xff] }
  0xbb   : > { %v3096_v57 = vpop.permute.xlu1 %3095  ;;  %v4114_v58 = vsel %vm799_vm3, %v775_v56, %v3082_v54  ;;  %v4117_v59 = vsel %vm799_vm3, %v776_v55, %v3083_v53  ;;  %v3254_v15 = vpack.i.bf16 %v4127_v2, %v4124_v1 }
  0xbc   : > { %v3091_v62 = vpop.permute.xlu0 %3090  ;;  %v3244_v63 = vpack.i.bf16 %v4117_v59, %v4114_v58  ;;  %v3098_v12 = vunpack.i.h.bf16 %v3096_v57  ;;  %v3097_v13 = vunpack.i.l.bf16 %v3096_v57 }
  0xbd   : > { %v3093_v3 = vunpack.i.h.bf16 %v3091_v62  ;;  %v3092_v6 = vunpack.i.l.bf16 %v3091_v62 }
  0xbe   : > { %3245 = vrot.lane.b32.xlu1 %v3244_v63, %s3774_s23  ;;  %3250 = vrot.lane.b32.xlu0 %v3244_v63, %s3775_s25  ;;  %v782_v27 = vsel %vm224_vm0, %v386_v17, %v3098_v12  ;;  %v781_v28 = vsel %vm224_vm0, %v385_v16, %v3097_v13  ;;  %v391_v12 = vld [vmem:[#allocation2 + $0x120] sm:$0xff]  ;;  %v392_v13 = vld [vmem:[#allocation2 + $0x128] sm:$0xff] }
  0xbf   : > { %v3106_v9 = vpop.permute.xlu1 %3105  ;;  %v780_v22 = vsel %vm224_vm0, %v384_v8, %v3093_v3  ;;  %v779_v23 = vsel %vm224_vm0, %v383_v7, %v3092_v6 }
  0xc0   : > { %v3101_v14 = vpop.permute.xlu0 %3100  ;;  %v3108_v18 = vunpack.i.h.bf16 %v3106_v9  ;;  %v3107_v19 = vunpack.i.l.bf16 %v3106_v9 }
  0xc1   : > { %v3103_v20 = vunpack.i.h.bf16 %v3101_v14  ;;  %v3102_v21 = vunpack.i.l.bf16 %v3101_v14 }
  0xc2   : > { %3255 = vrot.lane.b32.xlu1 %v3254_v15, %s3775_s25  ;;  %3260 = vrot.lane.b32.xlu0 %v3254_v15, %s3774_s23  ;;  %v4148_v33 = vsel %vm799_vm3, %v781_v28, %v3107_v19  ;;  %v4151_v34 = vsel %vm799_vm3, %v782_v27, %v3108_v18  ;;  %v393_v19 = vld [vmem:[#allocation2 + $0x138] sm:$0xff] }
  0xc3   : > { %v3116_v24 = vpop.permute.xlu1 %3115  ;;  %v4138_v25 = vsel %vm799_vm3, %v779_v23, %v3102_v21  ;;  %v4141_v26 = vsel %vm799_vm3, %v780_v22, %v3103_v20  ;;  %v3274_v47 = vpack.i.bf16 %v4151_v34, %v4148_v33  ;;  %v394_v20 = vld [vmem:[#allocation2 + $0x140] sm:$0xff] }
  0xc4   : > { %v3111_v29 = vpop.permute.xlu0 %3110  ;;  %v3264_v32 = vpack.i.bf16 %v4141_v26, %v4138_v25  ;;  %v3118_v42 = vunpack.i.h.bf16 %v3116_v24  ;;  %v3117_v43 = vunpack.i.l.bf16 %v3116_v24 }
  0xc5   : > { %v3113_v35 = vunpack.i.h.bf16 %v3111_v29  ;;  %v3112_v38 = vunpack.i.l.bf16 %v3111_v29 }
  0xc6   : > { %3265 = vrot.lane.b32.xlu1 %v3264_v32, %s3774_s23  ;;  %3270 = vrot.lane.b32.xlu0 %v3264_v32, %s3775_s25  ;;  %v786_v61 = vsel %vm224_vm0, %v390_v49, %v3118_v42  ;;  %v785_v62 = vsel %vm224_vm0, %v389_v48, %v3117_v43  ;;  %v395_v48 = vld [vmem:[#allocation2 + $0x150] sm:$0xff]  ;;  %v396_v49 = vld [vmem:[#allocation2 + $0x158] sm:$0xff] }
  0xc7   : > { %v3126_v41 = vpop.permute.xlu1 %3125  ;;  %v784_v54 = vsel %vm224_vm0, %v388_v40, %v3113_v35  ;;  %v783_v55 = vsel %vm224_vm0, %v387_v39, %v3112_v38 }
  0xc8   : > { %v3121_v44 = vpop.permute.xlu0 %3120  ;;  %v3128_v50 = vunpack.i.h.bf16 %v3126_v41  ;;  %v3127_v51 = vunpack.i.l.bf16 %v3126_v41 }
  0xc9   : > { %v3123_v52 = vunpack.i.h.bf16 %v3121_v44  ;;  %v3122_v53 = vunpack.i.l.bf16 %v3121_v44 }
  0xca   : > { %3275 = vrot.lane.b32.xlu1 %v3274_v47, %s3775_s25  ;;  %3280 = vrot.lane.b32.xlu0 %v3274_v47, %s3774_s23  ;;  %v4172_v6 = vsel %vm799_vm3, %v785_v62, %v3127_v51  ;;  %v4175_v7 = vsel %vm799_vm3, %v786_v61, %v3128_v50 }
  0xcb   : > { %v3136_v56 = vpop.permute.xlu1 %3135  ;;  %v4162_v57 = vsel %vm799_vm3, %v783_v55, %v3122_v53  ;;  %v4165_v60 = vsel %vm799_vm3, %v784_v54, %v3123_v52  ;;  %v3294_v18 = vpack.i.bf16 %v4175_v7, %v4172_v6  ;;  %v397_v55 = vld [vmem:[#allocation2 + $0x168] sm:$0xff] }
  0xcc   : > { %v3131_v63 = vpop.permute.xlu0 %3130  ;;  %v3284_v3 = vpack.i.bf16 %v4165_v60, %v4162_v57  ;;  %v3138_v15 = vunpack.i.h.bf16 %v3136_v56  ;;  %v3137_v16 = vunpack.i.l.bf16 %v3136_v56  ;;  %v398_v56 = vld [vmem:[#allocation2 + $0x170] sm:$0xff] }
  0xcd   : > { %v3133_v8 = vunpack.i.h.bf16 %v3131_v63  ;;  %v3132_v9 = vunpack.i.l.bf16 %v3131_v63 }
  0xce   : > { %3285 = vrot.lane.b32.xlu1 %v3284_v3, %s3774_s23  ;;  %3290 = vrot.lane.b32.xlu0 %v3284_v3, %s3775_s25  ;;  %v790_v38 = vsel %vm224_vm0, %v394_v20, %v3138_v15  ;;  %v789_v39 = vsel %vm224_vm0, %v393_v19, %v3137_v16  ;;  %v399_v19 = vld [vmem:[#allocation2 + $0x180] sm:$0xff]  ;;  %v400_v20 = vld [vmem:[#allocation2 + $0x188] sm:$0xff] }
  0xcf   : > { %v3146_v14 = vpop.permute.xlu1 %3145  ;;  %v788_v27 = vsel %vm224_vm0, %v392_v13, %v3133_v8  ;;  %v787_v28 = vsel %vm224_vm0, %v391_v12, %v3132_v9 }
  0xd0   : > { %v3141_v17 = vpop.permute.xlu0 %3140  ;;  %v3148_v21 = vunpack.i.h.bf16 %v3146_v14  ;;  %v3147_v22 = vunpack.i.l.bf16 %v3146_v14 }
  0xd1   : > { %v3143_v23 = vunpack.i.h.bf16 %v3141_v17  ;;  %v3142_v24 = vunpack.i.l.bf16 %v3141_v17 }
  0xd2   : > { %3295 = vrot.lane.b32.xlu1 %v3294_v18, %s3775_s25  ;;  %3300 = vrot.lane.b32.xlu0 %v3294_v18, %s3774_s23  ;;  %v4196_v42 = vsel %vm799_vm3, %v789_v39, %v3147_v22  ;;  %v4199_v43 = vsel %vm799_vm3, %v790_v38, %v3148_v21 }
  0xd3   : > { %v3156_v29 = vpop.permute.xlu1 %3155  ;;  %v4186_v32 = vsel %vm799_vm3, %v787_v28, %v3142_v24  ;;  %v4189_v35 = vsel %vm799_vm3, %v788_v27, %v3143_v23  ;;  %v3314_v54 = vpack.i.bf16 %v4199_v43, %v4196_v42 }
  0xd4   : > { %v3151_v40 = vpop.permute.xlu0 %3150  ;;  %v3304_v41 = vpack.i.bf16 %v4189_v35, %v4186_v32  ;;  %v3158_v51 = vunpack.i.h.bf16 %v3156_v29  ;;  %v3157_v52 = vunpack.i.l.bf16 %v3156_v29 }
  0xd5   : > { %v3153_v44 = vunpack.i.h.bf16 %v3151_v40  ;;  %v3152_v47 = vunpack.i.l.bf16 %v3151_v40 }
  0xd6   : > { %3305 = vrot.lane.b32.xlu1 %v3304_v41, %s3774_s23  ;;  %3310 = vrot.lane.b32.xlu0 %v3304_v41, %s3775_s25  ;;  %v794_v15 = vsel %vm224_vm0, %v398_v56, %v3158_v51  ;;  %v793_v16 = vsel %vm224_vm0, %v397_v55, %v3157_v52 }
  0xd7   : > { %v3166_v50 = vpop.permute.xlu1 %3165  ;;  %v792_v8 = vsel %vm224_vm0, %v396_v49, %v3153_v44  ;;  %v791_v9 = vsel %vm224_vm0, %v395_v48, %v3152_v47  ;;  %v401_v44 = vld [vmem:[#allocation2 + $0x198] sm:$0xff]  ;;  %v402_v47 = vld [vmem:[#allocation2 + $0x1a0] sm:$0xff] }
  0xd8   : > { %v3161_v53 = vpop.permute.xlu0 %3160  ;;  %v3168_v61 = vunpack.i.h.bf16 %v3166_v50  ;;  %v3167_v62 = vunpack.i.l.bf16 %v3166_v50 }
  0xd9   : > { %v3163_v63 = vunpack.i.h.bf16 %v3161_v53  ;;  %v3162_v3 = vunpack.i.l.bf16 %v3161_v53 }
  0xda   : > { %3315 = vrot.lane.b32.xlu1 %v3314_v54, %s3775_s25  ;;  %3320 = vrot.lane.b32.xlu0 %v3314_v54, %s3774_s23  ;;  %v4220_v23 = vsel %vm799_vm3, %v793_v16, %v3167_v62  ;;  %v4223_v24 = vsel %vm799_vm3, %v794_v15, %v3168_v61 }
  0xdb   : > { %v3176_v12 = vpop.permute.xlu1 %3175  ;;  %v4210_v13 = vsel %vm799_vm3, %v791_v9, %v3162_v3  ;;  %v4213_v14 = vsel %vm799_vm3, %v792_v8, %v3163_v63  ;;  %v3334_v41 = vpack.i.bf16 %v4223_v24, %v4220_v23 }
  0xdc   : > { %v3171_v17 = vpop.permute.xlu0 %3170  ;;  %v3324_v18 = vpack.i.bf16 %v4213_v14, %v4210_v13  ;;  %v3178_v15 = vunpack.i.h.bf16 %v3176_v12  ;;  %v3177_v16 = vunpack.i.l.bf16 %v3176_v12 }
  0xdd   : > { %v3173_v21 = vunpack.i.h.bf16 %v3171_v17  ;;  %v3172_v22 = vunpack.i.l.bf16 %v3171_v17  ;;  %v367_v17 = vld [vmem:[#allocation2] sm:$0xff] }
  0xde   : > { %3325 = vrot.lane.b32.xlu1 %v3324_v18, %s3774_s23  ;;  %3330 = vrot.lane.b32.xlu0 %v3324_v18, %s3775_s25  ;;  %v368_v18 = vld [vmem:[#allocation2 + $0x8] sm:$0xff] }
  0xdf   : > { %v3186_v27 = vpop.permute.xlu1 %3185  ;;  %v795_v28 = vsel %vm224_vm0, %v399_v19, %v3172_v22  ;;  %v796_v29 = vsel %vm224_vm0, %v400_v20, %v3173_v21 }
  0xe0   : > { %v3188_v38 = vunpack.i.h.bf16 %v3186_v27  ;;  %v3187_v39 = vunpack.i.l.bf16 %v3186_v27  ;;  %v3181_v40 = vpop.permute.xlu0 %3180  ;;  %v764_v27 = vsel %vm224_vm0, %v368_v18, %v3178_v15 }
  0xe1   : > { %v3183_v48 = vunpack.i.h.bf16 %v3181_v40  ;;  %v3182_v49 = vunpack.i.l.bf16 %v3181_v40 }
  0xe2   : > { %3335 = vrot.lane.b32.xlu1 %v3334_v41, %s3775_s25  ;;  %3340 = vrot.lane.b32.xlu0 %v3334_v41, %s3774_s23  ;;  %v832_v50 = vsel %vm799_vm3, %v795_v28, %v3187_v39  ;;  %v833_v51 = vsel %vm799_vm3, %v796_v29, %v3188_v38  ;;  %v763_v28 = vsel %vm224_vm0, %v367_v17, %v3177_v16 }
  0xe3   : > { %v3196_v52 = vpop.permute.xlu1 %3195  ;;  %v3344_v53 = vpack.i.bf16 %v833_v51, %v832_v50  ;;  %v797_v54 = vsel %vm224_vm0, %v401_v44, %v3182_v49  ;;  %v798_v55 = vsel %vm224_vm0, %v402_v47, %v3183_v48 }
  0xe4   : > { %v3198_v56 = vunpack.i.h.bf16 %v3196_v52  ;;  %v3197_v61 = vunpack.i.l.bf16 %v3196_v52  ;;  %v3191_v8 = vpop.permute.xlu0 %3190 }
  0xe5   : > { %v3193_v19 = vunpack.i.h.bf16 %v3191_v8  ;;  %v3192_v20 = vunpack.i.l.bf16 %v3191_v8 }
  0xe6   : > { %3345 = vrot.lane.b32.xlu1 %v3344_v53, %s3774_s23  ;;  %3350 = vrot.lane.b32.xlu0 %v3344_v53, %s3775_s25  ;;  %v834_v62 = vsel %vm799_vm3, %v797_v54, %v3197_v61  ;;  %v835_v63 = vsel %vm799_vm3, %v798_v55, %v3198_v56  ;;  %s3777_s23 = smov 48  }
  0xe7   : > { %v3354_v3 = vpack.i.bf16 %v835_v63, %v834_v62  ;;  %v800_v41 = vsel %vm799_vm3, %v763_v28, %v3192_v20  ;;  %v801_v12 = vsel %vm799_vm3, %v764_v27, %v3193_v19 }
  0xea   : > { %3355 = vrot.lane.b32.xlu1 %v3354_v3, %s3775_s25 }
 0x119   : > { %v3201_v9 = vpop.permute.xlu0 %3200 }
 0x11a   : > { %v3203_v21 = vunpack.i.h.bf16 %v3201_v9  ;;  %v3202_v22 = vunpack.i.l.bf16 %v3201_v9 }
 0x11c   : > { %v1063_v48 = vsel %vm1062_vm5, %v800_v41, %v3202_v22  ;;  %v1064_v49 = vsel %vm1062_vm5, %v801_v12, %v3203_v21 }
 0x120   : > { %v3206_v29 = vpop.permute.xlu1 %3205  ;;  %v3211_v38 = vpop.permute.xlu0 %3210 }
 0x121   : > { %v3213_v39 = vunpack.i.h.bf16 %v3211_v38  ;;  %v3212_v40 = vunpack.i.l.bf16 %v3211_v38  ;;  %v3208_v44 = vunpack.i.h.bf16 %v3206_v29  ;;  %v3207_v47 = vunpack.i.l.bf16 %v3206_v29 }
 0x123   : > { %v1096_v50 = vsel %vm1095_vm6, %v1063_v48, %v3212_v40  ;;  %v1097_v51 = vsel %vm1095_vm6, %v1064_v49, %v3213_v39  ;;  %v1065_v61 = vsel %vm1062_vm5, %v4052_v45, %v3207_v47  ;;  %v1066_v62 = vsel %vm1062_vm5, %v4055_v46, %v3208_v44 }
 0x124   : > { %v3216_v52 = vpop.permute.xlu1 %3215  ;;  %v3221_v53 = vpop.permute.xlu0 %3220  ;;  %v1128_v54 = vpack.c.bf16 %v1097_v51, %v1096_v50 }
 0x125   : > { %v3218_v55 = vunpack.i.h.bf16 %v3216_v52  ;;  %v3217_v56 = vunpack.i.l.bf16 %v3216_v52  ;;  %v3223_v63 = vunpack.i.h.bf16 %v3221_v53  ;;  %v3222_v3 = vunpack.i.l.bf16 %v3221_v53 }
 0x126   : > { %2896 = vmatprep.mubr.msk.bf16.mxu0 %vm1171_vm7, %v1128_v54 }
 0x127   : > { %v1098_v8 = vsel %vm1095_vm6, %v1065_v61, %v3217_v56  ;;  %v1099_v9 = vsel %vm1095_vm6, %v1066_v62, %v3218_v55  ;;  %v1068_v20 = vsel %vm1062_vm5, %v4069_v5, %v3223_v63  ;;  %v1067_v45 = vsel %vm1062_vm5, %v4066_v4, %v3222_v3 }
 0x128   : > { %v1129_v15 = vpack.c.bf16 %v1099_v9, %v1098_v8  ;;  %v3226_v16 = vpop.permute.xlu1 %3225  ;;  %v3231_v17 = vpop.permute.xlu0 %3230 }
 0x129   : > { %v3233_v18 = vunpack.i.h.bf16 %v3231_v17  ;;  %v3232_v19 = vunpack.i.l.bf16 %v3231_v17  ;;  %v3228_v46 = vunpack.i.h.bf16 %v3226_v16  ;;  %v3227_v21 = vunpack.i.l.bf16 %v3226_v16 }
 0x12a   : > { %2897 = vmatmul.mubr.msk.bf16.vlgmr.msra.gmra.mrb[0].mxu0 %vm1171_vm7, %v1129_v15 }
 0x12b   : > { %v1100_v22 = vsel %vm1095_vm6, %v1067_v45, %v3232_v19  ;;  %v1101_v27 = vsel %vm1095_vm6, %v1068_v20, %v3233_v18  ;;  %v1070_v41 = vsel %vm1062_vm5, %v4079_v11, %v3228_v46  ;;  %v1069_v5 = vsel %vm1062_vm5, %v4076_v10, %v3227_v21 }
 0x12c   : > { %v1130_v28 = vpack.c.bf16 %v1101_v27, %v1100_v22  ;;  %v3236_v29 = vpop.permute.xlu1 %3235  ;;  %v3241_v38 = vpop.permute.xlu0 %3240 }
 0x12d   : > { %v3238_v39 = vunpack.i.h.bf16 %v3236_v29  ;;  %v3237_v40 = vunpack.i.l.bf16 %v3236_v29  ;;  %v3243_v4 = vunpack.i.h.bf16 %v3241_v38  ;;  %v3242_v12 = vunpack.i.l.bf16 %v3241_v38 }
 0x12e   : > { %2900 = vmatprep.mubr.msk.bf16.mxu0 %vm1171_vm7, %v1130_v28 }
 0x12f   : > { %v1102_v44 = vsel %vm1095_vm6, %v1069_v5, %v3237_v40  ;;  %v1103_v47 = vsel %vm1095_vm6, %v1070_v41, %v3238_v39  ;;  %v1072_v53 = vsel %vm1062_vm5, %v4093_v31, %v3243_v4  ;;  %v1071_v11 = vsel %vm1062_vm5, %v4090_v30, %v3242_v12 }
 0x130   : > { %v1131_v48 = vpack.c.bf16 %v1103_v47, %v1102_v44  ;;  %v3246_v49 = vpop.permute.xlu1 %3245  ;;  %v3251_v50 = vpop.permute.xlu0 %3250 }
 0x131   : > { %v3253_v51 = vunpack.i.h.bf16 %v3251_v50  ;;  %v3252_v52 = vunpack.i.l.bf16 %v3251_v50  ;;  %v3248_v10 = vunpack.i.h.bf16 %v3246_v49  ;;  %v3247_v54 = vunpack.i.l.bf16 %v3246_v49 }
 0x132   : > { %2901 = vmatmul.mubr.msk.bf16.gmra.mrb[4].mxu0 %vm1171_vm7, %v1131_v48 }
 0x133   : > { %v1104_v55 = vsel %vm1095_vm6, %v1071_v11, %v3252_v52  ;;  %v1105_v56 = vsel %vm1095_vm6, %v1072_v53, %v3253_v51  ;;  %v1074_v9 = vsel %vm1062_vm5, %v4103_v37, %v3248_v10  ;;  %v1073_v31 = vsel %vm1062_vm5, %v4100_v36, %v3247_v54 }
 0x134   : > { %v1132_v61 = vpack.c.bf16 %v1105_v56, %v1104_v55  ;;  %v3256_v62 = vpop.permute.xlu1 %3255  ;;  %v3261_v63 = vpop.permute.xlu0 %3260 }
 0x135   : > { %v3258_v3 = vunpack.i.h.bf16 %v3256_v62  ;;  %v3257_v8 = vunpack.i.l.bf16 %v3256_v62  ;;  %v3263_v30 = vunpack.i.h.bf16 %v3261_v63  ;;  %v3262_v15 = vunpack.i.l.bf16 %v3261_v63 }
 0x136   : > { %2904 = vmatprep.mubr.msk.bf16.mxu0 %vm1171_vm7, %v1132_v61 }
 0x137   : > { %v1106_v16 = vsel %vm1095_vm6, %v1073_v31, %v3257_v8  ;;  %v1107_v17 = vsel %vm1095_vm6, %v1074_v9, %v3258_v3  ;;  %v1076_v21 = vsel %vm1062_vm5, %v4117_v59, %v3263_v30  ;;  %v1075_v37 = vsel %vm1062_vm5, %v4114_v58, %v3262_v15 }
 0x138   : > { %v1133_v18 = vpack.c.bf16 %v1107_v17, %v1106_v16  ;;  %v3266_v19 = vpop.permute.xlu1 %3265  ;;  %v3271_v20 = vpop.permute.xlu0 %3270 }
 0x139   : > { %v3273_v45 = vunpack.i.h.bf16 %v3271_v20  ;;  %v3272_v46 = vunpack.i.l.bf16 %v3271_v20  ;;  %v3268_v36 = vunpack.i.h.bf16 %v3266_v19  ;;  %v3267_v22 = vunpack.i.l.bf16 %v3266_v19 }
 0x13a   : > { %2905 = vmatmul.mubr.msk.bf16.gmra.mrb[8].mxu0 %vm1171_vm7, %v1133_v18 }
 0x13b   : > { %v1108_v27 = vsel %vm1095_vm6, %v1075_v37, %v3272_v46  ;;  %v1109_v28 = vsel %vm1095_vm6, %v1076_v21, %v3273_v45  ;;  %v1078_v5 = vsel %vm1062_vm5, %v4127_v2, %v3268_v36  ;;  %v1077_v59 = vsel %vm1062_vm5, %v4124_v1, %v3267_v22 }
 0x13c   : > { %v1134_v29 = vpack.c.bf16 %v1109_v28, %v1108_v27  ;;  %v3276_v38 = vpop.permute.xlu1 %3275  ;;  %v3281_v39 = vpop.permute.xlu0 %3280 }
 0x13d   : > { %v3278_v40 = vunpack.i.h.bf16 %v3276_v38  ;;  %v3277_v41 = vunpack.i.l.bf16 %v3276_v38  ;;  %v3283_v58 = vunpack.i.h.bf16 %v3281_v39  ;;  %v3282_v4 = vunpack.i.l.bf16 %v3281_v39 }
 0x13e   : > { %2908 = vmatprep.mubr.msk.bf16.mxu0 %vm1171_vm7, %v1134_v29 }
 0x13f   : > { %v1110_v12 = vsel %vm1095_vm6, %v1077_v59, %v3277_v41  ;;  %v1111_v44 = vsel %vm1095_vm6, %v1078_v5, %v3278_v40  ;;  %v1080_v52 = vsel %vm1062_vm5, %v4141_v26, %v3283_v58  ;;  %v1079_v2 = vsel %vm1062_vm5, %v4138_v25, %v3282_v4 }
 0x140   : > { %v1135_v47 = vpack.c.bf16 %v1111_v44, %v1110_v12  ;;  %v3286_v48 = vpop.permute.xlu1 %3285  ;;  %v3291_v49 = vpop.permute.xlu0 %3290 }
 0x141   : > { %v3293_v50 = vunpack.i.h.bf16 %v3291_v49  ;;  %v3292_v51 = vunpack.i.l.bf16 %v3291_v49  ;;  %v3288_v1 = vunpack.i.h.bf16 %v3286_v48  ;;  %v3287_v53 = vunpack.i.l.bf16 %v3286_v48 }
 0x142   : > { %2909 = vmatmul.mubr.msk.bf16.gmra.mrb[12].mxu0 %vm1171_vm7, %v1135_v47 }
 0x143   : > { %v1112_v11 = vsel %vm1095_vm6, %v1079_v2, %v3292_v51  ;;  %v1113_v10 = vsel %vm1095_vm6, %v1080_v52, %v3293_v50  ;;  %v1082_v63 = vsel %vm1062_vm5, %v4151_v34, %v3288_v1  ;;  %v1081_v26 = vsel %vm1062_vm5, %v4148_v33, %v3287_v53 }
 0x144   : > { %v1136_v54 = vpack.c.bf16 %v1113_v10, %v1112_v11  ;;  %v3296_v55 = vpop.permute.xlu1 %3295  ;;  %v3301_v56 = vpop.permute.xlu0 %3300 }
 0x145   : > { %v3298_v61 = vunpack.i.h.bf16 %v3296_v55  ;;  %v3297_v62 = vunpack.i.l.bf16 %v3296_v55  ;;  %v3303_v25 = vunpack.i.h.bf16 %v3301_v56  ;;  %v3302_v3 = vunpack.i.l.bf16 %v3301_v56 }
 0x146   : > { %2912 = vmatprep.mubr.msk.bf16.mxu0 %vm1171_vm7, %v1136_v54 }
 0x147   : > { %v1114_v8 = vsel %vm1095_vm6, %v1081_v26, %v3297_v62  ;;  %v1115_v9 = vsel %vm1095_vm6, %v1082_v63, %v3298_v61  ;;  %v1084_v18 = vsel %vm1062_vm5, %v4165_v60, %v3303_v25  ;;  %v1083_v34 = vsel %vm1062_vm5, %v4162_v57, %v3302_v3 }
 0x148   : > { %v1137_v31 = vpack.c.bf16 %v1115_v9, %v1114_v8  ;;  %v3306_v30 = vpop.permute.xlu1 %3305  ;;  %v3311_v15 = vpop.permute.xlu0 %3310 }
 0x149   : > { %v3313_v16 = vunpack.i.h.bf16 %v3311_v15  ;;  %v3312_v17 = vunpack.i.l.bf16 %v3311_v15  ;;  %v3308_v33 = vunpack.i.h.bf16 %v3306_v30  ;;  %v3307_v19 = vunpack.i.l.bf16 %v3306_v30 }
 0x14a   : > { %2913 = vmatmul.mubr.msk.bf16.gmra.mrb[16].mxu0 %vm1171_vm7, %v1137_v31 }
 0x14b   : > { %v1116_v20 = vsel %vm1095_vm6, %v1083_v34, %v3312_v17  ;;  %v1117_v45 = vsel %vm1095_vm6, %v1084_v18, %v3313_v16  ;;  %v1086_v27 = vsel %vm1062_vm5, %v4175_v7, %v3308_v33  ;;  %v1085_v60 = vsel %vm1062_vm5, %v4172_v6, %v3307_v19  ;;  %v1531_v17 = vld [vmem:[#allocation3 + $0x1] sm:$0xff]  ;;  %v1532_v18 = vld [vmem:[#allocation3 + $0x9] sm:$0xff] }
 0x14c   : > { %v1138_v46 = vpack.c.bf16 %v1117_v45, %v1116_v20  ;;  %v3316_v21 = vpop.permute.xlu1 %3315  ;;  %v3321_v37 = vpop.permute.xlu0 %3320  ;;  %v1567_v34 = vld [vmem:[#allocation3 + $0x2] sm:$0xff]  ;;  %v3359_v33 = vpack.i.bf16 %v1532_v18, %v1531_v17  ;;  %v1568_v19 = vld [vmem:[#allocation3 + $0xa] sm:$0xff] }
 0x14d   : > { %v3318_v36 = vunpack.i.h.bf16 %v3316_v21  ;;  %v3317_v22 = vunpack.i.l.bf16 %v3316_v21  ;;  %v3323_v57 = vunpack.i.h.bf16 %v3321_v37  ;;  %v3322_v28 = vunpack.i.l.bf16 %v3321_v37 }
 0x14e   : > { %2916 = vmatprep.mubr.msk.bf16.mxu0 %vm1171_vm7, %v1138_v46  ;;  %v3369_v20 = vpack.i.bf16 %v1568_v19, %v1567_v34  ;;  %3360 = vrot.lane.b32.xlu1 %v3359_v33, %s3772_s10 }
 0x14f   : > { %v1118_v29 = vsel %vm1095_vm6, %v1085_v60, %v3317_v22  ;;  %v1119_v38 = vsel %vm1095_vm6, %v1086_v27, %v3318_v36  ;;  %v1088_v58 = vsel %vm1062_vm5, %v4189_v35, %v3323_v57  ;;  %v1087_v7 = vsel %vm1062_vm5, %v4186_v32, %v3322_v28 }
 0x150   : > { %v1139_v39 = vpack.c.bf16 %v1119_v38, %v1118_v29  ;;  %v3326_v40 = vpop.permute.xlu1 %3325  ;;  %v3331_v41 = vpop.permute.xlu0 %3330 }
 0x151   : > { %v3333_v5 = vunpack.i.h.bf16 %v3331_v41  ;;  %v3332_v59 = vunpack.i.l.bf16 %v3331_v41  ;;  %v3328_v6 = vunpack.i.h.bf16 %v3326_v40  ;;  %v3327_v4 = vunpack.i.l.bf16 %v3326_v40 }
 0x152   : > { %2917 = vmatmul.mubr.msk.bf16.gmra.mrb[20].mxu0 %vm1171_vm7, %v1139_v39 }
 0x153   : > { %v1120_v12 = vsel %vm1095_vm6, %v1087_v7, %v3332_v59  ;;  %v1121_v44 = vsel %vm1095_vm6, %v1088_v58, %v3333_v5  ;;  %v1090_v52 = vsel %vm1062_vm5, %v4199_v43, %v3328_v6  ;;  %v1089_v35 = vsel %vm1062_vm5, %v4196_v42, %v3327_v4 }
 0x154   : > { %v1140_v47 = vpack.c.bf16 %v1121_v44, %v1120_v12  ;;  %v3336_v48 = vpop.permute.xlu1 %3335  ;;  %v3341_v49 = vpop.permute.xlu0 %3340 }
 0x155   : > { %v3338_v50 = vunpack.i.h.bf16 %v3336_v48  ;;  %v3337_v51 = vunpack.i.l.bf16 %v3336_v48  ;;  %v3343_v32 = vunpack.i.h.bf16 %v3341_v49  ;;  %v3342_v2 = vunpack.i.l.bf16 %v3341_v49 }
 0x156   : > { %2920 = vmatprep.mubr.msk.bf16.mxu0 %vm1171_vm7, %v1140_v47 }
 0x157   : > { %v1122_v1 = vsel %vm1095_vm6, %v1089_v35, %v3337_v51  ;;  %v1123_v53 = vsel %vm1095_vm6, %v1090_v52, %v3338_v50  ;;  %v1092_v61 = vsel %vm1062_vm5, %v4213_v14, %v3343_v32  ;;  %v1091_v43 = vsel %vm1062_vm5, %v4210_v13, %v3342_v2 }
 0x158   : > { %v1141_v11 = vpack.c.bf16 %v1123_v53, %v1122_v1  ;;  %v3346_v10 = vpop.permute.xlu1 %3345  ;;  %v3351_v54 = vpop.permute.xlu0 %3350 }
 0x159   : > { %v3353_v55 = vunpack.i.h.bf16 %v3351_v54  ;;  %v3352_v56 = vunpack.i.l.bf16 %v3351_v54  ;;  %v3348_v42 = vunpack.i.h.bf16 %v3346_v10  ;;  %v3347_v62 = vunpack.i.l.bf16 %v3346_v10 }
 0x15a   : > { %2921 = vmatmul.mubr.msk.bf16.gmra.mrb[24].mxu0 %vm1171_vm7, %v1141_v11 }
 0x15b   : > { %v1124_v63 = vsel %vm1095_vm6, %v1091_v43, %v3352_v56  ;;  %v1125_v26 = vsel %vm1095_vm6, %v1092_v61, %v3353_v55  ;;  %v1094_v31 = vsel %vm1062_vm5, %v4223_v24, %v3348_v42  ;;  %v1093_v14 = vsel %vm1062_vm5, %v4220_v23, %v3347_v62  ;;  %v1565_v23 = vld [vmem:[#allocation3 + $0x199] sm:$0xff]  ;;  %v1566_v24 = vld [vmem:[#allocation3 + $0x1a1] sm:$0xff] }
 0x15c   : > { %v1142_v25 = vpack.c.bf16 %v1125_v26, %v1124_v63  ;;  %v3356_v3 = vpop.permute.xlu1 %3355  ;;  %v3364_v16 = vpack.i.bf16 %v1566_v24, %v1565_v23 }
 0x15d   : > { %v3358_v8 = vunpack.i.h.bf16 %v3356_v3  ;;  %v3357_v9 = vunpack.i.l.bf16 %v3356_v3 }
 0x15e   : > { %2924 = vmatprep.mubr.msk.bf16.mxu0 %vm1171_vm7, %v1142_v25  ;;  %3365 = vrot.lane.b32.xlu0 %v3364_v16, %s3772_s10 }
 0x15f   : > { %v1126_v13 = vsel %vm1095_vm6, %v1093_v14, %v3357_v9  ;;  %v1127_v30 = vsel %vm1095_vm6, %v1094_v31, %v3358_v8 }
 0x160   : > { %v1143_v15 = vpack.c.bf16 %v1127_v30, %v1126_v13 }
 0x162   : > { %2925 = vmatmul.mubr.msk.bf16.gmra.mrb[28].mxu0 %vm1171_vm7, %v1143_v15  ;;  %3370 = vrot.lane.b32.xlu0 %v3369_v20, %s3776_s26 }
 0x1fd   : > { %v2898_v45 = vpop.f32.mrb[0].mxu0 }
 0x1fe   : > { %v1267_v46 = vadd.f32 %v2898_v45, %v4436_v0  ;;  %v1258_v21 = vpop.f32.mrb[1].mxu0 }
 0x1ff   : > { %v1259_v37 = vadd.f32 %v4436_v0, %v1258_v21  ;;  %v2899_v36 = vpop.f32.mrb[2].mxu0 }
 0x200   : > { %v1387_v22 = vmax.f32 %v1267_v46, 0.0  ;;  %v1270_v27 = vadd.f32 %v2899_v36, %v4436_v0  ;;  %v1261_v60 = vpop.f32.mrb[3].mxu0 }
 0x201   : > { %v1385_v57 = vmax.f32 %v1259_v37, 0.0  ;;  %v1262_v28 = vadd.f32 %v4436_v0, %v1261_v60 }
 0x202   : > { %1465 = vst.msk [vmem:[#allocation3 + $0x31] sm:$0xff] %vm799_vm3, %v1387_v22  ;;  %v1388_v29 = vmax.f32 %v1270_v27, 0.0 }
 0x203   : > { %1463 = vst.msk [vmem:[#allocation3 + $0x19] sm:$0xff] %vm799_vm3, %v1385_v57  ;;  %v1386_v38 = vmax.f32 %v1262_v28, 0.0 }
 0x204   : > { %1466 = vst.msk [vmem:[#allocation3 + $0x39] sm:$0xff] %vm799_vm3, %v1388_v29 }
 0x205   : > { %1464 = vst.msk [vmem:[#allocation3 + $0x21] sm:$0xff] %vm799_vm3, %v1386_v38  ;;  %v2902_v39 = vpop.f32.mrb[4].mxu0 }
 0x206   : > { %v1283_v40 = vadd.f32 %v2902_v39, %v4436_v0  ;;  %v1274_v41 = vpop.f32.mrb[5].mxu0 }
 0x207   : > { %v1275_v5 = vadd.f32 %v4436_v0, %v1274_v41  ;;  %v2903_v59 = vpop.f32.mrb[6].mxu0 }
 0x208   : > { %v1391_v58 = vmax.f32 %v1283_v40, 0.0  ;;  %v1286_v7 = vadd.f32 %v2903_v59, %v4436_v0  ;;  %v1277_v6 = vpop.f32.mrb[7].mxu0 }
 0x209   : > { %v1389_v4 = vmax.f32 %v1275_v5, 0.0  ;;  %v1278_v12 = vadd.f32 %v4436_v0, %v1277_v6  ;;  %v1535_v47 = vld [vmem:[#allocation3 + $0x31] sm:$0xff] }
 0x20a   : > { %1469 = vst.msk [vmem:[#allocation3 + $0x61] sm:$0xff] %vm799_vm3, %v1391_v58  ;;  %v1392_v44 = vmax.f32 %v1286_v7, 0.0  ;;  %v1533_v54 = vld [vmem:[#allocation3 + $0x19] sm:$0xff] }
 0x20b   : > { %1467 = vst.msk [vmem:[#allocation3 + $0x49] sm:$0xff] %vm799_vm3, %v1389_v4  ;;  %v1390_v48 = vmax.f32 %v1278_v12, 0.0  ;;  %v1571_v49 = vld [vmem:[#allocation3 + $0x32] sm:$0xff]  ;;  %v1572_v50 = vld [vmem:[#allocation3 + $0x3a] sm:$0xff] }
 0x20c   : > { %v1536_v51 = vld [vmem:[#allocation3 + $0x39] sm:$0xff]  ;;  %1470 = vst.msk [vmem:[#allocation3 + $0x69] sm:$0xff] %vm799_vm3, %v1392_v44  ;;  %v3379_v52 = vpack.i.bf16 %v1572_v50, %v1571_v49  ;;  %v1534_v2 = vld [vmem:[#allocation3 + $0x21] sm:$0xff] }
 0x20d   : > { %v3374_v35 = vpack.i.bf16 %v1536_v51, %v1535_v47  ;;  %1468 = vst.msk [vmem:[#allocation3 + $0x51] sm:$0xff] %vm799_vm3, %v1390_v48  ;;  %v2906_v32 = vpop.f32.mrb[8].mxu0  ;;  %v3384_v43 = vpack.i.bf16 %v1534_v2, %v1533_v54  ;;  %v1569_v63 = vld [vmem:[#allocation3 + $0x1a] sm:$0xff]  ;;  %v1570_v26 = vld [vmem:[#allocation3 + $0x22] sm:$0xff] }
 0x20e   : > { %v1299_v1 = vadd.f32 %v2906_v32, %v4436_v0  ;;  %3380 = vrot.lane.b32.xlu0 %v3379_v52, %s3776_s26  ;;  %v1290_v53 = vpop.f32.mrb[9].mxu0  ;;  %v3389_v8 = vpack.i.bf16 %v1570_v26, %v1569_v63 }
 0x20f   : > { %3375 = vrot.lane.b32.xlu1 %v3374_v35, %s3772_s10  ;;  %v1291_v11 = vadd.f32 %v4436_v0, %v1290_v53  ;;  %v2907_v10 = vpop.f32.mrb[10].mxu0 }
 0x210   : > { %v1395_v55 = vmax.f32 %v1299_v1, 0.0  ;;  %v1302_v56 = vadd.f32 %v2907_v10, %v4436_v0  ;;  %v1293_v61 = vpop.f32.mrb[11].mxu0 }
 0x211   : > { %v1393_v42 = vmax.f32 %v1291_v11, 0.0  ;;  %v1294_v62 = vadd.f32 %v4436_v0, %v1293_v61  ;;  %v1539_v34 = vld [vmem:[#allocation3 + $0x61] sm:$0xff] }
 0x212   : > { %1473 = vst.msk [vmem:[#allocation3 + $0x91] sm:$0xff] %vm799_vm3, %v1395_v55  ;;  %v1396_v25 = vmax.f32 %v1302_v56, 0.0  ;;  %3385 = vrot.lane.b32.xlu0 %v3384_v43, %s3772_s10  ;;  %v1537_v9 = vld [vmem:[#allocation3 + $0x49] sm:$0xff] }
 0x213   : > { %1471 = vst.msk [vmem:[#allocation3 + $0x79] sm:$0xff] %vm799_vm3, %v1393_v42  ;;  %v1394_v3 = vmax.f32 %v1294_v62, 0.0  ;;  %v1540_v30 = vld [vmem:[#allocation3 + $0x69] sm:$0xff] }
 0x214   : > { %1474 = vst.msk [vmem:[#allocation3 + $0x99] sm:$0xff] %vm799_vm3, %v1396_v25  ;;  %v1538_v31 = vld [vmem:[#allocation3 + $0x51] sm:$0xff]  ;;  %v3394_v45 = vpack.i.bf16 %v1540_v30, %v1539_v34  ;;  %v1575_v36 = vld [vmem:[#allocation3 + $0x62] sm:$0xff] }
 0x215   : > { %1472 = vst.msk [vmem:[#allocation3 + $0x81] sm:$0xff] %vm799_vm3, %v1394_v3  ;;  %v2910_v14 = vpop.f32.mrb[12].mxu0  ;;  %v3404_v13 = vpack.i.bf16 %v1538_v31, %v1537_v9  ;;  %v1573_v24 = vld [vmem:[#allocation3 + $0x4a] sm:$0xff]  ;;  %v1574_v16 = vld [vmem:[#allocation3 + $0x52] sm:$0xff] }
 0x216   : > { %v1315_v15 = vadd.f32 %v2910_v14, %v4436_v0  ;;  %v1306_v23 = vpop.f32.mrb[13].mxu0  ;;  %3390 = vrot.lane.b32.xlu0 %v3389_v8, %s3776_s26  ;;  %v3409_v37 = vpack.i.bf16 %v1574_v16, %v1573_v24  ;;  %v1576_v22 = vld [vmem:[#allocation3 + $0x6a] sm:$0xff] }
 0x217   : > { %v1307_v17 = vadd.f32 %v4436_v0, %v1306_v23  ;;  %v2911_v18 = vpop.f32.mrb[14].mxu0  ;;  %3405 = vrot.lane.b32.xlu1 %v3404_v13, %s3772_s10  ;;  %v3399_v57 = vpack.i.bf16 %v1576_v22, %v1575_v36 }
 0x218   : > { %v1399_v33 = vmax.f32 %v1315_v15, 0.0  ;;  %v1318_v19 = vadd.f32 %v2911_v18, %v4436_v0  ;;  %v1309_v20 = vpop.f32.mrb[15].mxu0 }
 0x219   : > { %v1397_v46 = vmax.f32 %v1307_v17, 0.0  ;;  %v1310_v21 = vadd.f32 %v4436_v0, %v1309_v20  ;;  %v1543_v4 = vld [vmem:[#allocation3 + $0x91] sm:$0xff] }
 0x21a   : > { %1477 = vst.msk [vmem:[#allocation3 + $0xc1] sm:$0xff] %vm799_vm3, %v1399_v33  ;;  %v1400_v27 = vmax.f32 %v1318_v19, 0.0  ;;  %3395 = vrot.lane.b32.xlu0 %v3394_v45, %s3772_s10  ;;  %v1541_v28 = vld [vmem:[#allocation3 + $0x79] sm:$0xff] }
 0x21b   : > { %1475 = vst.msk [vmem:[#allocation3 + $0xa9] sm:$0xff] %vm799_vm3, %v1397_v46  ;;  %v1398_v60 = vmax.f32 %v1310_v21, 0.0  ;;  %3410 = vrot.lane.b32.xlu1 %v3409_v37, %s3776_s26  ;;  %v1544_v40 = vld [vmem:[#allocation3 + $0x99] sm:$0xff] }
 0x21c   : > { %1478 = vst.msk [vmem:[#allocation3 + $0xc9] sm:$0xff] %vm799_vm3, %v1400_v27  ;;  %v1542_v29 = vld [vmem:[#allocation3 + $0x81] sm:$0xff]  ;;  %v3414_v48 = vpack.i.bf16 %v1544_v40, %v1543_v4  ;;  %v1579_v52 = vld [vmem:[#allocation3 + $0x92] sm:$0xff] }
 0x21d   : > { %1476 = vst.msk [vmem:[#allocation3 + $0xb1] sm:$0xff] %vm799_vm3, %v1398_v60  ;;  %v2914_v38 = vpop.f32.mrb[16].mxu0  ;;  %v3424_v39 = vpack.i.bf16 %v1542_v29, %v1541_v28  ;;  %v1577_v59 = vld [vmem:[#allocation3 + $0x7a] sm:$0xff]  ;;  %v1578_v58 = vld [vmem:[#allocation3 + $0x82] sm:$0xff] }
 0x21e   : > { %v1331_v41 = vadd.f32 %v2914_v38, %v4436_v0  ;;  %v1322_v5 = vpop.f32.mrb[17].mxu0  ;;  %3400 = vrot.lane.b32.xlu0 %v3399_v57, %s3776_s26  ;;  %v3429_v51 = vpack.i.bf16 %v1578_v58, %v1577_v59  ;;  %v1580_v35 = vld [vmem:[#allocation3 + $0x9a] sm:$0xff] }
 0x21f   : > { %v1323_v7 = vadd.f32 %v4436_v0, %v1322_v5  ;;  %v2915_v6 = vpop.f32.mrb[18].mxu0  ;;  %3425 = vrot.lane.b32.xlu1 %v3424_v39, %s3772_s10  ;;  %v3419_v1 = vpack.i.bf16 %v1580_v35, %v1579_v52 }
 0x220   : > { %v1403_v12 = vmax.f32 %v1331_v41, 0.0  ;;  %v1334_v44 = vadd.f32 %v2915_v6, %v4436_v0  ;;  %v1325_v47 = vpop.f32.mrb[19].mxu0 }
 0x221   : > { %v1401_v49 = vmax.f32 %v1323_v7, 0.0  ;;  %v1326_v50 = vadd.f32 %v4436_v0, %v1325_v47  ;;  %v1547_v26 = vld [vmem:[#allocation3 + $0xc1] sm:$0xff] }
 0x222   : > { %1481 = vst.msk [vmem:[#allocation3 + $0xf1] sm:$0xff] %vm799_vm3, %v1403_v12  ;;  %v1404_v32 = vmax.f32 %v1334_v44, 0.0  ;;  %3415 = vrot.lane.b32.xlu0 %v3414_v48, %s3772_s10  ;;  %v1545_v53 = vld [vmem:[#allocation3 + $0xa9] sm:$0xff] }
 0x223   : > { %1479 = vst.msk [vmem:[#allocation3 + $0xd9] sm:$0xff] %vm799_vm3, %v1401_v49  ;;  %v1402_v2 = vmax.f32 %v1326_v50, 0.0  ;;  %3430 = vrot.lane.b32.xlu1 %v3429_v51, %s3776_s26  ;;  %v1548_v55 = vld [vmem:[#allocation3 + $0xc9] sm:$0xff] }
 0x224   : > { %1482 = vst.msk [vmem:[#allocation3 + $0xf9] sm:$0xff] %vm799_vm3, %v1404_v32  ;;  %v1546_v11 = vld [vmem:[#allocation3 + $0xb1] sm:$0xff]  ;;  %v3434_v9 = vpack.i.bf16 %v1548_v55, %v1547_v26  ;;  %v1583_v30 = vld [vmem:[#allocation3 + $0xc2] sm:$0xff] }
 0x225   : > { %1480 = vst.msk [vmem:[#allocation3 + $0xe1] sm:$0xff] %vm799_vm3, %v1402_v2  ;;  %v2918_v10 = vpop.f32.mrb[20].mxu0  ;;  %v3444_v54 = vpack.i.bf16 %v1546_v11, %v1545_v53  ;;  %v1581_v43 = vld [vmem:[#allocation3 + $0xaa] sm:$0xff]  ;;  %v1582_v42 = vld [vmem:[#allocation3 + $0xb2] sm:$0xff] }
 0x226   : > { %v1347_v56 = vadd.f32 %v2918_v10, %v4436_v0  ;;  %v1338_v61 = vpop.f32.mrb[21].mxu0  ;;  %3420 = vrot.lane.b32.xlu0 %v3419_v1, %s3776_s26  ;;  %v3449_v13 = vpack.i.bf16 %v1582_v42, %v1581_v43  ;;  %v1584_v15 = vld [vmem:[#allocation3 + $0xca] sm:$0xff] }
 0x227   : > { %v1339_v62 = vadd.f32 %v4436_v0, %v1338_v61  ;;  %v2919_v63 = vpop.f32.mrb[22].mxu0  ;;  %3445 = vrot.lane.b32.xlu1 %v3444_v54, %s3772_s10  ;;  %v3439_v16 = vpack.i.bf16 %v1584_v15, %v1583_v30 }
 0x228   : > { %v1407_v25 = vmax.f32 %v1347_v56, 0.0  ;;  %v1350_v3 = vadd.f32 %v2919_v63, %v4436_v0  ;;  %v1341_v8 = vpop.f32.mrb[23].mxu0 }
 0x229   : > { %v1405_v31 = vmax.f32 %v1339_v62, 0.0  ;;  %v1342_v14 = vadd.f32 %v4436_v0, %v1341_v8  ;;  %v1551_v22 = vld [vmem:[#allocation3 + $0xf1] sm:$0xff] }
 0x22a   : > { %1485 = vst.msk [vmem:[#allocation3 + $0x121] sm:$0xff] %vm799_vm3, %v1407_v25  ;;  %v1408_v23 = vmax.f32 %v1350_v3, 0.0  ;;  %3435 = vrot.lane.b32.xlu0 %v3434_v9, %s3772_s10  ;;  %v1549_v17 = vld [vmem:[#allocation3 + $0xd9] sm:$0xff] }
 0x22b   : > { %1483 = vst.msk [vmem:[#allocation3 + $0x109] sm:$0xff] %vm799_vm3, %v1405_v31  ;;  %v1406_v24 = vmax.f32 %v1342_v14, 0.0  ;;  %3450 = vrot.lane.b32.xlu1 %v3449_v13, %s3776_s26  ;;  %v1552_v19 = vld [vmem:[#allocation3 + $0xf9] sm:$0xff] }
 0x22c   : > { %1486 = vst.msk [vmem:[#allocation3 + $0x129] sm:$0xff] %vm799_vm3, %v1408_v23  ;;  %v1550_v18 = vld [vmem:[#allocation3 + $0xe1] sm:$0xff]  ;;  %v3454_v28 = vpack.i.bf16 %v1552_v19, %v1551_v22  ;;  %v1587_v40 = vld [vmem:[#allocation3 + $0xf2] sm:$0xff] }
 0x22d   : > { %1484 = vst.msk [vmem:[#allocation3 + $0x111] sm:$0xff] %vm799_vm3, %v1406_v24  ;;  %v2922_v34 = vpop.f32.mrb[24].mxu0  ;;  %v3464_v33 = vpack.i.bf16 %v1550_v18, %v1549_v17  ;;  %v1585_v46 = vld [vmem:[#allocation3 + $0xda] sm:$0xff]  ;;  %v1586_v21 = vld [vmem:[#allocation3 + $0xe2] sm:$0xff]  ;;  %v3702_v22 = vld [vmem:[%s4996_s3] sm:$0xff]  }
 0x22e   : > { %v1363_v20 = vadd.f32 %v2922_v34, %v4436_v0  ;;  %v1354_v45 = vpop.f32.mrb[25].mxu0  ;;  %3440 = vrot.lane.b32.xlu0 %v3439_v16, %s3776_s26  ;;  %v3469_v39 = vpack.i.bf16 %v1586_v21, %v1585_v46  ;;  %v1588_v41 = vld [vmem:[#allocation3 + $0xfa] sm:$0xff]  ;;  %v1602_v21 = vld [vmem:[#allocation3 + $0x1a2] sm:$0xff]  ;;  %2928 = vmatprep.subr.bf16.mxu1 %v3702_v22 }
 0x22f   : > { %v1355_v37 = vadd.f32 %v4436_v0, %v1354_v45  ;;  %v2923_v36 = vpop.f32.mrb[26].mxu0  ;;  %3465 = vrot.lane.b32.xlu1 %v3464_v33, %s3772_s10  ;;  %v3459_v58 = vpack.i.bf16 %v1588_v41, %v1587_v40  ;;  %v1601_v46 = vld [vmem:[#allocation3 + $0x19a] sm:$0xff]  ;;  %2929 = vmatpush3.bf16.msra.mxu1 %v3702_v22 }
 0x230   : > { %v1411_v27 = vmax.f32 %v1363_v20, 0.0  ;;  %v1366_v60 = vadd.f32 %v2923_v36, %v4436_v0  ;;  %v1357_v57 = vpop.f32.mrb[27].mxu0  ;;  %v3534_v36 = vpack.i.bf16 %v1602_v21, %v1601_v46 }
 0x231   : > { %v1409_v29 = vmax.f32 %v1355_v37, 0.0  ;;  %v1358_v38 = vadd.f32 %v4436_v0, %v1357_v57  ;;  %v1555_v35 = vld [vmem:[#allocation3 + $0x121] sm:$0xff] }
 0x232   : > { %1489 = vst.msk [vmem:[#allocation3 + $0x151] sm:$0xff] %vm799_vm3, %v1411_v27  ;;  %v1412_v5 = vmax.f32 %v1366_v60, 0.0  ;;  %3455 = vrot.lane.b32.xlu0 %v3454_v28, %s3772_s10  ;;  %v1553_v7 = vld [vmem:[#allocation3 + $0x109] sm:$0xff]  ;;  %v4538_v27 = vpop.permute.xlu0 %3365  ;;  %v4540_v60 = vpop.permute.xlu1 %3360  ;;  %v3703_v28 = vld [vmem:[%s4996_s3 + $0x8] sm:$0xff]  }
 0x233   : > { %1487 = vst.msk [vmem:[#allocation3 + $0x139] sm:$0xff] %vm799_vm3, %v1409_v29  ;;  %v1410_v59 = vmax.f32 %v1358_v38, 0.0  ;;  %3470 = vrot.lane.b32.xlu1 %v3469_v39, %s3776_s26  ;;  %v1556_v44 = vld [vmem:[#allocation3 + $0x129] sm:$0xff]  ;;  %v3704_v29 = vld [vmem:[%s4996_s3 + $0x10] sm:$0xff]   ;;  %2930 = vmatprep.subr.bf16.mxu1 %v3703_v28 }
 0x234   : > { %1490 = vst.msk [vmem:[#allocation3 + $0x159] sm:$0xff] %vm799_vm3, %v1412_v5  ;;  %v1554_v6 = vld [vmem:[#allocation3 + $0x111] sm:$0xff]  ;;  %v3474_v53 = vpack.i.bf16 %v1556_v44, %v1555_v35  ;;  %v1591_v55 = vld [vmem:[#allocation3 + $0x122] sm:$0xff]  ;;  %2931 = vmatpush3.bf16.msra.mxu1 %v3703_v28 }
 0x235   : > { %1488 = vst.msk [vmem:[#allocation3 + $0x141] sm:$0xff] %vm799_vm3, %v1410_v59  ;;  %v2926_v4 = vpop.f32.mrb[28].mxu0  ;;  %v3484_v12 = vpack.i.bf16 %v1554_v6, %v1553_v7  ;;  %v1589_v49 = vld [vmem:[#allocation3 + $0x10a] sm:$0xff]  ;;  %v1590_v50 = vld [vmem:[#allocation3 + $0x112] sm:$0xff]  ;;  %2932 = vmatprep.subr.bf16.mxu1 %v3704_v29 }
 0x236   : > { %v1379_v47 = vadd.f32 %v2926_v4, %v4436_v0  ;;  %v1370_v48 = vpop.f32.mrb[29].mxu0  ;;  %3460 = vrot.lane.b32.xlu0 %v3459_v58, %s3776_s26  ;;  %v3489_v54 = vpack.i.bf16 %v1590_v50, %v1589_v49  ;;  %v1592_v56 = vld [vmem:[#allocation3 + $0x12a] sm:$0xff]  ;;  %v4542_v57 = vpop.permute.xlu0 %3370  ;;  %v1500_v6 = vld [vmem:[#allocation3 + $0x38] sm:$0xff] }
 0x237   : > { %v1371_v51 = vadd.f32 %v4436_v0, %v1370_v48  ;;  %v2927_v52 = vpop.f32.mrb[30].mxu0  ;;  %3485 = vrot.lane.b32.xlu1 %v3484_v12, %s3772_s10  ;;  %v3479_v42 = vpack.i.bf16 %v1592_v56, %v1591_v55  ;;  %v3705_v58 = vld [vmem:[%s4996_s3 + $0x18] sm:$0xff]   ;;  %v1499_v7 = vld [vmem:[#allocation3 + $0x30] sm:$0xff] }
 0x238   : > { %v1415_v32 = vmax.f32 %v1379_v47, 0.0  ;;  %v1382_v2 = vadd.f32 %v2927_v52, %v4436_v0  ;;  %v1373_v1 = vpop.f32.mrb[31].mxu0  ;;  %2933 = vmatpush3.bf16.msra.mxu1 %v3704_v29  ;;  %v3706_v52 = vld [vmem:[%s4996_s3 + $0x20] ss:$0 sps:$4 sm:$0xff]   ;;  %v1505_v29 = vld [vmem:[#allocation3 + $0x78] sm:$0xff] }
 0x239   : > { %v1413_v11 = vmax.f32 %v1371_v51, 0.0  ;;  %v1374_v10 = vadd.f32 %v4436_v0, %v1373_v1  ;;  %v1559_v8 = vld [vmem:[#allocation3 + $0x151] sm:$0xff]  ;;  %2934 = vmatprep.subr.bf16.mxu1 %v3705_v58 }
 0x23a   : > { %1493 = vst.msk [vmem:[#allocation3 + $0x181] sm:$0xff] %vm799_vm3, %v1415_v32  ;;  %v1416_v61 = vmax.f32 %v1382_v2, 0.0  ;;  %3475 = vrot.lane.b32.xlu0 %v3474_v53, %s3772_s10  ;;  %v1557_v62 = vld [vmem:[#allocation3 + $0x139] sm:$0xff] }
 0x23b   : > { %1491 = vst.msk [vmem:[#allocation3 + $0x169] sm:$0xff] %vm799_vm3, %v1413_v11  ;;  %v1414_v43 = vmax.f32 %v1374_v10, 0.0  ;;  %3490 = vrot.lane.b32.xlu1 %v3489_v54, %s3776_s26  ;;  %v1560_v26 = vld [vmem:[#allocation3 + $0x159] sm:$0xff]  ;;  %v2365_v10 = vsel %vm2363_vm11, %v3706_v52, 0 }
 0x23c   : > { %1494 = vst.msk [vmem:[#allocation3 + $0x189] sm:$0xff] %vm799_vm3, %v1416_v61  ;;  %v1558_v63 = vld [vmem:[#allocation3 + $0x141] sm:$0xff]  ;;  %v3494_v9 = vpack.i.bf16 %v1560_v26, %v1559_v8  ;;  %v1595_v14 = vld [vmem:[#allocation3 + $0x152] sm:$0xff]  ;;  %2935 = vmatpush3.bf16.msra.mxu1 %v3705_v58 }
 0x23d   : > { %1492 = vst.msk [vmem:[#allocation3 + $0x171] sm:$0xff] %vm799_vm3, %v1414_v43  ;;  %v3504_v0 = vpack.i.bf16 %v1558_v63, %v1557_v62  ;;  %v1593_v25 = vld [vmem:[#allocation3 + $0x13a] sm:$0xff]  ;;  %v1594_v3 = vld [vmem:[#allocation3 + $0x142] sm:$0xff]  ;;  %2971 = vmatprep.subr.msk.bf16.mxu1 %vm2363_vm11, %v3706_v52 }
 0x23e   : > { %3480 = vrot.lane.b32.xlu0 %v3479_v42, %s3776_s26  ;;  %v3509_v31 = vpack.i.bf16 %v1594_v3, %v1593_v25  ;;  %v1596_v13 = vld [vmem:[#allocation3 + $0x15a] sm:$0xff]  ;;  %v1501_v26 = vld [vmem:[#allocation3 + $0x48] sm:$0xff]  ;;  %v1502_v25 = vld [vmem:[#allocation3 + $0x50] sm:$0xff] }
 0x23f   : > { %3505 = vrot.lane.b32.xlu1 %v3504_v0, %s3772_s10  ;;  %v3499_v23 = vpack.i.bf16 %v1596_v13, %v1595_v14  ;;  %v1497_v32 = vld [vmem:[#allocation3 + $0x18] sm:$0xff]  ;;  %v1498_v2 = vld [vmem:[#allocation3 + $0x20] sm:$0xff] }
 0x240   : > { %2937 = vmatpush3.bf16.msra.mxu1 %v2365_v10 }
 0x241   : > { %v1563_v18 = vld [vmem:[#allocation3 + $0x181] sm:$0xff] }
 0x242   : > { %3495 = vrot.lane.b32.xlu0 %v3494_v9, %s3772_s10  ;;  %v1561_v33 = vld [vmem:[#allocation3 + $0x169] sm:$0xff] }
 0x243   : > { %3510 = vrot.lane.b32.xlu1 %v3509_v31, %s3776_s26  ;;  %v1599_v30 = vld [vmem:[#allocation3 + $0x182] sm:$0xff]  ;;  %v1600_v15 = vld [vmem:[#allocation3 + $0x18a] sm:$0xff] }
 0x244   : > { %v3519_v24 = vpack.i.bf16 %v1600_v15, %v1599_v30  ;;  %v1564_v16 = vld [vmem:[#allocation3 + $0x189] sm:$0xff]  ;;  %v1562_v17 = vld [vmem:[#allocation3 + $0x171] sm:$0xff] }
 0x245   : > { %v3514_v34 = vpack.i.bf16 %v1564_v16, %v1563_v18  ;;  %v3524_v19 = vpack.i.bf16 %v1562_v17, %v1561_v33  ;;  %v1597_v20 = vld [vmem:[#allocation3 + $0x16a] sm:$0xff]  ;;  %v1598_v45 = vld [vmem:[#allocation3 + $0x172] sm:$0xff] }
 0x246   : > { %3500 = vrot.lane.b32.xlu0 %v3499_v23, %s3776_s26  ;;  %v3529_v37 = vpack.i.bf16 %v1598_v45, %v1597_v20  ;;  %v1504_v16 = vld [vmem:[#allocation3 + $0x68] sm:$0xff] }
 0x247   : > { %3520 = vrot.lane.b32.xlu1 %v3519_v24, %s3776_s26  ;;  %v1503_v24 = vld [vmem:[#allocation3 + $0x60] sm:$0xff] }
 0x24a   : > { %3515 = vrot.lane.b32.xlu0 %v3514_v34, %s3772_s10 }
 0x24b   : > { %3525 = vrot.lane.b32.xlu1 %v3524_v19, %s3772_s10 }
 0x24f   : > { %3530 = vrot.lane.b32.xlu1 %v3529_v37, %s3776_s26 }
 0x253   : > { %3535 = vrot.lane.b32.xlu1 %v3534_v36, %s3776_s26 }
 0x280   : > { %v3381_v38 = vpop.permute.xlu0 %3380 }
 0x281   : > { %v3376_v39 = vpop.permute.xlu1 %3375  ;;  %v3383_v40 = vunpack.i.h.bf16 %v3381_v38  ;;  %v3382_v41 = vunpack.i.l.bf16 %v3381_v38  ;;  %v1506_v38 = vld [vmem:[#allocation3 + $0x80] sm:$0xff] }
 0x282   : > { %v3378_v5 = vunpack.i.h.bf16 %v3376_v39  ;;  %v3377_v59 = vunpack.i.l.bf16 %v3376_v39 }
 0x284   : > { %v1895_v4 = vsel %vm799_vm3, %v1499_v7, %v3377_v59  ;;  %v1896_v12 = vsel %vm799_vm3, %v1500_v6, %v3378_v5  ;;  %v3386_v48 = vpop.permute.xlu0 %3385 }
 0x285   : > { %v4556_v44 = vsel %vm1927_vm10, %v1895_v4, %v3382_v41  ;;  %v4559_v47 = vsel %vm1927_vm10, %v1896_v12, %v3383_v40  ;;  %v3388_v50 = vunpack.i.h.bf16 %v3386_v48  ;;  %v3387_v51 = vunpack.i.l.bf16 %v3386_v48  ;;  %v1507_v12 = vld [vmem:[#allocation3 + $0x90] sm:$0xff]  ;;  %v1508_v48 = vld [vmem:[#allocation3 + $0x98] sm:$0xff] }
 0x286   : > { %v3539_v49 = vpack.i.bf16 %v4559_v47, %v4556_v44 }
 0x287   : > { %v1893_v54 = vsel %vm799_vm3, %v1497_v32, %v3387_v51  ;;  %v1894_v55 = vsel %vm799_vm3, %v1498_v2, %v3388_v50 }
 0x288   : > { %3540 = vrot.lane.b32.xlu1 %v3539_v49, %s3775_s25  ;;  %v3391_v35 = vpop.permute.xlu0 %3390 }
 0x289   : > { %v3393_v1 = vunpack.i.h.bf16 %v3391_v35  ;;  %v3392_v53 = vunpack.i.l.bf16 %v3391_v35  ;;  %v3406_v11 = vpop.permute.xlu1 %3405 }
 0x28a   : > { %v3408_v43 = vunpack.i.h.bf16 %v3406_v11  ;;  %v3407_v42 = vunpack.i.l.bf16 %v3406_v11 }
 0x28b   : > { %v4570_v56 = vsel %vm1927_vm10, %v1893_v54, %v3392_v53  ;;  %v4573_v61 = vsel %vm1927_vm10, %v1894_v55, %v3393_v1 }
 0x28c   : > { %v3544_v62 = vpack.i.bf16 %v4573_v61, %v4570_v56  ;;  %v3396_v63 = vpop.permute.xlu0 %3395  ;;  %v1897_v14 = vsel %vm799_vm3, %v1501_v26, %v3407_v42  ;;  %v1898_v13 = vsel %vm799_vm3, %v1502_v25, %v3408_v43  ;;  %v1509_v43 = vld [vmem:[#allocation3 + $0xa8] sm:$0xff]  ;;  %v1510_v42 = vld [vmem:[#allocation3 + $0xb0] sm:$0xff] }
 0x28d   : > { %v3411_v0 = vpop.permute.xlu1 %3410  ;;  %v3398_v3 = vunpack.i.h.bf16 %v3396_v63  ;;  %v3397_v8 = vunpack.i.l.bf16 %v3396_v63 }
 0x28e   : > { %v3413_v9 = vunpack.i.h.bf16 %v3411_v0  ;;  %v3412_v31 = vunpack.i.l.bf16 %v3411_v0  ;;  %3545 = vrot.lane.b32.xlu0 %v3544_v62, %s3775_s25 }
 0x28f   : > { %v1900_v19 = vsel %vm799_vm3, %v1504_v16, %v3398_v3  ;;  %v1899_v20 = vsel %vm799_vm3, %v1503_v24, %v3397_v8 }
 0x290   : > { %v4581_v30 = vsel %vm1927_vm10, %v1897_v14, %v3412_v31  ;;  %v4584_v15 = vsel %vm1927_vm10, %v1898_v13, %v3413_v9  ;;  %v3401_v23 = vpop.permute.xlu0 %3400  ;;  %v1511_v14 = vld [vmem:[#allocation3 + $0xc0] sm:$0xff]  ;;  %v1512_v13 = vld [vmem:[#allocation3 + $0xc8] sm:$0xff] }
 0x291   : > { %v3403_v17 = vunpack.i.h.bf16 %v3401_v23  ;;  %v3402_v18 = vunpack.i.l.bf16 %v3401_v23  ;;  %v3426_v34 = vpop.permute.xlu1 %3425  ;;  %v3554_v33 = vpack.i.bf16 %v4584_v15, %v4581_v30 }
 0x292   : > { %3550 = vrot.lane.b32.xlu0 %v3539_v49, %s3777_s23  ;;  %v3428_v21 = vunpack.i.h.bf16 %v3426_v34  ;;  %v3427_v37 = vunpack.i.l.bf16 %v3426_v34 }
 0x293   : > { %v4592_v45 = vsel %vm1927_vm10, %v1899_v20, %v3402_v18  ;;  %v4595_v46 = vsel %vm1927_vm10, %v1900_v19, %v3403_v17  ;;  %3555 = vrot.lane.b32.xlu1 %v3554_v33, %s3777_s23 }
 0x294   : > { %v3416_v36 = vpop.permute.xlu0 %3415  ;;  %v3559_v22 = vpack.i.bf16 %v4595_v46, %v4592_v45  ;;  %v1902_v59 = vsel %vm799_vm3, %v1506_v38, %v3428_v21  ;;  %v1901_v58 = vsel %vm799_vm3, %v1505_v29, %v3427_v37  ;;  %v1514_v29 = vld [vmem:[#allocation3 + $0xe0] sm:$0xff] }
 0x295   : > { %v3431_v28 = vpop.permute.xlu1 %3430  ;;  %v3418_v39 = vunpack.i.h.bf16 %v3416_v36  ;;  %v3417_v40 = vunpack.i.l.bf16 %v3416_v36 }
 0x296   : > { %v3433_v41 = vunpack.i.h.bf16 %v3431_v28  ;;  %v3432_v5 = vunpack.i.l.bf16 %v3431_v28  ;;  %3565 = vrot.lane.b32.xlu0 %v3554_v33, %s3775_s25  ;;  %v1513_v28 = vld [vmem:[#allocation3 + $0xd8] sm:$0xff] }
 0x297   : > { %3560 = vrot.lane.b32.xlu1 %v3559_v22, %s3775_s25  ;;  %v1904_v35 = vsel %vm799_vm3, %v1508_v48, %v3418_v39  ;;  %v1903_v32 = vsel %vm799_vm3, %v1507_v12, %v3417_v40  ;;  %v1515_v48 = vld [vmem:[#allocation3 + $0xf0] sm:$0xff] }
 0x298   : > { %v4605_v7 = vsel %vm1927_vm10, %v1901_v58, %v3432_v5  ;;  %v4608_v6 = vsel %vm1927_vm10, %v1902_v59, %v3433_v41  ;;  %v3421_v4 = vpop.permute.xlu0 %3420 }
 0x299   : > { %v3423_v49 = vunpack.i.h.bf16 %v3421_v4  ;;  %v3422_v50 = vunpack.i.l.bf16 %v3421_v4  ;;  %v3446_v51 = vpop.permute.xlu1 %3445  ;;  %v3574_v52 = vpack.i.bf16 %v4608_v6, %v4605_v7 }
 0x29a   : > { %3570 = vrot.lane.b32.xlu0 %v3559_v22, %s3777_s23  ;;  %v3448_v53 = vunpack.i.h.bf16 %v3446_v51  ;;  %v3447_v11 = vunpack.i.l.bf16 %v3446_v51 }
 0x29b   : > { %v4616_v2 = vsel %vm1927_vm10, %v1903_v32, %v3422_v50  ;;  %v4619_v1 = vsel %vm1927_vm10, %v1904_v35, %v3423_v49  ;;  %3575 = vrot.lane.b32.xlu1 %v3574_v52, %s3777_s23  ;;  %v1516_v49 = vld [vmem:[#allocation3 + $0xf8] sm:$0xff] }
 0x29c   : > { %v3436_v10 = vpop.permute.xlu0 %3435  ;;  %v3579_v54 = vpack.i.bf16 %v4619_v1, %v4616_v2  ;;  %v1906_v25 = vsel %vm799_vm3, %v1510_v42, %v3448_v53  ;;  %v1905_v3 = vsel %vm799_vm3, %v1509_v43, %v3447_v11 }
 0x29d   : > { %v3451_v55 = vpop.permute.xlu1 %3450  ;;  %v3438_v62 = vunpack.i.h.bf16 %v3436_v10  ;;  %v3437_v63 = vunpack.i.l.bf16 %v3436_v10 }
 0x29e   : > { %v3453_v0 = vunpack.i.h.bf16 %v3451_v55  ;;  %v3452_v26 = vunpack.i.l.bf16 %v3451_v55  ;;  %3585 = vrot.lane.b32.xlu0 %v3574_v52, %s3775_s25 }
 0x29f   : > { %3580 = vrot.lane.b32.xlu1 %v3579_v54, %s3775_s25  ;;  %v1908_v18 = vsel %vm799_vm3, %v1512_v13, %v3438_v62  ;;  %v1907_v34 = vsel %vm799_vm3, %v1511_v14, %v3437_v63  ;;  %v1517_v63 = vld [vmem:[#allocation3 + $0x108] sm:$0xff] }
 0x2a0   : > { %v4629_v8 = vsel %vm1927_vm10, %v1905_v3, %v3452_v26  ;;  %v4632_v9 = vsel %vm1927_vm10, %v1906_v25, %v3453_v0  ;;  %v3441_v31 = vpop.permute.xlu0 %3440  ;;  %v1518_v0 = vld [vmem:[#allocation3 + $0x110] sm:$0xff] }
 0x2a1   : > { %v3443_v23 = vunpack.i.h.bf16 %v3441_v31  ;;  %v3442_v24 = vunpack.i.l.bf16 %v3441_v31  ;;  %v3466_v16 = vpop.permute.xlu1 %3465  ;;  %v3594_v17 = vpack.i.bf16 %v4632_v9, %v4629_v8 }
 0x2a2   : > { %3590 = vrot.lane.b32.xlu0 %v3579_v54, %s3777_s23  ;;  %v3468_v20 = vunpack.i.h.bf16 %v3466_v16  ;;  %v3467_v21 = vunpack.i.l.bf16 %v3466_v16 }
 0x2a3   : > { %v4640_v33 = vsel %vm1927_vm10, %v1907_v34, %v3442_v24  ;;  %v4643_v19 = vsel %vm1927_vm10, %v1908_v18, %v3443_v23  ;;  %3595 = vrot.lane.b32.xlu1 %v3594_v17, %s3777_s23  ;;  %v1520_v18 = vld [vmem:[#allocation3 + $0x128] sm:$0xff] }
 0x2a4   : > { %v3456_v37 = vpop.permute.xlu0 %3455  ;;  %v3599_v36 = vpack.i.bf16 %v4643_v19, %v4640_v33  ;;  %v1910_v5 = vsel %vm799_vm3, %v1514_v29, %v3468_v20  ;;  %v1909_v59 = vsel %vm799_vm3, %v1513_v28, %v3467_v21 }
 0x2a5   : > { %v3471_v22 = vpop.permute.xlu1 %3470  ;;  %v3458_v38 = vunpack.i.h.bf16 %v3456_v37  ;;  %v3457_v39 = vunpack.i.l.bf16 %v3456_v37 }
 0x2a6   : > { %v3473_v40 = vunpack.i.h.bf16 %v3471_v22  ;;  %v3472_v41 = vunpack.i.l.bf16 %v3471_v22  ;;  %3605 = vrot.lane.b32.xlu0 %v3594_v17, %s3775_s25  ;;  %v1519_v17 = vld [vmem:[#allocation3 + $0x120] sm:$0xff] }
 0x2a7   : > { %3600 = vrot.lane.b32.xlu1 %v3599_v36, %s3775_s25  ;;  %v1912_v32 = vsel %vm799_vm3, %v1516_v49, %v3458_v38  ;;  %v1911_v53 = vsel %vm799_vm3, %v1515_v48, %v3457_v39 }
 0x2a8   : > { %v4653_v58 = vsel %vm1927_vm10, %v1909_v59, %v3472_v41  ;;  %v4656_v4 = vsel %vm1927_vm10, %v1910_v5, %v3473_v40  ;;  %v3461_v12 = vpop.permute.xlu0 %3460  ;;  %v1521_v59 = vld [vmem:[#allocation3 + $0x138] sm:$0xff] }
 0x2a9   : > { %v3463_v50 = vunpack.i.h.bf16 %v3461_v12  ;;  %v3462_v51 = vunpack.i.l.bf16 %v3461_v12  ;;  %v3486_v52 = vpop.permute.xlu1 %3485  ;;  %v3614_v35 = vpack.i.bf16 %v4656_v4, %v4653_v58  ;;  %v1522_v12 = vld [vmem:[#allocation3 + $0x140] sm:$0xff] }
 0x2aa   : > { %3610 = vrot.lane.b32.xlu0 %v3599_v36, %s3777_s23  ;;  %v3488_v54 = vunpack.i.h.bf16 %v3486_v52  ;;  %v3487_v55 = vunpack.i.l.bf16 %v3486_v52 }
 0x2ab   : > { %v4664_v11 = vsel %vm1927_vm10, %v1911_v53, %v3462_v51  ;;  %v4667_v10 = vsel %vm1927_vm10, %v1912_v32, %v3463_v50  ;;  %3615 = vrot.lane.b32.xlu1 %v3614_v35, %s3777_s23 }
 0x2ac   : > { %v3476_v43 = vpop.permute.xlu0 %3475  ;;  %v3619_v42 = vpack.i.bf16 %v4667_v10, %v4664_v11  ;;  %v1914_v14 = vsel %vm799_vm3, %v1518_v0, %v3488_v54  ;;  %v1913_v13 = vsel %vm799_vm3, %v1517_v63, %v3487_v55  ;;  %v1523_v55 = vld [vmem:[#allocation3 + $0x150] sm:$0xff] }
 0x2ad   : > { %v3491_v62 = vpop.permute.xlu1 %3490  ;;  %v3478_v26 = vunpack.i.h.bf16 %v3476_v43  ;;  %v3477_v25 = vunpack.i.l.bf16 %v3476_v43  ;;  %v1524_v43 = vld [vmem:[#allocation3 + $0x158] sm:$0xff] }
 0x2ae   : > { %v3493_v3 = vunpack.i.h.bf16 %v3491_v62  ;;  %v3492_v31 = vunpack.i.l.bf16 %v3491_v62  ;;  %3625 = vrot.lane.b32.xlu0 %v3614_v35, %s3775_s25 }
 0x2af   : > { %3620 = vrot.lane.b32.xlu1 %v3619_v42, %s3775_s25  ;;  %v1916_v36 = vsel %vm799_vm3, %v1520_v18, %v3478_v26  ;;  %v1915_v22 = vsel %vm799_vm3, %v1519_v17, %v3477_v25 }
 0x2b0   : > { %v4677_v23 = vsel %vm1927_vm10, %v1913_v13, %v3492_v31  ;;  %v4680_v24 = vsel %vm1927_vm10, %v1914_v14, %v3493_v3  ;;  %v3481_v16 = vpop.permute.xlu0 %3480 }
 0x2b1   : > { %v3483_v34 = vunpack.i.h.bf16 %v3481_v16  ;;  %v3482_v20 = vunpack.i.l.bf16 %v3481_v16  ;;  %v3506_v21 = vpop.permute.xlu1 %3505  ;;  %v3634_v37 = vpack.i.bf16 %v4680_v24, %v4677_v23 }
 0x2b2   : > { %3630 = vrot.lane.b32.xlu0 %v3619_v42, %s3777_s23  ;;  %v3508_v38 = vunpack.i.h.bf16 %v3506_v21  ;;  %v3507_v39 = vunpack.i.l.bf16 %v3506_v21  ;;  %v1527_v21 = vld [vmem:[#allocation3 + $0x180] sm:$0xff] }
 0x2b3   : > { %v4688_v28 = vsel %vm1927_vm10, %v1915_v22, %v3482_v20  ;;  %v4691_v29 = vsel %vm1927_vm10, %v1916_v36, %v3483_v34  ;;  %3635 = vrot.lane.b32.xlu1 %v3634_v37, %s3777_s23  ;;  %v1528_v36 = vld [vmem:[#allocation3 + $0x188] sm:$0xff] }
 0x2b4   : > { %v3496_v40 = vpop.permute.xlu0 %3495  ;;  %v3639_v41 = vpack.i.bf16 %v4691_v29, %v4688_v28  ;;  %v1918_v52 = vsel %vm799_vm3, %v1522_v12, %v3508_v38  ;;  %v1917_v35 = vsel %vm799_vm3, %v1521_v59, %v3507_v39  ;;  %v1525_v22 = vld [vmem:[#allocation3 + $0x168] sm:$0xff]  ;;  %v1526_v38 = vld [vmem:[#allocation3 + $0x170] sm:$0xff] }
 0x2b5   : > { %v3511_v5 = vpop.permute.xlu1 %3510  ;;  %v3498_v48 = vunpack.i.h.bf16 %v3496_v40  ;;  %v3497_v49 = vunpack.i.l.bf16 %v3496_v40 }
 0x2b6   : > { %v3513_v50 = vunpack.i.h.bf16 %v3511_v5  ;;  %v3512_v51 = vunpack.i.l.bf16 %v3511_v5  ;;  %3645 = vrot.lane.b32.xlu0 %v3634_v37, %s3775_s25 }
 0x2b7   : > { %3640 = vrot.lane.b32.xlu1 %v3639_v41, %s3775_s25  ;;  %v1920_v26 = vsel %vm799_vm3, %v1524_v43, %v3498_v48  ;;  %v1919_v25 = vsel %vm799_vm3, %v1523_v55, %v3497_v49  ;;  %v1529_v43 = vld [vmem:[#allocation3 + $0x198] sm:$0xff] }
 0x2b8   : > { %v4701_v32 = vsel %vm1927_vm10, %v1917_v35, %v3512_v51  ;;  %v4704_v53 = vsel %vm1927_vm10, %v1918_v52, %v3513_v50  ;;  %v3501_v54 = vpop.permute.xlu0 %3500  ;;  %v3368_v52 = vunpack.i.h.bf16 %v4538_v27  ;;  %v3367_v35 = vunpack.i.l.bf16 %v4538_v27 }
 0x2b9   : > { %v3503_v42 = vunpack.i.h.bf16 %v3501_v54  ;;  %v3502_v62 = vunpack.i.l.bf16 %v3501_v54  ;;  %v3521_v63 = vpop.permute.xlu1 %3520  ;;  %v3654_v0 = vpack.i.bf16 %v4704_v53, %v4701_v32 }
 0x2ba   : > { %3650 = vrot.lane.b32.xlu0 %v3639_v41, %s3777_s23  ;;  %v3523_v48 = vunpack.i.h.bf16 %v3521_v63  ;;  %v3522_v49 = vunpack.i.l.bf16 %v3521_v63  ;;  %v1925_v27 = vsel %vm799_vm3, %v1529_v43, %v3367_v35 }
 0x2bb   : > { %v4712_v3 = vsel %vm1927_vm10, %v1919_v25, %v3502_v62  ;;  %v4715_v31 = vsel %vm1927_vm10, %v1920_v26, %v3503_v42  ;;  %3655 = vrot.lane.b32.xlu1 %v3654_v0, %s3777_s23  ;;  %v1530_v42 = vld [vmem:[#allocation3 + $0x1a0] sm:$0xff] }
 0x2bc   : > { %v3516_v14 = vpop.permute.xlu0 %3515  ;;  %v3659_v13 = vpack.i.bf16 %v4715_v31, %v4712_v3  ;;  %v1926_v25 = vsel %vm799_vm3, %v1530_v42, %v3368_v52 }
 0x2bd   : > { %v3526_v16 = vpop.permute.xlu1 %3525  ;;  %v3518_v17 = vunpack.i.h.bf16 %v3516_v14  ;;  %v3517_v18 = vunpack.i.l.bf16 %v3516_v14 }
 0x2be   : > { %3665 = vrot.lane.b32.xlu0 %v3654_v0, %s3775_s25  ;;  %v3528_v34 = vunpack.i.h.bf16 %v3526_v16  ;;  %v3527_v20 = vunpack.i.l.bf16 %v3526_v16 }
 0x2bf   : > { %3660 = vrot.lane.b32.xlu1 %v3659_v13, %s3775_s25  ;;  %v1924_v41 = vsel %vm799_vm3, %v1528_v36, %v3518_v17  ;;  %v1923_v5 = vsel %vm799_vm3, %v1527_v21, %v3517_v18  ;;  %v3363_v18 = vunpack.i.h.bf16 %v4540_v60  ;;  %v1495_v21 = vld [vmem:[#allocation3] sm:$0xff] }
 0x2c0   : > { %v1922_v59 = vsel %vm799_vm3, %v1526_v38, %v3528_v34  ;;  %v1921_v12 = vsel %vm799_vm3, %v1525_v22, %v3527_v20  ;;  %v1960_v63 = vsel %vm1927_vm10, %v1923_v5, %v3522_v49  ;;  %v1961_v26 = vsel %vm1927_vm10, %v1924_v41, %v3523_v48  ;;  %v1496_v34 = vld [vmem:[#allocation3 + $0x8] sm:$0xff] }
 0x2c1   : > { %v3531_v37 = vpop.permute.xlu1 %3530  ;;  %v3679_v14 = vpack.i.bf16 %v1961_v26, %v1960_v63  ;;  %v3362_v20 = vunpack.i.l.bf16 %v4540_v60  ;;  %v1892_v38 = vsel %vm799_vm3, %v1496_v34, %v3363_v18 }
 0x2c2   : > { %v3533_v39 = vunpack.i.h.bf16 %v3531_v37  ;;  %v3532_v40 = vunpack.i.l.bf16 %v3531_v37  ;;  %3670 = vrot.lane.b32.xlu0 %v3659_v13, %s3777_s23  ;;  %v3373_v37 = vunpack.i.h.bf16 %v4542_v57 }
 0x2c4   : > { %v4728_v50 = vsel %vm1927_vm10, %v1921_v12, %v3532_v40  ;;  %v4731_v51 = vsel %vm1927_vm10, %v1922_v59, %v3533_v39  ;;  %v3372_v39 = vunpack.i.l.bf16 %v4542_v57  ;;  %v1891_v40 = vsel %vm799_vm3, %v1495_v21, %v3362_v20 }
 0x2c5   : > { %v3536_v54 = vpop.permute.xlu1 %3535  ;;  %v3674_v55 = vpack.i.bf16 %v4731_v51, %v4728_v50  ;;  %v1929_v48 = vsel %vm1927_vm10, %v1892_v38, %v3373_v37 }
 0x2c6   : > { %v3538_v62 = vunpack.i.h.bf16 %v3536_v54  ;;  %v3537_v0 = vunpack.i.l.bf16 %v3536_v54  ;;  %v1928_v60 = vsel %vm1927_vm10, %v1891_v40, %v3372_v39 }
 0x2c7   : > { %3675 = vrot.lane.b32.xlu1 %v3674_v55, %s3777_s23  ;;  %3685 = vrot.lane.b32.xlu0 %v3674_v55, %s3775_s25 }
 0x2c8   : > { %v1963_v13 = vsel %vm1927_vm10, %v1926_v25, %v3538_v62  ;;  %v1962_v16 = vsel %vm1927_vm10, %v1925_v27, %v3537_v0 }
 0x2c9   : > { %v3694_v17 = vpack.i.bf16 %v1963_v13, %v1962_v16 }
 0x2cb   : > { %3680 = vrot.lane.b32.xlu1 %v3679_v14, %s3775_s25  ;;  %3690 = vrot.lane.b32.xlu0 %v3679_v14, %s3777_s23 }
 0x2cf   : > { %3695 = vrot.lane.b32.xlu1 %v3694_v17, %s3777_s23 }
 0x2fa   : > { %v3541_v36 = vpop.permute.xlu1 %3540 }
 0x2fb   : > { %v3543_v59 = vunpack.i.h.bf16 %v3541_v36  ;;  %v3542_v12 = vunpack.i.l.bf16 %v3541_v36 }
 0x2fd   : > { %v2192_v62 = vsel %vm1095_vm6, %v4570_v56, %v3542_v12  ;;  %v2193_v0 = vsel %vm1095_vm6, %v4573_v61, %v3543_v59 }
 0x300   : > { %v3546_v22 = vpop.permute.xlu0 %3545 }
 0x301   : > { %v3548_v41 = vunpack.i.h.bf16 %v3546_v22  ;;  %v3547_v5 = vunpack.i.l.bf16 %v3546_v22 }
 0x303   : > { %v2190_v57 = vsel %vm1095_vm6, %v1928_v60, %v3547_v5  ;;  %v2191_v42 = vsel %vm1095_vm6, %v1929_v48, %v3548_v41 }
 0x304   : > { %v3551_v49 = vpop.permute.xlu0 %3550 }
 0x305   : > { %v3553_v52 = vunpack.i.h.bf16 %v3551_v49  ;;  %v3552_v35 = vunpack.i.l.bf16 %v3551_v49  ;;  %v3556_v54 = vpop.permute.xlu1 %3555 }
 0x306   : > { %v3558_v55 = vunpack.i.h.bf16 %v3556_v54  ;;  %v3557_v43 = vunpack.i.l.bf16 %v3556_v54 }
 0x307   : > { %v2223_v63 = vsel %vm2222_vm12, %v2190_v57, %v3552_v35  ;;  %v2224_v26 = vsel %vm2222_vm12, %v2191_v42, %v3553_v52 }
 0x308   : > { %v2225_v25 = vsel %vm2222_vm12, %v2192_v62, %v3557_v43  ;;  %v2226_v27 = vsel %vm2222_vm12, %v2193_v0, %v3558_v55  ;;  %v3566_v14 = vpop.permute.xlu0 %3565  ;;  %v2255_v13 = vpack.c.bf16 %v2224_v26, %v2223_v63 }
 0x309   : > { %v2256_v16 = vpack.c.bf16 %v2226_v27, %v2225_v25  ;;  %v3561_v17 = vpop.permute.xlu1 %3560  ;;  %v3568_v18 = vunpack.i.h.bf16 %v3566_v14  ;;  %v3567_v34 = vunpack.i.l.bf16 %v3566_v14 }
 0x30a   : > { %2938 = vmatprep.mubr.msk.bf16.mxu1 %vm2314_vm13, %v2255_v13  ;;  %v3563_v56 = vunpack.i.h.bf16 %v3561_v17  ;;  %v3562_v20 = vunpack.i.l.bf16 %v3561_v17 }
 0x30b   : > { %2939 = vmatmul.mubr.msk.bf16.vlgmr.msra.gmra.mrb[0].mxu1 %vm2314_vm13, %v2256_v16  ;;  %v2195_v22 = vsel %vm1095_vm6, %v4559_v47, %v3568_v18  ;;  %v2194_v38 = vsel %vm1095_vm6, %v4556_v44, %v3567_v34 }
 0x30c   : > { %v3571_v61 = vpop.permute.xlu0 %3570  ;;  %v2197_v41 = vsel %vm1095_vm6, %v4584_v15, %v3563_v56  ;;  %v2196_v5 = vsel %vm1095_vm6, %v4581_v30, %v3562_v20 }
 0x30d   : > { %v3573_v21 = vunpack.i.h.bf16 %v3571_v61  ;;  %v3572_v37 = vunpack.i.l.bf16 %v3571_v61  ;;  %v3576_v36 = vpop.permute.xlu1 %3575 }
 0x30e   : > { %v3578_v39 = vunpack.i.h.bf16 %v3576_v36  ;;  %v3577_v40 = vunpack.i.l.bf16 %v3576_v36 }
 0x30f   : > { %v2227_v59 = vsel %vm2222_vm12, %v2194_v38, %v3572_v37  ;;  %v2228_v12 = vsel %vm2222_vm12, %v2195_v22, %v3573_v21 }
 0x310   : > { %v2257_v48 = vpack.c.bf16 %v2228_v12, %v2227_v59  ;;  %v2229_v49 = vsel %vm2222_vm12, %v2196_v5, %v3577_v40  ;;  %v2230_v47 = vsel %vm2222_vm12, %v2197_v41, %v3578_v39  ;;  %v3586_v60 = vpop.permute.xlu0 %3585 }
 0x311   : > { %v2258_v52 = vpack.c.bf16 %v2230_v47, %v2229_v49  ;;  %v3581_v44 = vpop.permute.xlu1 %3580  ;;  %v3588_v35 = vunpack.i.h.bf16 %v3586_v60  ;;  %v3587_v54 = vunpack.i.l.bf16 %v3586_v60 }
 0x312   : > { %2942 = vmatprep.mubr.msk.bf16.mxu1 %vm2314_vm13, %v2257_v48  ;;  %v3583_v15 = vunpack.i.h.bf16 %v3581_v44  ;;  %v3582_v55 = vunpack.i.l.bf16 %v3581_v44 }
 0x313   : > { %2943 = vmatmul.mubr.msk.bf16.gmra.mrb[4].mxu1 %vm2314_vm13, %v2258_v52  ;;  %v2199_v62 = vsel %vm1095_vm6, %v4595_v46, %v3588_v35  ;;  %v2198_v0 = vsel %vm1095_vm6, %v4592_v45, %v3587_v54 }
 0x314   : > { %v3591_v30 = vpop.permute.xlu0 %3590  ;;  %v2201_v25 = vsel %vm1095_vm6, %v4608_v6, %v3583_v15  ;;  %v2200_v27 = vsel %vm1095_vm6, %v4605_v7, %v3582_v55 }
 0x315   : > { %v3593_v43 = vunpack.i.h.bf16 %v3591_v30  ;;  %v3592_v57 = vunpack.i.l.bf16 %v3591_v30  ;;  %v3596_v42 = vpop.permute.xlu1 %3595 }
 0x316   : > { %v3598_v63 = vunpack.i.h.bf16 %v3596_v42  ;;  %v3597_v26 = vunpack.i.l.bf16 %v3596_v42 }
 0x317   : > { %v2231_v14 = vsel %vm2222_vm12, %v2198_v0, %v3592_v57  ;;  %v2232_v13 = vsel %vm2222_vm12, %v2199_v62, %v3593_v43 }
 0x318   : > { %v2259_v16 = vpack.c.bf16 %v2232_v13, %v2231_v14  ;;  %v2233_v17 = vsel %vm2222_vm12, %v2200_v27, %v3597_v26  ;;  %v2234_v46 = vsel %vm2222_vm12, %v2201_v25, %v3598_v63  ;;  %v3606_v18 = vpop.permute.xlu0 %3605 }
 0x319   : > { %v2260_v34 = vpack.c.bf16 %v2234_v46, %v2233_v17  ;;  %v3601_v45 = vpop.permute.xlu1 %3600  ;;  %v3608_v56 = vunpack.i.h.bf16 %v3606_v18  ;;  %v3607_v20 = vunpack.i.l.bf16 %v3606_v18 }
 0x31a   : > { %2946 = vmatprep.mubr.msk.bf16.mxu1 %vm2314_vm13, %v2259_v16  ;;  %v3603_v6 = vunpack.i.h.bf16 %v3601_v45  ;;  %v3602_v61 = vunpack.i.l.bf16 %v3601_v45 }
 0x31b   : > { %2947 = vmatmul.mubr.msk.bf16.gmra.mrb[8].mxu1 %vm2314_vm13, %v2260_v34  ;;  %v2203_v22 = vsel %vm1095_vm6, %v4619_v1, %v3608_v56  ;;  %v2202_v38 = vsel %vm1095_vm6, %v4616_v2, %v3607_v20 }
 0x31c   : > { %v3611_v7 = vpop.permute.xlu0 %3610  ;;  %v2205_v41 = vsel %vm1095_vm6, %v4632_v9, %v3603_v6  ;;  %v2204_v5 = vsel %vm1095_vm6, %v4629_v8, %v3602_v61 }
 0x31d   : > { %v3613_v21 = vunpack.i.h.bf16 %v3611_v7  ;;  %v3612_v37 = vunpack.i.l.bf16 %v3611_v7  ;;  %v3616_v36 = vpop.permute.xlu1 %3615 }
 0x31e   : > { %v3618_v39 = vunpack.i.h.bf16 %v3616_v36  ;;  %v3617_v40 = vunpack.i.l.bf16 %v3616_v36 }
 0x31f   : > { %v2235_v59 = vsel %vm2222_vm12, %v2202_v38, %v3612_v37  ;;  %v2236_v12 = vsel %vm2222_vm12, %v2203_v22, %v3613_v21 }
 0x320   : > { %v2261_v48 = vpack.c.bf16 %v2236_v12, %v2235_v59  ;;  %v2237_v49 = vsel %vm2222_vm12, %v2204_v5, %v3617_v40  ;;  %v2238_v1 = vsel %vm2222_vm12, %v2205_v41, %v3618_v39  ;;  %v3626_v47 = vpop.permute.xlu0 %3625 }
 0x321   : > { %v2262_v60 = vpack.c.bf16 %v2238_v1, %v2237_v49  ;;  %v3621_v2 = vpop.permute.xlu1 %3620  ;;  %v3628_v52 = vunpack.i.h.bf16 %v3626_v47  ;;  %v3627_v44 = vunpack.i.l.bf16 %v3626_v47 }
 0x322   : > { %2950 = vmatprep.mubr.msk.bf16.mxu1 %vm2314_vm13, %v2261_v48  ;;  %v3623_v9 = vunpack.i.h.bf16 %v3621_v2  ;;  %v3622_v35 = vunpack.i.l.bf16 %v3621_v2 }
 0x323   : > { %2951 = vmatmul.mubr.msk.bf16.gmra.mrb[12].mxu1 %vm2314_vm13, %v2262_v60  ;;  %v2207_v30 = vsel %vm1095_vm6, %v4643_v19, %v3628_v52  ;;  %v2206_v43 = vsel %vm1095_vm6, %v4640_v33, %v3627_v44 }
 0x324   : > { %v3631_v8 = vpop.permute.xlu0 %3630  ;;  %v2209_v62 = vsel %vm1095_vm6, %v4656_v4, %v3623_v9  ;;  %v2208_v0 = vsel %vm1095_vm6, %v4653_v58, %v3622_v35 }
 0x325   : > { %v3633_v54 = vunpack.i.h.bf16 %v3631_v8  ;;  %v3632_v15 = vunpack.i.l.bf16 %v3631_v8  ;;  %v3636_v55 = vpop.permute.xlu1 %3635 }
 0x326   : > { %v3638_v57 = vunpack.i.h.bf16 %v3636_v55  ;;  %v3637_v42 = vunpack.i.l.bf16 %v3636_v55 }
 0x327   : > { %v2239_v63 = vsel %vm2222_vm12, %v2206_v43, %v3632_v15  ;;  %v2240_v26 = vsel %vm2222_vm12, %v2207_v30, %v3633_v54 }
 0x328   : > { %v2263_v25 = vpack.c.bf16 %v2240_v26, %v2239_v63  ;;  %v2241_v27 = vsel %vm2222_vm12, %v2208_v0, %v3637_v42  ;;  %v2242_v19 = vsel %vm2222_vm12, %v2209_v62, %v3638_v57  ;;  %v3646_v14 = vpop.permute.xlu0 %3645 }
 0x329   : > { %v2264_v13 = vpack.c.bf16 %v2242_v19, %v2241_v27  ;;  %v3641_v33 = vpop.permute.xlu1 %3640  ;;  %v3648_v16 = vunpack.i.h.bf16 %v3646_v14  ;;  %v3647_v17 = vunpack.i.l.bf16 %v3646_v14 }
 0x32a   : > { %2954 = vmatprep.mubr.msk.bf16.mxu1 %vm2314_vm13, %v2263_v25  ;;  %v3643_v4 = vunpack.i.h.bf16 %v3641_v33  ;;  %v3642_v46 = vunpack.i.l.bf16 %v3641_v33 }
 0x32b   : > { %2955 = vmatmul.mubr.msk.bf16.gmra.mrb[16].mxu1 %vm2314_vm13, %v2264_v13  ;;  %v2211_v56 = vsel %vm1095_vm6, %v4667_v10, %v3648_v16  ;;  %v2210_v20 = vsel %vm1095_vm6, %v4664_v11, %v3647_v17 }
 0x32c   : > { %v3651_v58 = vpop.permute.xlu0 %3650  ;;  %v2213_v7 = vsel %vm1095_vm6, %v4680_v24, %v3643_v4  ;;  %v2212_v21 = vsel %vm1095_vm6, %v4677_v23, %v3642_v46  ;;  %v4869_v4 = vld [vmem:[%s4997_s4] ss:$0 sm:$0xff] }
 0x32d   : > { %v3653_v18 = vunpack.i.h.bf16 %v3651_v58  ;;  %v3652_v34 = vunpack.i.l.bf16 %v3651_v58  ;;  %v3656_v45 = vpop.permute.xlu1 %3655 }
 0x32e   : > { %v3658_v6 = vunpack.i.h.bf16 %v3656_v45  ;;  %v3657_v61 = vunpack.i.l.bf16 %v3656_v45 }
 0x32f   : > { %v2243_v37 = vsel %vm2222_vm12, %v2210_v20, %v3652_v34  ;;  %v2244_v36 = vsel %vm2222_vm12, %v2211_v56, %v3653_v18 }
 0x330   : > { %v2265_v22 = vpack.c.bf16 %v2244_v36, %v2243_v37  ;;  %v2245_v38 = vsel %vm2222_vm12, %v2212_v21, %v3657_v61  ;;  %v2246_v10 = vsel %vm2222_vm12, %v2213_v7, %v3658_v6  ;;  %v3666_v39 = vpop.permute.xlu0 %3665 }
 0x331   : > { %v2266_v40 = vpack.c.bf16 %v2246_v10, %v2245_v38  ;;  %v3668_v11 = vunpack.i.h.bf16 %v3666_v39  ;;  %v3667_v41 = vunpack.i.l.bf16 %v3666_v39  ;;  %v3661_v24 = vpop.permute.xlu1 %3660 }
 0x332   : > { %2958 = vmatprep.mubr.msk.bf16.mxu1 %vm2314_vm13, %v2265_v22  ;;  %v3663_v49 = vunpack.i.h.bf16 %v3661_v24  ;;  %v3662_v1 = vunpack.i.l.bf16 %v3661_v24 }
 0x333   : > { %2959 = vmatmul.mubr.msk.bf16.gmra.mrb[20].mxu1 %vm2314_vm13, %v2266_v40  ;;  %v2215_v12 = vsel %vm1095_vm6, %v4691_v29, %v3668_v11  ;;  %v2214_v48 = vsel %vm1095_vm6, %v4688_v28, %v3667_v41 }
 0x334   : > { %v3671_v5 = vpop.permute.xlu0 %3670  ;;  %v2217_v8 = vsel %vm1095_vm6, %v4704_v53, %v3663_v49  ;;  %v2216_v29 = vsel %vm1095_vm6, %v4701_v32, %v3662_v1 }
 0x335   : > { %v3673_v23 = vunpack.i.h.bf16 %v3671_v5  ;;  %v3672_v59 = vunpack.i.l.bf16 %v3671_v5 }
 0x337   : > { %v2247_v47 = vsel %vm2222_vm12, %v2214_v48, %v3672_v59  ;;  %v2248_v60 = vsel %vm2222_vm12, %v2215_v12, %v3673_v23 }
 0x338   : > { %v2267_v2 = vpack.c.bf16 %v2248_v60, %v2247_v47 }
 0x339   : > { %v3676_v52 = vpop.permute.xlu1 %3675  ;;  %v3686_v44 = vpop.permute.xlu0 %3685 }
 0x33a   : > { %v3678_v9 = vunpack.i.h.bf16 %v3676_v52  ;;  %v3677_v35 = vunpack.i.l.bf16 %v3676_v52  ;;  %2962 = vmatprep.mubr.msk.bf16.mxu1 %vm2314_vm13, %v2267_v2  ;;  %v3688_v28 = vunpack.i.h.bf16 %v3686_v44  ;;  %v3687_v54 = vunpack.i.l.bf16 %v3686_v44 }
 0x33c   : > { %v2249_v15 = vsel %vm2222_vm12, %v2216_v29, %v3677_v35  ;;  %v2250_v55 = vsel %vm2222_vm12, %v2217_v8, %v3678_v9  ;;  %v2219_v0 = vsel %vm1095_vm6, %v4715_v31, %v3688_v28  ;;  %v2218_v53 = vsel %vm1095_vm6, %v4712_v3, %v3687_v54 }
 0x33d   : > { %v2268_v30 = vpack.c.bf16 %v2250_v55, %v2249_v15  ;;  %v3681_v43 = vpop.permute.xlu1 %3680  ;;  %v3691_v57 = vpop.permute.xlu0 %3690 }
 0x33e   : > { %v3693_v42 = vunpack.i.h.bf16 %v3691_v57  ;;  %v3692_v62 = vunpack.i.l.bf16 %v3691_v57  ;;  %v3683_v63 = vunpack.i.h.bf16 %v3681_v43  ;;  %v3682_v26 = vunpack.i.l.bf16 %v3681_v43 }
 0x33f   : > { %2963 = vmatmul.mubr.msk.bf16.gmra.mrb[24].mxu1 %vm2314_vm13, %v2268_v30 }
 0x340   : > { %v2251_v32 = vsel %vm2222_vm12, %v2218_v53, %v3692_v62  ;;  %v2252_v25 = vsel %vm2222_vm12, %v2219_v0, %v3693_v42  ;;  %v2221_v33 = vsel %vm1095_vm6, %v4731_v51, %v3683_v63  ;;  %v2220_v31 = vsel %vm1095_vm6, %v4728_v50, %v3682_v26 }
 0x341   : > { %v2269_v27 = vpack.c.bf16 %v2252_v25, %v2251_v32  ;;  %v3696_v19 = vpop.permute.xlu1 %3695 }
 0x342   : > { %v3698_v14 = vunpack.i.h.bf16 %v3696_v19  ;;  %v3697_v13 = vunpack.i.l.bf16 %v3696_v19 }
 0x343   : > { %2966 = vmatprep.mubr.msk.bf16.mxu1 %vm2314_vm13, %v2269_v27 }
 0x344   : > { %v2253_v3 = vsel %vm2222_vm12, %v2220_v31, %v3697_v13  ;;  %v2254_v16 = vsel %vm2222_vm12, %v2221_v33, %v3698_v14 }
 0x345   : > { %v2270_v17 = vpack.c.bf16 %v2254_v16, %v2253_v3 }
 0x347   : > { %2967 = vmatmul.mubr.msk.bf16.gmra.mrb[28].mxu1 %vm2314_vm13, %v2270_v17 }
 0x3de   : > { %v2940_v46 = vpop.f32.mrb[0].mxu1 }
 0x3df   : > { %v2410_v51 = vadd.f32 %v2940_v46, %v4869_v4  ;;  %v2401_v58 = vpop.f32.mrb[1].mxu1 }
 0x3e0   : > { %v2402_v50 = vadd.f32 %v4869_v4, %v2401_v58  ;;  %v2941_v18 = vpop.f32.mrb[2].mxu1 }
 0x3e1   : > { %v2530_v34 = vmax.f32 %v2410_v51, 0.0  ;;  %v2413_v45 = vadd.f32 %v2941_v18, %v4869_v4  ;;  %v2404_v56 = vpop.f32.mrb[3].mxu1 }
 0x3e2   : > { %v2528_v20 = vmax.f32 %v2402_v50, 0.0  ;;  %v2405_v6 = vadd.f32 %v4869_v4, %v2404_v56 }
 0x3e3   : > { %v2531_v61 = vmax.f32 %v2413_v45, 0.0 }
 0x3e4   : > { %v2560_v7 = vmax.f32 %v2528_v20, %v2530_v34  ;;  %v2529_v21 = vmax.f32 %v2405_v6, 0.0 }
 0x3e6   : > { %2576 = vst.msk [vmem:[#allocation4] sm:$0xff] %vm799_vm3, %v2560_v7  ;;  %v2561_v37 = vmax.f32 %v2529_v21, %v2531_v61  ;;  %v2944_v36 = vpop.f32.mrb[4].mxu1 }
 0x3e7   : > { %v2426_v22 = vadd.f32 %v2944_v36, %v4869_v4  ;;  %v2417_v38 = vpop.f32.mrb[5].mxu1 }
 0x3e8   : > { %2577 = vst.msk [vmem:[#allocation4 + $0x8] sm:$0xff] %vm799_vm3, %v2561_v37  ;;  %v2418_v10 = vadd.f32 %v4869_v4, %v2417_v38  ;;  %v2945_v39 = vpop.f32.mrb[6].mxu1 }
 0x3e9   : > { %v2534_v40 = vmax.f32 %v2426_v22, 0.0  ;;  %v2429_v11 = vadd.f32 %v2945_v39, %v4869_v4  ;;  %v2420_v41 = vpop.f32.mrb[7].mxu1 }
 0x3ea   : > { %v2532_v24 = vmax.f32 %v2418_v10, 0.0  ;;  %v2421_v5 = vadd.f32 %v4869_v4, %v2420_v41 }
 0x3eb   : > { %v2535_v23 = vmax.f32 %v2429_v11, 0.0 }
 0x3ec   : > { %v2562_v59 = vmax.f32 %v2532_v24, %v2534_v40  ;;  %v2533_v12 = vmax.f32 %v2421_v5, 0.0 }
 0x3ee   : > { %2578 = vst.msk [vmem:[#allocation4 + $0x10] sm:$0xff] %vm799_vm3, %v2562_v59  ;;  %v2563_v48 = vmax.f32 %v2533_v12, %v2535_v23  ;;  %v2948_v49 = vpop.f32.mrb[8].mxu1 }
 0x3ef   : > { %v2592_v1 = vld [vmem:[#allocation4] ss:$2 sm:$0xff]  ;;  %v2608_v47 = vld [vmem:[#allocation4 + $0x1] ss:$2 sm:$0xff]  ;;  %v2442_v60 = vadd.f32 %v2948_v49, %v4869_v4  ;;  %v2433_v2 = vpop.f32.mrb[9].mxu1 }
 0x3f0   : > { %v2623_v52 = vmax.f32 %v2592_v1, %v2608_v47  ;;  %2579 = vst.msk [vmem:[#allocation4 + $0x18] sm:$0xff] %vm799_vm3, %v2563_v48  ;;  %v2434_v44 = vadd.f32 %v4869_v4, %v2433_v2  ;;  %v2949_v9 = vpop.f32.mrb[10].mxu1 }
 0x3f1   : > { %v2538_v35 = vmax.f32 %v2442_v60, 0.0  ;;  %v2445_v8 = vadd.f32 %v2949_v9, %v4869_v4  ;;  %v2436_v29 = vpop.f32.mrb[11].mxu1 }
 0x3f2   : > { %v2536_v28 = vmax.f32 %v2434_v44, 0.0  ;;  %v2437_v54 = vadd.f32 %v4869_v4, %v2436_v29  ;;  %2631 = vst.msk [vmem:[%s4890_s7] sm:$0xff] %vm799_vm3, %v2623_v52 }
 0x3f3   : > { %v2539_v15 = vmax.f32 %v2445_v8, 0.0 }
 0x3f4   : > { %v2564_v55 = vmax.f32 %v2536_v28, %v2538_v35  ;;  %v2537_v30 = vmax.f32 %v2437_v54, 0.0 }
 0x3f6   : > { %2580 = vst.msk [vmem:[#allocation4 + $0x20] sm:$0xff] %vm799_vm3, %v2564_v55  ;;  %v2565_v43 = vmax.f32 %v2537_v30, %v2539_v15  ;;  %v2952_v57 = vpop.f32.mrb[12].mxu1 }
 0x3f7   : > { %v2594_v42 = vld [vmem:[#allocation4 + $0x10] ss:$2 sm:$0xff]  ;;  %v2610_v62 = vld [vmem:[#allocation4 + $0x11] ss:$2 sm:$0xff]  ;;  %v2458_v0 = vadd.f32 %v2952_v57, %v4869_v4  ;;  %v2449_v53 = vpop.f32.mrb[13].mxu1 }
 0x3f8   : > { %v2624_v63 = vmax.f32 %v2594_v42, %v2610_v62  ;;  %2581 = vst.msk [vmem:[#allocation4 + $0x28] sm:$0xff] %vm799_vm3, %v2565_v43  ;;  %v2450_v26 = vadd.f32 %v4869_v4, %v2449_v53  ;;  %v2953_v32 = vpop.f32.mrb[14].mxu1 }
 0x3f9   : > { %v2542_v25 = vmax.f32 %v2458_v0, 0.0  ;;  %v2461_v27 = vadd.f32 %v2953_v32, %v4869_v4  ;;  %v2452_v19 = vpop.f32.mrb[15].mxu1 }
 0x3fa   : > { %v2540_v14 = vmax.f32 %v2450_v26, 0.0  ;;  %v2453_v13 = vadd.f32 %v4869_v4, %v2452_v19  ;;  %2632 = vst.msk [vmem:[%s4890_s7 + $0x8] sm:$0xff] %vm799_vm3, %v2624_v63 }
 0x3fb   : > { %v2543_v33 = vmax.f32 %v2461_v27, 0.0 }
 0x3fc   : > { %v2566_v31 = vmax.f32 %v2540_v14, %v2542_v25  ;;  %v2541_v3 = vmax.f32 %v2453_v13, 0.0 }
 0x3fe   : > { %2582 = vst.msk [vmem:[#allocation4 + $0x30] sm:$0xff] %vm799_vm3, %v2566_v31  ;;  %v2567_v16 = vmax.f32 %v2541_v3, %v2543_v33  ;;  %v2956_v17 = vpop.f32.mrb[16].mxu1 }
 0x3ff   : > { %v2596_v46 = vld [vmem:[#allocation4 + $0x20] ss:$2 sm:$0xff]  ;;  %v2612_v51 = vld [vmem:[#allocation4 + $0x21] ss:$2 sm:$0xff]  ;;  %v2474_v58 = vadd.f32 %v2956_v17, %v4869_v4  ;;  %v2465_v50 = vpop.f32.mrb[17].mxu1 }
 0x400   : > { %v2625_v18 = vmax.f32 %v2596_v46, %v2612_v51  ;;  %2583 = vst.msk [vmem:[#allocation4 + $0x38] sm:$0xff] %vm799_vm3, %v2567_v16  ;;  %v2466_v34 = vadd.f32 %v4869_v4, %v2465_v50  ;;  %v2957_v45 = vpop.f32.mrb[18].mxu1 }
 0x401   : > { %v2546_v56 = vmax.f32 %v2474_v58, 0.0  ;;  %v2477_v20 = vadd.f32 %v2957_v45, %v4869_v4  ;;  %v2468_v6 = vpop.f32.mrb[19].mxu1 }
 0x402   : > { %v2544_v61 = vmax.f32 %v2466_v34, 0.0  ;;  %v2469_v7 = vadd.f32 %v4869_v4, %v2468_v6  ;;  %2633 = vst.msk [vmem:[%s4890_s7 + $0x10] sm:$0xff] %vm799_vm3, %v2625_v18 }
 0x403   : > { %v2547_v21 = vmax.f32 %v2477_v20, 0.0 }
 0x404   : > { %v2568_v37 = vmax.f32 %v2544_v61, %v2546_v56  ;;  %v2545_v36 = vmax.f32 %v2469_v7, 0.0 }
 0x406   : > { %2584 = vst.msk [vmem:[#allocation4 + $0x40] sm:$0xff] %vm799_vm3, %v2568_v37  ;;  %v2569_v22 = vmax.f32 %v2545_v36, %v2547_v21  ;;  %v2960_v38 = vpop.f32.mrb[20].mxu1 }
 0x407   : > { %v2598_v10 = vld [vmem:[#allocation4 + $0x30] ss:$2 sm:$0xff]  ;;  %v2614_v39 = vld [vmem:[#allocation4 + $0x31] ss:$2 sm:$0xff]  ;;  %v2490_v40 = vadd.f32 %v2960_v38, %v4869_v4  ;;  %v2481_v11 = vpop.f32.mrb[21].mxu1 }
 0x408   : > { %v2626_v41 = vmax.f32 %v2598_v10, %v2614_v39  ;;  %2585 = vst.msk [vmem:[#allocation4 + $0x48] sm:$0xff] %vm799_vm3, %v2569_v22  ;;  %v2482_v24 = vadd.f32 %v4869_v4, %v2481_v11  ;;  %v2961_v5 = vpop.f32.mrb[22].mxu1 }
 0x409   : > { %v2550_v23 = vmax.f32 %v2490_v40, 0.0  ;;  %v2493_v59 = vadd.f32 %v2961_v5, %v4869_v4  ;;  %v2484_v12 = vpop.f32.mrb[23].mxu1 }
 0x40a   : > { %v2548_v48 = vmax.f32 %v2482_v24, 0.0  ;;  %v2485_v49 = vadd.f32 %v4869_v4, %v2484_v12  ;;  %2634 = vst.msk [vmem:[%s4890_s7 + $0x18] sm:$0xff] %vm799_vm3, %v2626_v41 }
 0x40b   : > { %v2551_v1 = vmax.f32 %v2493_v59, 0.0 }
 0x40c   : > { %v2570_v47 = vmax.f32 %v2548_v48, %v2550_v23  ;;  %v2549_v60 = vmax.f32 %v2485_v49, 0.0 }
 0x40e   : > { %2586 = vst.msk [vmem:[#allocation4 + $0x50] sm:$0xff] %vm799_vm3, %v2570_v47  ;;  %v2571_v2 = vmax.f32 %v2549_v60, %v2551_v1 }
 0x40f   : > { %v2600_v52 = vld [vmem:[#allocation4 + $0x40] ss:$2 sm:$0xff]  ;;  %v2616_v44 = vld [vmem:[#allocation4 + $0x41] ss:$2 sm:$0xff] }
 0x410   : > { %v2627_v9 = vmax.f32 %v2600_v52, %v2616_v44  ;;  %2587 = vst.msk [vmem:[#allocation4 + $0x58] sm:$0xff] %vm799_vm3, %v2571_v2 }
 0x412   : > { %v2964_v35 = vpop.f32.mrb[24].mxu1  ;;  %2635 = vst.msk [vmem:[%s4890_s7 + $0x20] sm:$0xff] %vm799_vm3, %v2627_v9 }
 0x413   : > { %v2506_v8 = vadd.f32 %v2964_v35, %v4869_v4  ;;  %v2497_v29 = vpop.f32.mrb[25].mxu1 }
 0x414   : > { %v2498_v28 = vadd.f32 %v4869_v4, %v2497_v29  ;;  %v2965_v54 = vpop.f32.mrb[26].mxu1 }
 0x415   : > { %v2554_v15 = vmax.f32 %v2506_v8, 0.0  ;;  %v2509_v55 = vadd.f32 %v2965_v54, %v4869_v4  ;;  %v2500_v30 = vpop.f32.mrb[27].mxu1 }
 0x416   : > { %v2552_v43 = vmax.f32 %v2498_v28, 0.0  ;;  %v2501_v57 = vadd.f32 %v4869_v4, %v2500_v30 }
 0x417   : > { %v2602_v42 = vld [vmem:[#allocation4 + $0x50] ss:$2 sm:$0xff]  ;;  %v2618_v62 = vld [vmem:[#allocation4 + $0x51] ss:$2 sm:$0xff]  ;;  %v2555_v0 = vmax.f32 %v2509_v55, 0.0 }
 0x418   : > { %v2628_v53 = vmax.f32 %v2602_v42, %v2618_v62  ;;  %v2572_v63 = vmax.f32 %v2552_v43, %v2554_v15  ;;  %v2553_v26 = vmax.f32 %v2501_v57, 0.0 }
 0x41a   : > { %2588 = vst.msk [vmem:[#allocation4 + $0x60] sm:$0xff] %vm799_vm3, %v2572_v63  ;;  %v2573_v32 = vmax.f32 %v2553_v26, %v2555_v0  ;;  %v2968_v25 = vpop.f32.mrb[28].mxu1  ;;  %2636 = vst.msk [vmem:[%s4890_s7 + $0x28] sm:$0xff] %vm799_vm3, %v2628_v53 }
 0x41b   : > { %v2522_v27 = vadd.f32 %v2968_v25, %v4869_v4  ;;  %v2513_v19 = vpop.f32.mrb[29].mxu1 }
 0x41c   : > { %2589 = vst.msk [vmem:[#allocation4 + $0x68] sm:$0xff] %vm799_vm3, %v2573_v32  ;;  %v2514_v14 = vadd.f32 %v4869_v4, %v2513_v19  ;;  %v2969_v13 = vpop.f32.mrb[30].mxu1 }
 0x41d   : > { %v2558_v33 = vmax.f32 %v2522_v27, 0.0  ;;  %v2525_v31 = vadd.f32 %v2969_v13, %v4869_v4  ;;  %v2516_v3 = vpop.f32.mrb[31].mxu1 }
 0x41e   : > { %v2556_v16 = vmax.f32 %v2514_v14, 0.0  ;;  %v2517_v17 = vadd.f32 %v4869_v4, %v2516_v3 }
 0x41f   : > { %v2559_v46 = vmax.f32 %v2525_v31, 0.0 }
 0x420   : > { %v2574_v51 = vmax.f32 %v2556_v16, %v2558_v33  ;;  %v2557_v58 = vmax.f32 %v2517_v17, 0.0 }
 0x422   : > { %2590 = vst.msk [vmem:[#allocation4 + $0x70] sm:$0xff] %vm799_vm3, %v2574_v51  ;;  %v2575_v50 = vmax.f32 %v2557_v58, %v2559_v46 }
 0x423   : > { %v2604_v18 = vld [vmem:[#allocation4 + $0x60] ss:$2 sm:$0xff]  ;;  %v2620_v34 = vld [vmem:[#allocation4 + $0x61] ss:$2 sm:$0xff] }
 0x424   : > { %v2629_v45 = vmax.f32 %v2604_v18, %v2620_v34  ;;  %2591 = vst.msk [vmem:[#allocation4 + $0x78] sm:$0xff] %vm799_vm3, %v2575_v50 }
 0x426   : > { %2637 = vst.msk [vmem:[%s4890_s7 + $0x30] sm:$0xff] %vm799_vm3, %v2629_v45 }
 0x42b   : > { %v2606_v56 = vld [vmem:[#allocation4 + $0x70] ss:$2 sm:$0xff]  ;;  %v2622_v4 = vld [vmem:[#allocation4 + $0x71] ss:$2 sm:$0xff] }
 0x42c   : > { %v2630_v20 = vmax.f32 %v2606_v56, %v2622_v4 }
 0x42e   : > { %2638 = vst.msk [vmem:[%s4890_s7 + $0x38] sm:$0xff] %vm799_vm3, %v2630_v20 }
 0x42f   : > { %3720 = shalt.err (!%p3717_p3)
}
 0x430   : > { %s3721_s23 = scalar_lea.hbm %s4943_s13, 1024  ;;  %s3725_s30 = scalar_lea.hbm %s4998_s5, 2048 }
 0x431   : > { %p3722_p4 = scmp.ne.s32.totalorder %s4943_s13, %s3721_s23  ;;  %p3726_p9 = scmp.lt.u32.totalorder %s4943_s13, %s4998_s5 }
 0x432   : > { %p3727_p10 = scmp.lt.u32.totalorder %s3725_s30, %s3721_s23  ;;  %p3729_p12 = scmp.lt.u32.totalorder %s3721_s23, %s4943_s13 }
 0x433   : > { %p3723_p7 = pnand %p3722_p4, %p3848_p5 }
 0x434   : > { %p3728_p11 = por %p3727_p10, %p3726_p9 }
 0x435   : > { %p3724_p8 = pneg %p3723_p7 }
 0x436   : > { %p3730_p13 = por %p3729_p12, %p3728_p11 }
 0x438   : > { %p3731_p0 = pnand %p3730_p13, %p3724_p8 }
 0x43a   : > { %3734 = shalt.err (!%p3731_p0)
}
 0x43b   : > { %s3779_s8 = smov 128  }
 0x43c   : > { %2972 = dma.vmem_to_hbm [thread:$0]  (%p3848_p5), %s4945_s9, 1024, %s4943_s13, %s4951_s14, %s3779_s8, %s3779_s8, %s3772_s10  }
 0x43d PF: > { %p2978_p1 = scmp.ge.s32.totalorder %s3769_s21, 2  ;;  %s2668_s11 = sand.u32 1, %s3757_s18  }
 0x43e   : > { %s2669_s12 = scalar_lea.sflag [#allocation6], %s2668_s11 }
 0x43f   : > { %p2975_p2 = pnand %p2978_p1, %p3852_p6 }
 0x441   : > { %3752 = dma.done.wait (!%p2975_p2), %s2669_s12, 1024  }
 0x442   : > { %3754 = vsyncadd (!%p2975_p2), %s2669_s12, 4294966272  ;;  %p15_p3 = scmp.ge.s32.totalorder %s3835_s24, 4   ;;  %s5001_s18 = smov %s3761_s19 }
 0x443   : > { %s5002_s19 = smov %s3765_s20  ;;  %s5003_s20 = smov %s3846_s27 }
 0x444   : > { %s5004_s21 = smov %s3835_s24  ;;  %17 = sbr.rel (!%p15_p3) target bundleno = 3 (0x3), region = 94 }
 0x44b   :  { %2674 = vsyncpa [#allocation6], 1 }
 0x44c   :  { %2676 = vsyncpa [#allocation6 + $0x1], 1 }

</bundles_post_ra>
